<compile_context>
chip_gen: v7x
topology: tpu7x:2x2x1
jax: 0.10.0
libtpu: 0.0.40
codegen_flags: <defaults>
</compile_context>

<pallas_src>
import functools
import math

import jax
import jax.numpy as jnp
from jax import lax
from jax.experimental import pallas as pl
from jax.experimental.pallas import tpu as pltpu


def _round_up(x, n):
    return (x + n - 1) // n * n


def _silu(x):
    return x * jax.nn.sigmoid(x)


# --------------------------------------------------------------------------
# Kernel 1: EMA gating + one fused [Q|K|V|F|I|C] projection for one row tile.
# --------------------------------------------------------------------------
def encode_kernel(r_ref, r_prev_ref,
                  wp_ad_ref, wt_ad_ref, b_ad_ref,
                  w_ema_ref, b_ema_ref,
                  w_big_ref, b_big_ref,
                  q_ref, kT_ref, v_ref, fic_ref,
                  *, rp, ap):
    r_t = r_ref[...]                      # (tm, rp) f32
    r_prev = r_prev_ref[...]              # (tm, rp) f32
    r_t_bf = r_t.astype(jnp.bfloat16)
    r_prev_bf = r_prev.astype(jnp.bfloat16)

    # Fused [alpha | delta] pre-activations: split-K over [r_prev, r_t]
    # (avoids an in-kernel lane concat), one pair of wide (N = 2*rp) dots.
    ad = (jnp.dot(r_prev_bf, wp_ad_ref[...], preferred_element_type=jnp.float32)
          + jnp.dot(r_t_bf, wt_ad_ref[...], preferred_element_type=jnp.float32)
          + b_ad_ref[...])
    alpha_t = jnp.tanh(ad[:, :rp])
    delta_t = jnp.tanh(ad[:, rp:])

    r_ema = alpha_t * r_t + (1.0 - alpha_t) * delta_t * r_prev      # f32 gating

    r_ema_p = _silu(
        jnp.dot(r_ema.astype(jnp.bfloat16), w_ema_ref[...],
                preferred_element_type=jnp.float32) + b_ema_ref[...])

    # One fused projection: [Q | K | V | F | I | C]  (N = 4*ap + 2*rp).
    # The softmax scale is already folded into the Q band at pack time.
    proj = (jnp.dot(r_ema_p.astype(jnp.bfloat16), w_big_ref[...],
                    preferred_element_type=jnp.float32) + b_big_ref[...])

    o_k, o_v, o_f, o_c = ap, 2 * ap, 3 * ap, 4 * ap + rp

    # Lane-aligned band stores (bf16 for the MXU-only bands, f32 for gates).
    q_ref[...] = proj[:, :o_k].astype(q_ref.dtype)                 # Q (scaled)
    kT_ref[...] = proj[:, o_k:o_v].T.astype(kT_ref.dtype)          # K^T (ap, tm)
    v_ref[...] = proj[:, o_v:o_f].astype(v_ref.dtype)              # V
    fic_ref[:, :ap + rp] = jax.nn.sigmoid(proj[:, o_f:o_c])        # f and i gates
    fic_ref[:, ap + rp:] = proj[:, o_c:]                           # c1 = R' W_EMA_c + b_C


# --------------------------------------------------------------------------
# Kernel 2: attention with K^T / V fully VMEM-resident + output gating.
# --------------------------------------------------------------------------
def attend_kernel(q_ref, kT_ref, v_ref, fic_ref, r_ref,
                  w_zc_ref, w_ot_ref, b_o_ref,
                  out_ref,
                  *, rp, ap):
    # Scores: (tq, m).  Scale pre-folded into W_q/b_q; K already transposed.
    s = jnp.dot(q_ref[...], kT_ref[...], preferred_element_type=jnp.float32)
    s_max = jnp.max(s, axis=-1, keepdims=True)
    p = jnp.exp(s - s_max)
    denom = jnp.sum(p, axis=-1, keepdims=True)
    z_ema = jnp.dot(p.astype(jnp.bfloat16), v_ref[...],
                    preferred_element_type=jnp.float32)
    z_ema = z_ema * pl.reciprocal(denom, approx=True)               # (tq, ap)

    fic = fic_ref[...]
    f = fic[:, :ap]                        # sigmoid(f) already applied
    i = fic[:, ap:ap + rp]                 # sigmoid(i) already applied
    c1 = fic[:, ap + rp:]                  # R' @ W_EMA_c + b_C

    z_ema_f = f * z_ema
    z_c = _silu(c1 + jnp.dot(z_ema_f.astype(jnp.bfloat16), w_zc_ref[...],
                             preferred_element_type=jnp.float32))
    r_h = i * z_c + (1.0 - i) * r_ref[...]
    r_cap = jnp.dot(r_h.astype(jnp.bfloat16), w_ot_ref[...],
                    preferred_element_type=jnp.float32) + b_o_ref[...]
    out_ref[...] = jax.nn.sigmoid(r_cap).astype(out_ref.dtype)


# --------------------------------------------------------------------------
# One-time weight packing (hoisted OUT of the per-call forward).
# --------------------------------------------------------------------------
def pack_params(params, *, r_dim, p_dim, at_dim, o_dim):
    f32, bf16 = jnp.float32, jnp.bfloat16
    rp = _round_up(r_dim, 128)
    pp = _round_up(p_dim, 128)
    ap = _round_up(at_dim, 128)
    op = _round_up(o_dim, 128)
    scale = 1.0 / math.sqrt(float(at_dim))

    def z(shape):
        return jnp.zeros(shape, f32)

    # Fused [alpha|delta] weights, split by the [r_prev | r_t] input halves.
    W_a, W_d = params["W_alpha"], params["W_delta"]
    wp_ad = (z((rp, 2 * rp))
             .at[:r_dim, :r_dim].set(W_a[:, :r_dim].T)
             .at[:r_dim, rp:rp + r_dim].set(W_d[:, :r_dim].T)).astype(bf16)
    wt_ad = (z((rp, 2 * rp))
             .at[:r_dim, :r_dim].set(W_a[:, r_dim:].T)
             .at[:r_dim, rp:rp + r_dim].set(W_d[:, r_dim:].T)).astype(bf16)
    b_ad = (z((1, 2 * rp))
            .at[0, :r_dim].set(params["b_alpha"])
            .at[0, rp:rp + r_dim].set(params["b_delta"]))

    w_ema = z((rp, pp)).at[:r_dim, :p_dim].set(params["W_EMA"].T).astype(bf16)
    b_ema = z((1, pp)).at[0, :p_dim].set(params["b_EMA"])

    # Fused [Q | K | V | F | I | C] projection; softmax scale folded into Q.
    big_w = 4 * ap + 2 * rp
    o_k, o_v, o_f, o_i, o_c = ap, 2 * ap, 3 * ap, 4 * ap, 4 * ap + rp
    w_big = (z((pp, big_w))
             .at[:p_dim, :at_dim].set(params["W_q"].T * scale)
             .at[:p_dim, o_k:o_k + at_dim].set(params["W_k"].T)
             .at[:p_dim, o_v:o_v + at_dim].set(params["W_v"].T)
             .at[:p_dim, o_f:o_f + at_dim].set(params["W_f"].T)
             .at[:p_dim, o_i:o_i + r_dim].set(params["W_i"].T)
             .at[:p_dim, o_c:o_c + r_dim].set(params["W_EMA_c"])).astype(bf16)
    b_big = (z((1, big_w))
             .at[0, :at_dim].set(params["b_q"] * scale)
             .at[0, o_k:o_k + at_dim].set(params["b_k"])
             .at[0, o_v:o_v + at_dim].set(params["b_v"])
             .at[0, o_f:o_f + at_dim].set(params["b_f"])
             .at[0, o_i:o_i + r_dim].set(params["b_i"])
             .at[0, o_c:o_c + r_dim].set(params["b_C"]))

    w_zc = z((ap, rp)).at[:at_dim, :r_dim].set(params["W_z_C"]).astype(bf16)
    w_ot = z((rp, op)).at[:r_dim, :o_dim].set(params["W_o"].T).astype(bf16)
    b_o = z((1, op)).at[0, :o_dim].set(params["b_o"])

    return dict(wp_ad=wp_ad, wt_ad=wt_ad, b_ad=b_ad, w_ema=w_ema, b_ema=b_ema,
                w_big=w_big, b_big=b_big, w_zc=w_zc, w_ot=w_ot, b_o=b_o)


# --------------------------------------------------------------------------
# Forward: pad R, launch the two kernels (weights already packed).
# --------------------------------------------------------------------------
@functools.partial(jax.jit,
                   static_argnames=("r_dim", "p_dim", "at_dim", "o_dim", "tile_m"))
def mega_decoder_forward(R, packed, *, r_dim, p_dim, at_dim, o_dim, tile_m=128):
    f32, bf16 = jnp.float32, jnp.bfloat16
    m = R.shape[0]
    rp = _round_up(r_dim, 128)
    pp = _round_up(p_dim, 128)
    ap = _round_up(at_dim, 128)
    op = _round_up(o_dim, 128)
    tm = min(tile_m, m)
    assert m % tm == 0, "sequence length must be divisible by the row tile"
    n_row = m // tm
    big_w = 4 * ap + 2 * rp
    fic_w = ap + 2 * rp

    R_pad = jnp.pad(R.astype(f32), ((0, 0), (0, rp - r_dim)))
    # r_prev = R shifted down by one row, zero row 0 (single small HBM pass).
    R_prev = jnp.pad(R_pad[:-1], ((1, 0), (0, 0)))

    # Explicit VMEM budgets (double-buffered tiles + resident arrays + headroom),
    # capped at v7x's 64 MiB physical VMEM, never set below the 32 MiB default.
    def vmem_limit(nbytes):
        return int(min(max(nbytes + (8 << 20), 32 << 20), 64 << 20))

    enc_bytes = (2 * (2 * tm * rp * 4 + 3 * tm * ap * 2 + tm * fic_w * 4)
                 + 2 * (2 * rp * 2 * rp * 2 + rp * pp * 2 + pp * big_w * 2)
                 + 2 * (2 * rp + pp + big_w) * 4)
    att_bytes = (2 * ap * m * 2                                  # resident K^T + V
                 + 2 * (tm * ap * 2 + tm * fic_w * 4 + tm * rp * 4 + tm * op * 4)
                 + 2 * (ap * rp * 2 + rp * op * 2 + op * 4)
                 + tm * m * 4)                                   # live score tile

    def row(width):
        return pl.BlockSpec((tm, width), lambda i: (i, 0))

    def res(shape):
        return pl.BlockSpec(shape, lambda i: (0, 0))

    # ------------------------- kernel 1: encode ----------------------------
    q_bf, kT_bf, v_bf, fic = pl.pallas_call(
        functools.partial(encode_kernel, rp=rp, ap=ap),
        out_shape=(jax.ShapeDtypeStruct((m, ap), bf16),      # Q (scaled)
                   jax.ShapeDtypeStruct((ap, m), bf16),      # K^T
                   jax.ShapeDtypeStruct((m, ap), bf16),      # V
                   jax.ShapeDtypeStruct((m, fic_w), f32)),   # [f | i | c1]
        grid_spec=pltpu.PrefetchScalarGridSpec(
            num_scalar_prefetch=0,
            grid=(n_row,),
            in_specs=[
                row(rp), row(rp),
                res((rp, 2 * rp)), res((rp, 2 * rp)), res((1, 2 * rp)),
                res((rp, pp)), res((1, pp)),
                res((pp, big_w)), res((1, big_w)),
            ],
            out_specs=[row(ap),
                       pl.BlockSpec((ap, tm), lambda i: (0, i)),
                       row(ap),
                       row(fic_w)],
        ),
        compiler_params=pltpu.CompilerParams(
            dimension_semantics=("parallel",),
            vmem_limit_bytes=vmem_limit(enc_bytes)),
    )(R_pad, R_prev,
      packed["wp_ad"], packed["wt_ad"], packed["b_ad"],
      packed["w_ema"], packed["b_ema"], packed["w_big"], packed["b_big"])

    # ----------------- kernel 2: resident-KV attention + output ------------
    out_pad = pl.pallas_call(
        functools.partial(attend_kernel, rp=rp, ap=ap),
        out_shape=jax.ShapeDtypeStruct((m, op), f32),
        grid_spec=pltpu.PrefetchScalarGridSpec(
            num_scalar_prefetch=0,
            grid=(n_row,),
            in_specs=[
                row(ap),                 # Q tile
                res((ap, m)),            # K^T resident (fetched once)
                res((m, ap)),            # V resident (fetched once)
                row(fic_w),              # [f | i | c1] tile
                row(rp),                 # R tile
                res((ap, rp)), res((rp, op)), res((1, op)),
            ],
            out_specs=row(op),
        ),
        compiler_params=pltpu.CompilerParams(
            dimension_semantics=("parallel",),
            vmem_limit_bytes=vmem_limit(att_bytes)),
    )(q_bf, kT_bf, v_bf, fic, R_pad,
      packed["w_zc"], packed["w_ot"], packed["b_o"])

    return out_pad[:, :o_dim]


# --------------------------------------------------------------------------
# Pure-JAX reference (mirrors the PyTorch forward exactly, fp32).
# --------------------------------------------------------------------------
def mega_decoder_ref(R, params, *, r_dim, at_dim):
    R_1 = jnp.concatenate([jnp.zeros((1, r_dim), R.dtype), R], axis=0)
    r_t = R_1[1:]
    r_prev = R_1[:-1]
    concat_r = jnp.concatenate([r_prev, r_t], axis=1)

    def linear(x, W, b):
        return x @ W.T + b

    alpha_t = jnp.tanh(linear(concat_r, params["W_alpha"], params["b_alpha"]))
    delta_t = jnp.tanh(linear(concat_r, params["W_delta"], params["b_delta"]))
    r_ema = alpha_t * r_t + (1 - alpha_t) * delta_t * r_prev
    silu = lambda x: x * jax.nn.sigmoid(x)
    r_ema_p = silu(linear(r_ema, params["W_EMA"], params["b_EMA"]))
    Q = linear(r_ema_p, params["W_q"], params["b_q"])
    K = linear(r_ema_p, params["W_k"], params["b_k"])
    V = linear(r_ema_p, params["W_v"], params["b_v"])
    scores = (Q @ K.T) / jnp.sqrt(jnp.float32(at_dim))
    w = jax.nn.softmax(scores, axis=-1)
    z_ema = w @ V
    f = jax.nn.sigmoid(linear(r_ema_p, params["W_f"], params["b_f"]))
    z_ema_f = f * z_ema
    z_ema_c = silu(r_ema_p @ params["W_EMA_c"] + z_ema_f @ params["W_z_C"] + params["b_C"])
    i = jax.nn.sigmoid(linear(r_ema_p, params["W_i"], params["b_i"]))
    r_h = i * z_ema_c + (1 - i) * R
    r_cap = linear(r_h, params["W_o"], params["b_o"])
    return jax.nn.sigmoid(r_cap)


def xavier_uniform(key, shape):
    fan_out, fan_in = shape
    bound = math.sqrt(6.0 / (fan_in + fan_out))
    return jax.random.uniform(key, shape, jnp.float32, -bound, bound)


def init_params(key, r_dim, p_dim, at_dim, o_dim):
    keys = jax.random.split(key, 11)
    return {
        "W_alpha": xavier_uniform(keys[0], (r_dim, r_dim * 2)),
        "b_alpha": jnp.zeros((r_dim,), jnp.float32),
        "W_delta": xavier_uniform(keys[1], (r_dim, r_dim * 2)),
        "b_delta": jnp.zeros((r_dim,), jnp.float32),
        "W_EMA": xavier_uniform(keys[2], (p_dim, r_dim)),
        "b_EMA": jnp.zeros((p_dim,), jnp.float32),
        "W_q": xavier_uniform(keys[3], (at_dim, p_dim)),
        "b_q": jnp.zeros((at_dim,), jnp.float32),
        "W_k": xavier_uniform(keys[4], (at_dim, p_dim)),
        "b_k": jnp.zeros((at_dim,), jnp.float32),
        "W_v": xavier_uniform(keys[5], (at_dim, p_dim)),
        "b_v": jnp.zeros((at_dim,), jnp.float32),
        "W_f": xavier_uniform(keys[6], (at_dim, p_dim)),
        "b_f": jnp.zeros((at_dim,), jnp.float32),
        "W_EMA_c": xavier_uniform(keys[7], (p_dim, r_dim)),
        "W_z_C": xavier_uniform(keys[8], (at_dim, r_dim)),
        "b_C": jnp.zeros((r_dim,), jnp.float32),
        "W_i": xavier_uniform(keys[9], (r_dim, p_dim)),
        "b_i": jnp.zeros((r_dim,), jnp.float32),
        "W_o": xavier_uniform(keys[10], (o_dim, r_dim)),
        "b_o": jnp.zeros((o_dim,), jnp.float32),
    }


if __name__ == "__main__":
    # r_size is a module hyperparameter unused in forward(); kept for parity.
    r_dim, r_size, p_dim, at_dim, o_dim = 32, 4, 32, 32, 16
    m_size = 256   # two 128-row tiles -> exercises the row grid + resident KV

    key = jax.random.PRNGKey(0)
    k_par, k_in = jax.random.split(key)
    params = init_params(k_par, r_dim, p_dim, at_dim, o_dim)
    R = jax.random.normal(k_in, (m_size, r_dim), jnp.float32)

    # One-time weight packing, outside the per-call jitted forward.
    packed = pack_params(params, r_dim=r_dim, p_dim=p_dim, at_dim=at_dim, o_dim=o_dim)
    packed = jax.tree_util.tree_map(jax.block_until_ready, packed)

    out = mega_decoder_forward(R, packed, r_dim=r_dim, p_dim=p_dim,
                               at_dim=at_dim, o_dim=o_dim, tile_m=128)
    out = jax.block_until_ready(out)

    ref = mega_decoder_ref(R, params, r_dim=r_dim, at_dim=at_dim)
    assert out.shape == (m_size, o_dim)
    max_err = float(jnp.max(jnp.abs(out - ref)))
    # bf16 MXU operands + approx reciprocal -> relaxed tolerance vs fp32 reference.
    assert max_err < 3e-2, f"mismatch vs pure-JAX reference, max abs err={max_err}"

    print("KERNEL_OK")
</pallas_src>

<mosaic_0001>
module attributes {stable_mosaic.version = 11 : i64} {
  func.func @attend_kernel(%arg0: i32, %arg1: memref<128x128xbf16, #tpu.memory_space<vmem>>, %arg2: memref<128x256xbf16, #tpu.memory_space<vmem>>, %arg3: memref<256x128xbf16, #tpu.memory_space<vmem>>, %arg4: memref<128x384xf32, #tpu.memory_space<vmem>>, %arg5: memref<128x128xf32, #tpu.memory_space<vmem>>, %arg6: memref<128x128xbf16, #tpu.memory_space<vmem>>, %arg7: memref<128x128xbf16, #tpu.memory_space<vmem>>, %arg8: memref<1x128xf32, #tpu.memory_space<vmem>>, %arg9: memref<128x128xf32, #tpu.memory_space<vmem>>) attributes {dimension_semantics = [#tpu.dimension_semantics<parallel>], iteration_bounds = array<i64: 2>, scalar_prefetch = 0 : i64, scratch_operands = 0 : i64, tpu.core_type = #tpu.core_type<tc>, window_params = [{transform_indices = @transform_0, window_bounds = array<i64: 128, 128>}, {pipeline_mode = #tpu.pipeline_mode<synchronous>, transform_indices = @transform_1, window_bounds = array<i64: 128, 256>}, {pipeline_mode = #tpu.pipeline_mode<synchronous>, transform_indices = @transform_2, window_bounds = array<i64: 256, 128>}, {transform_indices = @transform_3, window_bounds = array<i64: 128, 384>}, {transform_indices = @transform_4, window_bounds = array<i64: 128, 128>}, {pipeline_mode = #tpu.pipeline_mode<synchronous>, transform_indices = @transform_5, window_bounds = array<i64: 128, 128>}, {pipeline_mode = #tpu.pipeline_mode<synchronous>, transform_indices = @transform_6, window_bounds = array<i64: 128, 128>}, {pipeline_mode = #tpu.pipeline_mode<synchronous>, transform_indices = @transform_7, window_bounds = array<i64: 1, 128>}, {transform_indices = @transform_8, window_bounds = array<i64: 128, 128>}]} {
    %c0 = arith.constant 0 : index
    %c0_0 = arith.constant 0 : index
    %0 = vector.load %arg1[%c0, %c0_0] : memref<128x128xbf16, #tpu.memory_space<vmem>>, vector<128x128xbf16>
    %c0_1 = arith.constant 0 : index
    %c0_2 = arith.constant 0 : index
    %1 = vector.load %arg2[%c0_1, %c0_2] : memref<128x256xbf16, #tpu.memory_space<vmem>>, vector<128x256xbf16>
    %cst = arith.constant dense<0.000000e+00> : vector<128x256xf32>
    %2 = tpu.matmul %0, %1, %cst {dimension_numbers = #tpu.dot_dimension_numbers<[1], [0], [0], [1], [0, 0, 1, 1], [], []>} : vector<128x128xbf16>, vector<128x256xbf16>, vector<128x256xf32> -> vector<128x256xf32>
    %cst_3 = arith.constant dense<0xFF800000> : vector<128xf32>
    %3 = vector.multi_reduction <maximumf>, %2, %cst_3 [1] : vector<128x256xf32> to vector<128xf32>
    %4 = vector.shape_cast %3 : vector<128xf32> to vector<128x1xf32>
    %5 = vector.broadcast %4 : vector<128x1xf32> to vector<128x256xf32>
    %6 = arith.subf %2, %5 : vector<128x256xf32>
    %7 = math.exp %6 : vector<128x256xf32>
    %cst_4 = arith.constant dense<0.000000e+00> : vector<128xf32>
    %8 = vector.multi_reduction <add>, %7, %cst_4 [1] : vector<128x256xf32> to vector<128xf32>
    %9 = vector.shape_cast %8 : vector<128xf32> to vector<128x1xf32>
    %10 = arith.truncf %7 : vector<128x256xf32> to vector<128x256xbf16>
    %c0_5 = arith.constant 0 : index
    %c0_6 = arith.constant 0 : index
    %11 = vector.load %arg3[%c0_5, %c0_6] : memref<256x128xbf16, #tpu.memory_space<vmem>>, vector<256x128xbf16>
    %cst_7 = arith.constant dense<0.000000e+00> : vector<128x128xf32>
    %12 = tpu.matmul %10, %11, %cst_7 {dimension_numbers = #tpu.dot_dimension_numbers<[1], [0], [0], [1], [0, 0, 1, 1], [], []>} : vector<128x256xbf16>, vector<256x128xbf16>, vector<128x128xf32> -> vector<128x128xf32>
    %13 = tpu.reciprocal %9 {approx = true} : vector<128x1xf32> -> vector<128x1xf32>
    %14 = vector.broadcast %13 : vector<128x1xf32> to vector<128x128xf32>
    %15 = arith.mulf %12, %14 : vector<128x128xf32>
    %c0_8 = arith.constant 0 : index
    %c0_9 = arith.constant 0 : index
    %16 = vector.load %arg4[%c0_8, %c0_9] : memref<128x384xf32, #tpu.memory_space<vmem>>, vector<128x384xf32>
    %17 = vector.extract_strided_slice %16 {offsets = [0, 0], sizes = [128, 128], strides = [1, 1]} : vector<128x384xf32> to vector<128x128xf32>
    %18 = vector.extract_strided_slice %16 {offsets = [0, 128], sizes = [128, 128], strides = [1, 1]} : vector<128x384xf32> to vector<128x128xf32>
    %19 = vector.extract_strided_slice %16 {offsets = [0, 256], sizes = [128, 128], strides = [1, 1]} : vector<128x384xf32> to vector<128x128xf32>
    %20 = arith.mulf %17, %15 : vector<128x128xf32>
    %21 = arith.truncf %20 : vector<128x128xf32> to vector<128x128xbf16>
    %c0_10 = arith.constant 0 : index
    %c0_11 = arith.constant 0 : index
    %22 = vector.load %arg6[%c0_10, %c0_11] : memref<128x128xbf16, #tpu.memory_space<vmem>>, vector<128x128xbf16>
    %cst_12 = arith.constant dense<0.000000e+00> : vector<128x128xf32>
    %23 = tpu.matmul %21, %22, %cst_12 {dimension_numbers = #tpu.dot_dimension_numbers<[1], [0], [0], [1], [0, 0, 1, 1], [], []>} : vector<128x128xbf16>, vector<128x128xbf16>, vector<128x128xf32> -> vector<128x128xf32>
    %24 = arith.addf %19, %23 : vector<128x128xf32>
    %25 = arith.negf %24 : vector<128x128xf32>
    %26 = math.exp %25 : vector<128x128xf32>
    %cst_13 = arith.constant 1.000000e+00 : f32
    %27 = vector.broadcast %cst_13 : f32 to vector<128x128xf32>
    %28 = arith.addf %27, %26 : vector<128x128xf32>
    %29 = arith.divf %27, %28 : vector<128x128xf32>
    %30 = arith.mulf %24, %29 : vector<128x128xf32>
    %31 = arith.mulf %18, %30 : vector<128x128xf32>
    %cst_14 = arith.constant 1.000000e+00 : f32
    %32 = vector.broadcast %cst_14 : f32 to vector<128x128xf32>
    %33 = arith.subf %32, %18 : vector<128x128xf32>
    %c0_15 = arith.constant 0 : index
    %c0_16 = arith.constant 0 : index
    %34 = vector.load %arg5[%c0_15, %c0_16] : memref<128x128xf32, #tpu.memory_space<vmem>>, vector<128x128xf32>
    %35 = arith.mulf %33, %34 : vector<128x128xf32>
    %36 = arith.addf %31, %35 : vector<128x128xf32>
    %37 = arith.truncf %36 : vector<128x128xf32> to vector<128x128xbf16>
    %c0_17 = arith.constant 0 : index
    %c0_18 = arith.constant 0 : index
    %38 = vector.load %arg7[%c0_17, %c0_18] : memref<128x128xbf16, #tpu.memory_space<vmem>>, vector<128x128xbf16>
    %cst_19 = arith.constant dense<0.000000e+00> : vector<128x128xf32>
    %39 = tpu.matmul %37, %38, %cst_19 {dimension_numbers = #tpu.dot_dimension_numbers<[1], [0], [0], [1], [0, 0, 1, 1], [], []>} : vector<128x128xbf16>, vector<128x128xbf16>, vector<128x128xf32> -> vector<128x128xf32>
    %c0_20 = arith.constant 0 : index
    %c0_21 = arith.constant 0 : index
    %40 = vector.load %arg8[%c0_20, %c0_21] : memref<1x128xf32, #tpu.memory_space<vmem>>, vector<1x128xf32>
    %41 = vector.broadcast %40 : vector<1x128xf32> to vector<128x128xf32>
    %42 = arith.addf %39, %41 : vector<128x128xf32>
    %43 = arith.negf %42 : vector<128x128xf32>
    %44 = math.exp %43 : vector<128x128xf32>
    %cst_22 = arith.constant 1.000000e+00 : f32
    %45 = vector.broadcast %cst_22 : f32 to vector<128x128xf32>
    %46 = arith.addf %45, %44 : vector<128x128xf32>
    %47 = arith.divf %45, %46 : vector<128x128xf32>
    %c0_23 = arith.constant 0 : index
    %c0_24 = arith.constant 0 : index
    %48 = vector.load %arg9[%c0_23, %c0_24] : memref<128x128xf32, #tpu.memory_space<vmem>>, vector<128x128xf32>
    tpu.vector_store %arg9[%c0_23, %c0_24], %47 {strides = array<i32>} : memref<128x128xf32, #tpu.memory_space<vmem>>, vector<128x128xf32>,
    return
  }
  func.func @transform_0(%arg0: i32) -> (i32, i32) {
    %c0_i32 = arith.constant 0 : i32
    %c0_i32_0 = arith.constant 0 : i32
    return %arg0, %c0_i32 : i32, i32
  }
  func.func @transform_1(%arg0: i32) -> (i32, i32) {
    %c0_i32 = arith.constant 0 : i32
    %c0_i32_0 = arith.constant 0 : i32
    %c0_i32_1 = arith.constant 0 : i32
    return %c0_i32, %c0_i32_0 : i32, i32
  }
  func.func @transform_2(%arg0: i32) -> (i32, i32) {
    %c0_i32 = arith.constant 0 : i32
    %c0_i32_0 = arith.constant 0 : i32
    %c0_i32_1 = arith.constant 0 : i32
    return %c0_i32, %c0_i32_0 : i32, i32
  }
  func.func @transform_3(%arg0: i32) -> (i32, i32) {
    %c0_i32 = arith.constant 0 : i32
    %c0_i32_0 = arith.constant 0 : i32
    return %arg0, %c0_i32 : i32, i32
  }
  func.func @transform_4(%arg0: i32) -> (i32, i32) {
    %c0_i32 = arith.constant 0 : i32
    %c0_i32_0 = arith.constant 0 : i32
    return %arg0, %c0_i32 : i32, i32
  }
  func.func @transform_5(%arg0: i32) -> (i32, i32) {
    %c0_i32 = arith.constant 0 : i32
    %c0_i32_0 = arith.constant 0 : i32
    %c0_i32_1 = arith.constant 0 : i32
    return %c0_i32, %c0_i32_0 : i32, i32
  }
  func.func @transform_6(%arg0: i32) -> (i32, i32) {
    %c0_i32 = arith.constant 0 : i32
    %c0_i32_0 = arith.constant 0 : i32
    %c0_i32_1 = arith.constant 0 : i32
    return %c0_i32, %c0_i32_0 : i32, i32
  }
  func.func @transform_7(%arg0: i32) -> (i32, i32) {
    %c0_i32 = arith.constant 0 : i32
    %c0_i32_0 = arith.constant 0 : i32
    %c0_i32_1 = arith.constant 0 : i32
    return %c0_i32, %c0_i32_0 : i32, i32
  }
  func.func @transform_8(%arg0: i32) -> (i32, i32) {
    %c0_i32 = arith.constant 0 : i32
    %c0_i32_0 = arith.constant 0 : i32
    return %arg0, %c0_i32 : i32, i32
  }
}

module attributes {stable_mosaic.version = 11 : i64} {
  func.func @encode_kernel(%arg0: i32, %arg1: memref<128x128xf32, #tpu.memory_space<vmem>>, %arg2: memref<128x128xf32, #tpu.memory_space<vmem>>, %arg3: memref<128x256xbf16, #tpu.memory_space<vmem>>, %arg4: memref<128x256xbf16, #tpu.memory_space<vmem>>, %arg5: memref<1x256xf32, #tpu.memory_space<vmem>>, %arg6: memref<128x128xbf16, #tpu.memory_space<vmem>>, %arg7: memref<1x128xf32, #tpu.memory_space<vmem>>, %arg8: memref<128x768xbf16, #tpu.memory_space<vmem>>, %arg9: memref<1x768xf32, #tpu.memory_space<vmem>>, %arg10: memref<128x128xbf16, #tpu.memory_space<vmem>>, %arg11: memref<128x128xbf16, #tpu.memory_space<vmem>>, %arg12: memref<128x128xbf16, #tpu.memory_space<vmem>>, %arg13: memref<128x384xf32, #tpu.memory_space<vmem>>) attributes {dimension_semantics = [#tpu.dimension_semantics<parallel>], iteration_bounds = array<i64: 2>, scalar_prefetch = 0 : i64, scratch_operands = 0 : i64, tpu.core_type = #tpu.core_type<tc>, window_params = [{transform_indices = @transform_0, window_bounds = array<i64: 128, 128>}, {transform_indices = @transform_1, window_bounds = array<i64: 128, 128>}, {pipeline_mode = #tpu.pipeline_mode<synchronous>, transform_indices = @transform_2, window_bounds = array<i64: 128, 256>}, {pipeline_mode = #tpu.pipeline_mode<synchronous>, transform_indices = @transform_3, window_bounds = array<i64: 128, 256>}, {pipeline_mode = #tpu.pipeline_mode<synchronous>, transform_indices = @transform_4, window_bounds = array<i64: 1, 256>}, {pipeline_mode = #tpu.pipeline_mode<synchronous>, transform_indices = @transform_5, window_bounds = array<i64: 128, 128>}, {pipeline_mode = #tpu.pipeline_mode<synchronous>, transform_indices = @transform_6, window_bounds = array<i64: 1, 128>}, {pipeline_mode = #tpu.pipeline_mode<synchronous>, transform_indices = @transform_7, window_bounds = array<i64: 128, 768>}, {pipeline_mode = #tpu.pipeline_mode<synchronous>, transform_indices = @transform_8, window_bounds = array<i64: 1, 768>}, {transform_indices = @transform_9, window_bounds = array<i64: 128, 128>}, {transform_indices = @transform_10, window_bounds = array<i64: 128, 128>}, {transform_indices = @transform_11, window_bounds = array<i64: 128, 128>}, {transform_indices = @transform_12, window_bounds = array<i64: 128, 384>}]} {
    %c0 = arith.constant 0 : index
    %c0_0 = arith.constant 0 : index
    %0 = vector.load %arg1[%c0, %c0_0] : memref<128x128xf32, #tpu.memory_space<vmem>>, vector<128x128xf32>
    %c0_1 = arith.constant 0 : index
    %c0_2 = arith.constant 0 : index
    %1 = vector.load %arg2[%c0_1, %c0_2] : memref<128x128xf32, #tpu.memory_space<vmem>>, vector<128x128xf32>
    %2 = arith.truncf %0 : vector<128x128xf32> to vector<128x128xbf16>
    %3 = arith.truncf %1 : vector<128x128xf32> to vector<128x128xbf16>
    %c0_3 = arith.constant 0 : index
    %c0_4 = arith.constant 0 : index
    %4 = vector.load %arg3[%c0_3, %c0_4] : memref<128x256xbf16, #tpu.memory_space<vmem>>, vector<128x256xbf16>
    %cst = arith.constant dense<0.000000e+00> : vector<128x256xf32>
    %5 = tpu.matmul %3, %4, %cst {dimension_numbers = #tpu.dot_dimension_numbers<[1], [0], [0], [1], [0, 0, 1, 1], [], []>} : vector<128x128xbf16>, vector<128x256xbf16>, vector<128x256xf32> -> vector<128x256xf32>
    %c0_5 = arith.constant 0 : index
    %c0_6 = arith.constant 0 : index
    %6 = vector.load %arg4[%c0_5, %c0_6] : memref<128x256xbf16, #tpu.memory_space<vmem>>, vector<128x256xbf16>
    %cst_7 = arith.constant dense<0.000000e+00> : vector<128x256xf32>
    %7 = tpu.matmul %2, %6, %cst_7 {dimension_numbers = #tpu.dot_dimension_numbers<[1], [0], [0], [1], [0, 0, 1, 1], [], []>} : vector<128x128xbf16>, vector<128x256xbf16>, vector<128x256xf32> -> vector<128x256xf32>
    %8 = arith.addf %5, %7 : vector<128x256xf32>
    %c0_8 = arith.constant 0 : index
    %c0_9 = arith.constant 0 : index
    %9 = vector.load %arg5[%c0_8, %c0_9] : memref<1x256xf32, #tpu.memory_space<vmem>>, vector<1x256xf32>
    %10 = vector.broadcast %9 : vector<1x256xf32> to vector<128x256xf32>
    %11 = arith.addf %8, %10 : vector<128x256xf32>
    %12 = vector.extract_strided_slice %11 {offsets = [0, 0], sizes = [128, 128], strides = [1, 1]} : vector<128x256xf32> to vector<128x128xf32>
    %13 = math.tanh %12 : vector<128x128xf32>
    %14 = vector.extract_strided_slice %11 {offsets = [0, 128], sizes = [128, 128], strides = [1, 1]} : vector<128x256xf32> to vector<128x128xf32>
    %15 = math.tanh %14 : vector<128x128xf32>
    %16 = arith.mulf %13, %0 : vector<128x128xf32>
    %cst_10 = arith.constant 1.000000e+00 : f32
    %17 = vector.broadcast %cst_10 : f32 to vector<128x128xf32>
    %18 = arith.subf %17, %13 : vector<128x128xf32>
    %19 = arith.mulf %18, %15 : vector<128x128xf32>
    %20 = arith.mulf %19, %1 : vector<128x128xf32>
    %21 = arith.addf %16, %20 : vector<128x128xf32>
    %22 = arith.truncf %21 : vector<128x128xf32> to vector<128x128xbf16>
    %c0_11 = arith.constant 0 : index
    %c0_12 = arith.constant 0 : index
    %23 = vector.load %arg6[%c0_11, %c0_12] : memref<128x128xbf16, #tpu.memory_space<vmem>>, vector<128x128xbf16>
    %cst_13 = arith.constant dense<0.000000e+00> : vector<128x128xf32>
    %24 = tpu.matmul %22, %23, %cst_13 {dimension_numbers = #tpu.dot_dimension_numbers<[1], [0], [0], [1], [0, 0, 1, 1], [], []>} : vector<128x128xbf16>, vector<128x128xbf16>, vector<128x128xf32> -> vector<128x128xf32>
    %c0_14 = arith.constant 0 : index
    %c0_15 = arith.constant 0 : index
    %25 = vector.load %arg7[%c0_14, %c0_15] : memref<1x128xf32, #tpu.memory_space<vmem>>, vector<1x128xf32>
    %26 = vector.broadcast %25 : vector<1x128xf32> to vector<128x128xf32>
    %27 = arith.addf %24, %26 : vector<128x128xf32>
    %28 = arith.negf %27 : vector<128x128xf32>
    %29 = math.exp %28 : vector<128x128xf32>
    %cst_16 = arith.constant 1.000000e+00 : f32
    %30 = vector.broadcast %cst_16 : f32 to vector<128x128xf32>
    %31 = arith.addf %30, %29 : vector<128x128xf32>
    %32 = arith.divf %30, %31 : vector<128x128xf32>
    %33 = arith.mulf %27, %32 : vector<128x128xf32>
    %34 = arith.truncf %33 : vector<128x128xf32> to vector<128x128xbf16>
    %c0_17 = arith.constant 0 : index
    %c0_18 = arith.constant 0 : index
    %35 = vector.load %arg8[%c0_17, %c0_18] : memref<128x768xbf16, #tpu.memory_space<vmem>>, vector<128x768xbf16>
    %cst_19 = arith.constant dense<0.000000e+00> : vector<128x768xf32>
    %36 = tpu.matmul %34, %35, %cst_19 {dimension_numbers = #tpu.dot_dimension_numbers<[1], [0], [0], [1], [0, 0, 1, 1], [], []>} : vector<128x128xbf16>, vector<128x768xbf16>, vector<128x768xf32> -> vector<128x768xf32>
    %c0_20 = arith.constant 0 : index
    %c0_21 = arith.constant 0 : index
    %37 = vector.load %arg9[%c0_20, %c0_21] : memref<1x768xf32, #tpu.memory_space<vmem>>, vector<1x768xf32>
    %38 = vector.broadcast %37 : vector<1x768xf32> to vector<128x768xf32>
    %39 = arith.addf %36, %38 : vector<128x768xf32>
    %40 = vector.extract_strided_slice %39 {offsets = [0, 0], sizes = [128, 128], strides = [1, 1]} : vector<128x768xf32> to vector<128x128xf32>
    %41 = arith.truncf %40 : vector<128x128xf32> to vector<128x128xbf16>
    %c0_22 = arith.constant 0 : index
    %c0_23 = arith.constant 0 : index
    %42 = vector.load %arg10[%c0_22, %c0_23] : memref<128x128xbf16, #tpu.memory_space<vmem>>, vector<128x128xbf16>
    tpu.vector_store %arg10[%c0_22, %c0_23], %41 {strides = array<i32>} : memref<128x128xbf16, #tpu.memory_space<vmem>>, vector<128x128xbf16>,
    %43 = vector.extract_strided_slice %39 {offsets = [0, 128], sizes = [128, 128], strides = [1, 1]} : vector<128x768xf32> to vector<128x128xf32>
    %44 = tpu.transpose %43, [1, 0] : vector<128x128xf32> -> vector<128x128xf32>
    %45 = arith.truncf %44 : vector<128x128xf32> to vector<128x128xbf16>
    %c0_24 = arith.constant 0 : index
    %c0_25 = arith.constant 0 : index
    %46 = vector.load %arg11[%c0_24, %c0_25] : memref<128x128xbf16, #tpu.memory_space<vmem>>, vector<128x128xbf16>
    tpu.vector_store %arg11[%c0_24, %c0_25], %45 {strides = array<i32>} : memref<128x128xbf16, #tpu.memory_space<vmem>>, vector<128x128xbf16>,
    %47 = vector.extract_strided_slice %39 {offsets = [0, 256], sizes = [128, 128], strides = [1, 1]} : vector<128x768xf32> to vector<128x128xf32>
    %48 = arith.truncf %47 : vector<128x128xf32> to vector<128x128xbf16>
    %c0_26 = arith.constant 0 : index
    %c0_27 = arith.constant 0 : index
    %49 = vector.load %arg12[%c0_26, %c0_27] : memref<128x128xbf16, #tpu.memory_space<vmem>>, vector<128x128xbf16>
    tpu.vector_store %arg12[%c0_26, %c0_27], %48 {strides = array<i32>} : memref<128x128xbf16, #tpu.memory_space<vmem>>, vector<128x128xbf16>,
    %50 = vector.extract_strided_slice %39 {offsets = [0, 384], sizes = [128, 256], strides = [1, 1]} : vector<128x768xf32> to vector<128x256xf32>
    %51 = arith.negf %50 : vector<128x256xf32>
    %52 = math.exp %51 : vector<128x256xf32>
    %cst_28 = arith.constant 1.000000e+00 : f32
    %53 = vector.broadcast %cst_28 : f32 to vector<128x256xf32>
    %54 = arith.addf %53, %52 : vector<128x256xf32>
    %55 = arith.divf %53, %54 : vector<128x256xf32>
    %c0_29 = arith.constant 0 : index
    %c0_30 = arith.constant 0 : index
    %56 = vector.load %arg13[%c0_29, %c0_30] : memref<128x384xf32, #tpu.memory_space<vmem>>, vector<128x256xf32>
    tpu.vector_store %arg13[%c0_29, %c0_30], %55 {strides = array<i32>} : memref<128x384xf32, #tpu.memory_space<vmem>>, vector<128x256xf32>,
    %57 = vector.extract_strided_slice %39 {offsets = [0, 640], sizes = [128, 128], strides = [1, 1]} : vector<128x768xf32> to vector<128x128xf32>
    %c0_31 = arith.constant 0 : index
    %c256 = arith.constant 256 : index
    %58 = vector.load %arg13[%c0_31, %c256] : memref<128x384xf32, #tpu.memory_space<vmem>>, vector<128x128xf32>
    tpu.vector_store %arg13[%c0_31, %c256], %57 {strides = array<i32>} : memref<128x384xf32, #tpu.memory_space<vmem>>, vector<128x128xf32>,
    return
  }
  func.func @transform_0(%arg0: i32) -> (i32, i32) {
    %c0_i32 = arith.constant 0 : i32
    %c0_i32_0 = arith.constant 0 : i32
    return %arg0, %c0_i32 : i32, i32
  }
  func.func @transform_1(%arg0: i32) -> (i32, i32) {
    %c0_i32 = arith.constant 0 : i32
    %c0_i32_0 = arith.constant 0 : i32
    return %arg0, %c0_i32 : i32, i32
  }
  func.func @transform_2(%arg0: i32) -> (i32, i32) {
    %c0_i32 = arith.constant 0 : i32
    %c0_i32_0 = arith.constant 0 : i32
    %c0_i32_1 = arith.constant 0 : i32
    return %c0_i32, %c0_i32_0 : i32, i32
  }
  func.func @transform_3(%arg0: i32) -> (i32, i32) {
    %c0_i32 = arith.constant 0 : i32
    %c0_i32_0 = arith.constant 0 : i32
    %c0_i32_1 = arith.constant 0 : i32
    return %c0_i32, %c0_i32_0 : i32, i32
  }
  func.func @transform_4(%arg0: i32) -> (i32, i32) {
    %c0_i32 = arith.constant 0 : i32
    %c0_i32_0 = arith.constant 0 : i32
    %c0_i32_1 = arith.constant 0 : i32
    return %c0_i32, %c0_i32_0 : i32, i32
  }
  func.func @transform_5(%arg0: i32) -> (i32, i32) {
    %c0_i32 = arith.constant 0 : i32
    %c0_i32_0 = arith.constant 0 : i32
    %c0_i32_1 = arith.constant 0 : i32
    return %c0_i32, %c0_i32_0 : i32, i32
  }
  func.func @transform_6(%arg0: i32) -> (i32, i32) {
    %c0_i32 = arith.constant 0 : i32
    %c0_i32_0 = arith.constant 0 : i32
    %c0_i32_1 = arith.constant 0 : i32
    return %c0_i32, %c0_i32_0 : i32, i32
  }
  func.func @transform_7(%arg0: i32) -> (i32, i32) {
    %c0_i32 = arith.constant 0 : i32
    %c0_i32_0 = arith.constant 0 : i32
    %c0_i32_1 = arith.constant 0 : i32
    return %c0_i32, %c0_i32_0 : i32, i32
  }
  func.func @transform_8(%arg0: i32) -> (i32, i32) {
    %c0_i32 = arith.constant 0 : i32
    %c0_i32_0 = arith.constant 0 : i32
    %c0_i32_1 = arith.constant 0 : i32
    return %c0_i32, %c0_i32_0 : i32, i32
  }
  func.func @transform_9(%arg0: i32) -> (i32, i32) {
    %c0_i32 = arith.constant 0 : i32
    %c0_i32_0 = arith.constant 0 : i32
    return %arg0, %c0_i32 : i32, i32
  }
  func.func @transform_10(%arg0: i32) -> (i32, i32) {
    %c0_i32 = arith.constant 0 : i32
    %c0_i32_0 = arith.constant 0 : i32
    return %c0_i32, %arg0 : i32, i32
  }
  func.func @transform_11(%arg0: i32) -> (i32, i32) {
    %c0_i32 = arith.constant 0 : i32
    %c0_i32_0 = arith.constant 0 : i32
    return %arg0, %c0_i32 : i32, i32
  }
  func.func @transform_12(%arg0: i32) -> (i32, i32) {
    %c0_i32 = arith.constant 0 : i32
    %c0_i32_0 = arith.constant 0 : i32
    return %arg0, %c0_i32 : i32, i32
  }
}

</mosaic_0001>

<bundles_post_ra>
// kernel: mega_decoder_forward.3
= control target key start
LH: loop header
LB: loop body
LE: loop exit
PB: predicated region body
PF: predicated region fallthrough
CT: control target
= control target key end

     0   :  { %s2520_s27 = smov 0   ;;  %s3005_s0 = inlined_call_operand.vmem [shape: bf16[256,128], index: 0, kind: input, shape index: {}]   ;;  %s3006_s1 = inlined_call_operand.vmem [shape: bf16[128,256], index: 1, kind: input, shape index: {}]   ;;  %s3007_s2 = inlined_call_operand.vmem [shape: bf16[256,128], index: 2, kind: input, shape index: {}]   ;;  %s3008_s3 = inlined_call_operand.vmem [shape: f32[256,384], index: 3, kind: input, shape index: {}]   ;;  %s3009_s4 = inlined_call_operand.vmem [shape: f32[256,128], index: 4, kind: input, shape index: {}]   ;;  %s3010_s5 = inlined_call_operand.vmem [shape: bf16[128,128], index: 5, kind: input, shape index: {}]   ;;  %s3011_s6 = inlined_call_operand.vmem [shape: bf16[128,128], index: 6, kind: input, shape index: {}]   ;;  %s3012_s7 = inlined_call_operand.vmem [shape: f32[1,128], index: 7, kind: input, shape index: {}]   ;;  %s3013_s8 = inlined_call_operand.vmem [shape: f32[256,128], index: 8, kind: output, shape index: {}]  }
   0x1 LB: > { %s1904_s28 = sadd.s32 4294967295, %s2472_s27   ;;  %p1908_p0 = scmp.ge.s32.totalorder %s2472_s27, 1  ;;  %s2472_s27 = sphi %s2520_s27, %s18_s27  }
   0x2   : > { %p286_p1 = scmp.lt.s32.totalorder %s2472_s27, 3 }
   0x4   : > { %p287_p2 = pnand %p1908_p0, %p286_p1 }
   0x5   : > { %v2178_v0 = vld [vmem:[%s3006_s1 + $0x4] ss:$8 sps:$4 sm:$0xff] (!%p287_p2)   ;;  %s1909_s9 = sshll.u32 (!%p287_p2), %s1904_s28, 4  ;;  %v2180_v1 = vld [vmem:[%s3006_s1] ss:$8 sps:$4 sm:$0xff] (!%p287_p2)   ;;  %v2474_v2 = vmov (!%p287_p2), 0  }
   0x6   : > { %290 = sbr.rel (%p287_p2) target bundleno = 1197 (0x4ad), region = 52  ;;  %549 = vmatprep.mubr.bf16.mxu0 (!%p287_p2), %v2474_v2  ;;  %p332_p3 = scmp.lt.s32.totalorder (!%p287_p2), %s1909_s9, 31  ;;  %517 = vmatprep.subr.bf16.mxu0 (!%p287_p2), %v2178_v0  ;;  %v2181_v3 = vld [vmem:[%s3006_s1 + $0x14] ss:$8 sps:$4 sm:$0xff] (!%p287_p2)   ;;  %v2183_v4 = vld [vmem:[%s3006_s1 + $0x10] ss:$8 sps:$4 sm:$0xff] (!%p287_p2)  }
   0x7   : > { %518 = vmatpush1.bf16.msra.mxu0 (!%p287_p2), %v2180_v1  ;;  %v2184_v5 = vld [vmem:[%s3006_s1 + $0x24] ss:$8 sps:$4 sm:$0xff] (!%p287_p2)   ;;  %v2186_v6 = vld [vmem:[%s3006_s1 + $0x20] ss:$8 sps:$4 sm:$0xff] (!%p287_p2)   ;;  %v2187_v7 = vld [vmem:[%s3006_s1 + $0x34] ss:$8 sps:$4 sm:$0xff] (!%p287_p2)  }
   0x8   : > { %519 = vmatprep.subr.bf16.mxu0 (!%p287_p2), %v2181_v3  ;;  %v2189_v8 = vld [vmem:[%s3006_s1 + $0x30] ss:$8 sps:$4 sm:$0xff] (!%p287_p2)   ;;  %v2190_v9 = vld [vmem:[%s3006_s1 + $0x44] ss:$8 sps:$4 sm:$0xff] (!%p287_p2)   ;;  %v2192_v10 = vld [vmem:[%s3006_s1 + $0x40] ss:$8 sps:$4 sm:$0xff] (!%p287_p2)  }
   0x9   : > { %v2193_v11 = vld [vmem:[%s3006_s1 + $0x54] ss:$8 sps:$4 sm:$0xff] (!%p287_p2)   ;;  %v2195_v12 = vld [vmem:[%s3006_s1 + $0x50] ss:$8 sps:$4 sm:$0xff] (!%p287_p2)   ;;  %v2196_v13 = vld [vmem:[%s3006_s1 + $0x64] ss:$8 sps:$4 sm:$0xff] (!%p287_p2)  }
   0xa   : > { %v2198_v14 = vld [vmem:[%s3006_s1 + $0x60] ss:$8 sps:$4 sm:$0xff] (!%p287_p2)   ;;  %v2199_v15 = vld [vmem:[%s3006_s1 + $0x74] ss:$8 sps:$4 sm:$0xff] (!%p287_p2)   ;;  %v2201_v16 = vld [vmem:[%s3006_s1 + $0x70] ss:$8 sps:$4 sm:$0xff] (!%p287_p2)  }
   0xb   : > { %520 = vmatpush1.bf16.msra.mxu0 (!%p287_p2), %v2183_v4  ;;  %v2210_v25 = vld [vmem:[%s3007_s2 + $0x40] sm:$0xff] (!%p287_p2)   ;;  %v2212_v27 = vld [vmem:[%s3007_s2 + $0x48] sm:$0xff] (!%p287_p2)   ;;  %v2214_v29 = vld [vmem:[%s3007_s2 + $0x50] sm:$0xff] (!%p287_p2)  }
   0xc   : > { %521 = vmatprep.subr.bf16.mxu0 (!%p287_p2), %v2184_v5  ;;  %v2211_v26 = vld [vmem:[%s3007_s2] sm:$0xff] (!%p287_p2)   ;;  %2008 = vmatprep.subr.bf16.mxu1 (!%p287_p2), %v2210_v25  ;;  %v2213_v28 = vld [vmem:[%s3007_s2 + $0x8] sm:$0xff] (!%p287_p2)   ;;  %v2215_v30 = vld [vmem:[%s3007_s2 + $0x10] sm:$0xff] (!%p287_p2)  }
   0xd   : > { %s3015_s9 = smov (!%p332_p3, %s1909_s9), 31  ;;  %2009 = vmatpush3.bf16.msra.mxu1 %v2211_v26  ;;  %v2216_v48 = vld [vmem:[%s3007_s2 + $0x58] sm:$0xff]   ;;  %v2218_v51 = vld [vmem:[%s3007_s2 + $0x60] sm:$0xff]   ;;  %v2220_v58 = vld [vmem:[%s3007_s2 + $0x68] sm:$0xff]  }
   0xe   : > { %s1910_s18 = sshll.u32 %s3015_s9, 2  ;;  %2010 = vmatprep.subr.bf16.mxu1 %v2212_v27  ;;  %v2217_v50 = vld [vmem:[%s3007_s2 + $0x18] sm:$0xff]   ;;  %v2219_v53 = vld [vmem:[%s3007_s2 + $0x20] sm:$0xff]   ;;  %v2221_v60 = vld [vmem:[%s3007_s2 + $0x28] sm:$0xff]  }
   0xf   : > { %s2555_s25 = scalar_lea.vmem %s3005_s0, %s1910_s18  ;;  %522 = vmatpush1.bf16.msra.mxu0 %v2186_v6  ;;  %v2222_v61 = vld [vmem:[%s3007_s2 + $0x70] sm:$0xff]   ;;  %v2224_v4 = vld [vmem:[%s3007_s2 + $0x78] sm:$0xff]  }
  0x10   : > { %523 = vmatprep.subr.bf16.mxu0 %v2187_v7  ;;  %v2202_v17 = vld [vmem:[%s2555_s25] sm:$0xff]   ;;  %v2203_v18 = vld [vmem:[%s2555_s25 + $0x8] sm:$0xff]   ;;  %v2204_v19 = vld [vmem:[%s2555_s25 + $0x10] sm:$0xff]  }
  0x11   : > { %v2205_v20 = vld [vmem:[%s2555_s25 + $0x18] sm:$0xff]   ;;  %v2206_v21 = vld [vmem:[%s2555_s25 + $0x20] sm:$0xff]   ;;  %v2207_v22 = vld [vmem:[%s2555_s25 + $0x28] sm:$0xff]   ;;  %2011 = vmatpush3.bf16.msra.mxu1 %v2213_v28 }
  0x12   : > { %v2208_v23 = vld [vmem:[%s2555_s25 + $0x30] sm:$0xff]   ;;  %v2209_v24 = vld [vmem:[%s2555_s25 + $0x38] sm:$0xff]   ;;  %2012 = vmatprep.subr.bf16.mxu1 %v2214_v29  ;;  %s2168_s25 = smul.u32 24, %s3015_s9 }
  0x13   : > { %524 = vmatpush1.bf16.msra.mxu0 %v2189_v8  ;;  %v2223_v63 = vld [vmem:[%s3007_s2 + $0x30] sm:$0xff]   ;;  %v2225_v6 = vld [vmem:[%s3007_s2 + $0x38] sm:$0xff]  }
  0x14   : > { %525 = vmatprep.subr.bf16.mxu0 %v2190_v9  ;;  %s2796_s15 = scalar_lea.vmem %s3008_s3, %s2168_s25  ;;  %s1914_s25 = sshll.u32 %s3015_s9, 3 }
  0x15   : > { %2013 = vmatpush3.bf16.msra.mxu1 %v2215_v30  ;;  %s2877_s16 = scalar_lea.vmem %s3009_s4, %s1914_s25  ;;  %s2976_s20 = scalar_lea.vmem %s3013_s8, %s1914_s25 }
  0x16   : > { %2014 = vmatprep.subr.bf16.mxu1 %v2216_v48 }
  0x17   : > { %526 = vmatpush1.bf16.msra.mxu0 %v2192_v10 }
  0x18   : > { %527 = vmatprep.subr.bf16.mxu0 %v2193_v11 }
  0x19   : > { %2015 = vmatpush3.bf16.msra.mxu1 %v2217_v50 }
  0x1a   : > { %2016 = vmatprep.subr.bf16.mxu1 %v2218_v51 }
  0x1b   : > { %528 = vmatpush1.bf16.msra.mxu0 %v2195_v12 }
  0x1c   : > { %529 = vmatprep.subr.bf16.mxu0 %v2196_v13 }
  0x1d   : > { %2017 = vmatpush3.bf16.msra.mxu1 %v2219_v53 }
  0x1e   : > { %2018 = vmatprep.subr.bf16.mxu1 %v2220_v58 }
  0x1f   : > { %530 = vmatpush1.bf16.msra.mxu0 %v2198_v14 }
  0x20   : > { %531 = vmatprep.subr.bf16.mxu0 %v2199_v15 }
  0x21   : > { %2019 = vmatpush3.bf16.msra.mxu1 %v2221_v60 }
  0x22   : > { %2020 = vmatprep.subr.bf16.mxu1 %v2222_v61 }
  0x23   : > { %532 = vmatpush1.bf16.msra.mxu0 %v2201_v16 }
  0x25   : > { %2021 = vmatpush3.bf16.msra.mxu1 %v2223_v63 }
  0x26   : > { %550 = vmatmul.mubr.bf16.vlgmr.msra.gmra.mrb[0].mxu0 %v2202_v17  ;;  %2022 = vmatprep.subr.bf16.mxu1 %v2224_v4 }
  0x27   : > { %559 = vmatprep.mubr.bf16.mxu0 %v2474_v2 }
  0x29   : > { %2023 = vmatpush3.bf16.msra.mxu1 %v2225_v6 }
  0x2e   : > { %560 = vmatmul.mubr.bf16.gmra.mrb[4].mxu0 %v2203_v18 }
  0x2f   : > { %569 = vmatprep.mubr.bf16.mxu0 %v2474_v2 }
  0x36   : > { %570 = vmatmul.mubr.bf16.gmra.mrb[8].mxu0 %v2204_v19 }
  0x37   : > { %579 = vmatprep.mubr.bf16.mxu0 %v2474_v2 }
  0x3e   : > { %580 = vmatmul.mubr.bf16.gmra.mrb[12].mxu0 %v2205_v20 }
  0x3f   : > { %589 = vmatprep.mubr.bf16.mxu0 %v2474_v2 }
  0x46   : > { %590 = vmatmul.mubr.bf16.gmra.mrb[16].mxu0 %v2206_v21 }
  0x47   : > { %599 = vmatprep.mubr.bf16.mxu0 %v2474_v2 }
  0x4e   : > { %600 = vmatmul.mubr.bf16.gmra.mrb[20].mxu0 %v2207_v22 }
  0x4f   : > { %609 = vmatprep.mubr.bf16.mxu0 %v2474_v2 }
  0x56   : > { %610 = vmatmul.mubr.bf16.gmra.mrb[24].mxu0 %v2208_v23 }
  0x57   : > { %619 = vmatprep.mubr.bf16.mxu0 %v2474_v2 }
  0x5e   : > { %620 = vmatmul.mubr.bf16.gmra.mrb[28].mxu0 %v2209_v24 }
  0xf9   : > { %v2610_v31 = vpop.f32.mrb[0].mxu0 }
  0xfa   : > { %v2612_v32 = vpop.f32.mrb[1].mxu0 }
  0xfb   : > { %v2614_v33 = vpop.f32.mrb[2].mxu0  ;;  %v630_v34 = vmax.f32 %v2610_v31, %v2612_v32 }
  0xfc   : > { %v2618_v35 = vpop.f32.mrb[3].mxu0 }
  0xfd   : > { %631 = vmax.xlane.f32.xlu0 %v630_v34  ;;  %v633_v36 = vmax.f32 %v2614_v33, %v2618_v35 }
 0x101   : > { %634 = vmax.xlane.f32.xlu0 %v633_v36  ;;  %v2622_v37 = vpop.f32.mrb[4].mxu0 }
 0x102   : > { %v2624_v38 = vpop.f32.mrb[5].mxu0 }
 0x103   : > { %v2626_v39 = vpop.f32.mrb[6].mxu0  ;;  %v636_v40 = vmax.f32 %v2622_v37, %v2624_v38 }
 0x104   : > { %v2630_v41 = vpop.f32.mrb[7].mxu0 }
 0x105   : > { %637 = vmax.xlane.f32.xlu1 %v636_v40  ;;  %v639_v42 = vmax.f32 %v2626_v39, %v2630_v41 }
 0x109   : > { %640 = vmax.xlane.f32.xlu1 %v639_v42  ;;  %v2634_v43 = vpop.f32.mrb[8].mxu0 }
 0x10a   : > { %v2636_v44 = vpop.f32.mrb[9].mxu0 }
 0x10b   : > { %v2638_v45 = vpop.f32.mrb[10].mxu0  ;;  %v642_v46 = vmax.f32 %v2634_v43, %v2636_v44 }
 0x10c   : > { %v2642_v47 = vpop.f32.mrb[11].mxu0 }
 0x10d   : > { %643 = vmax.xlane.f32.xlu0 %v642_v46  ;;  %v645_v49 = vmax.f32 %v2638_v45, %v2642_v47 }
 0x10f   : > { %646 = vmax.xlane.f32.xlu1 %v645_v49 }
 0x111   : > { %v2655_v52 = vpop.f32.mrb[12].mxu0 }
 0x112   : > { %v2660_v54 = vpop.f32.mrb[13].mxu0 }
 0x113   : > { %v2662_v55 = vpop.f32.mrb[14].mxu0  ;;  %v648_v56 = vmax.f32 %v2655_v52, %v2660_v54 }
 0x114   : > { %v2666_v57 = vpop.f32.mrb[15].mxu0 }
 0x115   : > { %649 = vmax.xlane.f32.xlu0 %v648_v56  ;;  %v651_v59 = vmax.f32 %v2662_v55, %v2666_v57 }
 0x117   : > { %652 = vmax.xlane.f32.xlu1 %v651_v59 }
 0x119   : > { %v2679_v62 = vpop.f32.mrb[16].mxu0 }
 0x11a   : > { %v2684_v0 = vpop.f32.mrb[17].mxu0 }
 0x11b   : > { %v2686_v1 = vpop.f32.mrb[18].mxu0  ;;  %v654_v2 = vmax.f32 %v2679_v62, %v2684_v0 }
 0x11c   : > { %v2690_v3 = vpop.f32.mrb[19].mxu0 }
 0x11d   : > { %655 = vmax.xlane.f32.xlu0 %v654_v2  ;;  %v657_v5 = vmax.f32 %v2686_v1, %v2690_v3 }
 0x11f   : > { %658 = vmax.xlane.f32.xlu1 %v657_v5 }
 0x121   : > { %v2700_v7 = vpop.f32.mrb[20].mxu0 }
 0x122   : > { %v2702_v8 = vpop.f32.mrb[21].mxu0 }
 0x123   : > { %v2704_v9 = vpop.f32.mrb[22].mxu0  ;;  %v660_v10 = vmax.f32 %v2700_v7, %v2702_v8 }
 0x124   : > { %v2708_v11 = vpop.f32.mrb[23].mxu0 }
 0x125   : > { %661 = vmax.xlane.f32.xlu0 %v660_v10  ;;  %v663_v12 = vmax.f32 %v2704_v9, %v2708_v11 }
 0x127   : > { %664 = vmax.xlane.f32.xlu1 %v663_v12 }
 0x129   : > { %v2712_v13 = vpop.f32.mrb[24].mxu0 }
 0x12a   : > { %v2714_v14 = vpop.f32.mrb[25].mxu0 }
 0x12b   : > { %v2716_v15 = vpop.f32.mrb[26].mxu0  ;;  %v666_v16 = vmax.f32 %v2712_v13, %v2714_v14 }
 0x12c   : > { %v2720_v17 = vpop.f32.mrb[27].mxu0 }
 0x12d   : > { %667 = vmax.xlane.f32.xlu0 %v666_v16  ;;  %v669_v18 = vmax.f32 %v2716_v15, %v2720_v17 }
 0x12f   : > { %670 = vmax.xlane.f32.xlu1 %v669_v18 }
 0x131   : > { %v2724_v19 = vpop.f32.mrb[28].mxu0 }
 0x132   : > { %v2726_v20 = vpop.f32.mrb[29].mxu0 }
 0x133   : > { %v2728_v21 = vpop.f32.mrb[30].mxu0  ;;  %v672_v22 = vmax.f32 %v2724_v19, %v2726_v20 }
 0x134   : > { %v2732_v23 = vpop.f32.mrb[31].mxu0 }
 0x135   : > { %673 = vmax.xlane.f32.xlu0 %v672_v22  ;;  %v675_v24 = vmax.f32 %v2728_v21, %v2732_v23 }
 0x137   : > { %676 = vmax.xlane.f32.xlu1 %v675_v24 }
 0x18a   : > { %v632_v25 = vpop.xlane.xlu0 %631 }
 0x18b   : > { %v678_v26 = vsub.f32 %v2610_v31, %v632_v25  ;;  %v679_v27 = vsub.f32 %v2612_v32, %v632_v25 }
 0x18d   : > { %v710_v28 = vmul.f32 1.442695, %v678_v26  ;;  %v712_v29 = vmul.f32 1.442695, %v679_v27 }
 0x18e   : > { %v635_v30 = vpop.xlane.xlu0 %634 }
 0x18f   : > { %2242 = vpow2.f32 %v710_v28  ;;  %v680_v34 = vsub.f32 %v2614_v33, %v635_v30  ;;  %v681_v36 = vsub.f32 %v2618_v35, %v635_v30 }
 0x190   : > { %2244 = vpow2.f32 %v712_v29 }
 0x191   : > { %v714_v40 = vmul.f32 1.442695, %v680_v34  ;;  %v716_v42 = vmul.f32 1.442695, %v681_v36 }
 0x192   : > { %v638_v46 = vpop.xlane.xlu1 %637 }
 0x193   : > { %2246 = vpow2.f32 %v714_v40  ;;  %v682_v48 = vsub.f32 %v2622_v37, %v638_v46  ;;  %v683_v49 = vsub.f32 %v2624_v38, %v638_v46 }
 0x194   : > { %2248 = vpow2.f32 %v716_v42 }
 0x195   : > { %v718_v31 = vmul.f32 1.442695, %v682_v48  ;;  %v720_v32 = vmul.f32 1.442695, %v683_v49 }
 0x196   : > { %v641_v50 = vpop.xlane.xlu1 %640 }
 0x197   : > { %2250 = vpow2.f32 %v718_v31  ;;  %v684_v51 = vsub.f32 %v2626_v39, %v641_v50  ;;  %v685_v33 = vsub.f32 %v2630_v41, %v641_v50 }
 0x198   : > { %2252 = vpow2.f32 %v720_v32 }
 0x199   : > { %v2243_v35 = vpop.eup %2242  ;;  %v722_v53 = vmul.f32 1.442695, %v684_v51  ;;  %v724_v56 = vmul.f32 1.442695, %v685_v33 }
 0x19a   : > { %v2245_v58 = vpop.eup %2244  ;;  %v644_v59 = vpop.xlane.xlu0 %643 }
 0x19b   : > { %2254 = vpow2.f32 %v722_v53  ;;  %v686_v37 = vsub.f32 %v2634_v43, %v644_v59  ;;  %v687_v38 = vsub.f32 %v2636_v44, %v644_v59  ;;  %v774_v60 = vadd.f32 %v2245_v58, %v2243_v35 }
 0x19c   : > { %2256 = vpow2.f32 %v724_v56  ;;  %v647_v61 = vpop.xlane.xlu1 %646 }
 0x19d   : > { %v2247_v63 = vpop.eup %2246  ;;  %v726_v2 = vmul.f32 1.442695, %v686_v37  ;;  %v728_v4 = vmul.f32 1.442695, %v687_v38  ;;  %v688_v39 = vsub.f32 %v2638_v45, %v647_v61  ;;  %v689_v41 = vsub.f32 %v2642_v47, %v647_v61  ;;  %775 = vadd.xlane.f32.xlu0 %v774_v60 }
 0x19e   : > { %v2249_v5 = vpop.eup %2248  ;;  %v822_v6 = vpack.c.bf16 %v2247_v63, %v2243_v35 }
 0x19f   : > { %2258 = vpow2.f32 %v726_v2  ;;  %v730_v10 = vmul.f32 1.442695, %v688_v39  ;;  %v732_v12 = vmul.f32 1.442695, %v689_v41  ;;  %v823_v16 = vpack.c.bf16 %v2249_v5, %v2245_v58 }
 0x1a0   : > { %2260 = vpow2.f32 %v728_v4  ;;  %v777_v43 = vadd.f32 %v2249_v5, %v2247_v63 }
 0x1a1   : > { %v2251_v44 = vpop.eup %2250  ;;  %2262 = vpow2.f32 %v730_v10  ;;  %998 = vmatprep.mubr.bf16.mxu1 %v823_v16 }
 0x1a2   : > { %v2253_v18 = vpop.eup %2252  ;;  %2264 = vpow2.f32 %v732_v12  ;;  %778 = vadd.xlane.f32.xlu1 %v777_v43  ;;  %999 = vmatmul.mubr.bf16.vlgmr.msra.gmra.mrb[0].mxu1 %v822_v6  ;;  %v650_v22 = vpop.xlane.xlu0 %649 }
 0x1a3   : > { %v690_v45 = vsub.f32 %v2655_v52, %v650_v22  ;;  %v691_v47 = vsub.f32 %v2660_v54, %v650_v22  ;;  %v780_v24 = vadd.f32 %v2253_v18, %v2251_v44 }
 0x1a4   : > { %v653_v25 = vpop.xlane.xlu1 %652 }
 0x1a5   : > { %v2255_v26 = vpop.eup %2254  ;;  %v734_v27 = vmul.f32 1.442695, %v690_v45  ;;  %v736_v28 = vmul.f32 1.442695, %v691_v47  ;;  %v692_v29 = vsub.f32 %v2662_v55, %v653_v25  ;;  %v693_v30 = vsub.f32 %v2666_v57, %v653_v25  ;;  %781 = vadd.xlane.f32.xlu0 %v780_v24 }
 0x1a6   : > { %v2257_v34 = vpop.eup %2256  ;;  %v824_v36 = vpack.c.bf16 %v2255_v26, %v2251_v44 }
 0x1a7   : > { %2266 = vpow2.f32 %v734_v27  ;;  %v738_v40 = vmul.f32 1.442695, %v692_v29  ;;  %v740_v42 = vmul.f32 1.442695, %v693_v30  ;;  %v825_v46 = vpack.c.bf16 %v2257_v34, %v2253_v18 }
 0x1a8   : > { %2268 = vpow2.f32 %v736_v28  ;;  %v783_v52 = vadd.f32 %v2257_v34, %v2255_v26 }
 0x1a9   : > { %v2259_v48 = vpop.eup %2258  ;;  %2270 = vpow2.f32 %v738_v40  ;;  %1006 = vmatprep.mubr.bf16.mxu1 %v825_v46 }
 0x1aa   : > { %v2261_v54 = vpop.eup %2260  ;;  %2272 = vpow2.f32 %v740_v42  ;;  %784 = vadd.xlane.f32.xlu1 %v783_v52  ;;  %1007 = vmatmul.mubr.bf16.gmra.mrb[4].mxu1 %v824_v36  ;;  %v656_v49 = vpop.xlane.xlu0 %655 }
 0x1ab   : > { %v2263_v55 = vpop.eup %2262  ;;  %v694_v57 = vsub.f32 %v2679_v62, %v656_v49  ;;  %v695_v31 = vsub.f32 %v2684_v0, %v656_v49  ;;  %v786_v32 = vadd.f32 %v2261_v54, %v2259_v48 }
 0x1ac   : > { %v2265_v50 = vpop.eup %2264  ;;  %v659_v51 = vpop.xlane.xlu1 %658  ;;  %v826_v33 = vpack.c.bf16 %v2263_v55, %v2259_v48 }
 0x1ad   : > { %v742_v35 = vmul.f32 1.442695, %v694_v57  ;;  %v744_v53 = vmul.f32 1.442695, %v695_v31  ;;  %v696_v56 = vsub.f32 %v2686_v1, %v659_v51  ;;  %v697_v58 = vsub.f32 %v2690_v3, %v659_v51  ;;  %787 = vadd.xlane.f32.xlu0 %v786_v32 }
 0x1ae   : > { %v827_v59 = vpack.c.bf16 %v2265_v50, %v2261_v54  ;;  %v789_v37 = vadd.f32 %v2265_v50, %v2263_v55 }
 0x1af   : > { %2274 = vpow2.f32 %v742_v35  ;;  %v746_v38 = vmul.f32 1.442695, %v696_v56  ;;  %v748_v60 = vmul.f32 1.442695, %v697_v58 }
 0x1b0   : > { %2276 = vpow2.f32 %v744_v53  ;;  %1014 = vmatprep.mubr.bf16.mxu1 %v827_v59  ;;  %790 = vadd.xlane.f32.xlu1 %v789_v37 }
 0x1b1   : > { %v2267_v62 = vpop.eup %2266  ;;  %2278 = vpow2.f32 %v746_v38 }
 0x1b2   : > { %v2269_v0 = vpop.eup %2268  ;;  %2280 = vpow2.f32 %v748_v60  ;;  %1015 = vmatmul.mubr.bf16.gmra.mrb[8].mxu1 %v826_v33  ;;  %v662_v61 = vpop.xlane.xlu0 %661 }
 0x1b3   : > { %v2271_v63 = vpop.eup %2270  ;;  %v698_v1 = vsub.f32 %v2700_v7, %v662_v61  ;;  %v699_v3 = vsub.f32 %v2702_v8, %v662_v61  ;;  %v792_v2 = vadd.f32 %v2269_v0, %v2267_v62 }
 0x1b4   : > { %v2273_v4 = vpop.eup %2272  ;;  %v665_v39 = vpop.xlane.xlu1 %664  ;;  %v828_v41 = vpack.c.bf16 %v2271_v63, %v2267_v62 }
 0x1b5   : > { %v750_v5 = vmul.f32 1.442695, %v698_v1  ;;  %v752_v6 = vmul.f32 1.442695, %v699_v3  ;;  %v700_v10 = vsub.f32 %v2704_v9, %v665_v39  ;;  %v701_v12 = vsub.f32 %v2708_v11, %v665_v39  ;;  %793 = vadd.xlane.f32.xlu0 %v792_v2  ;;  %v2226_v2 = vld [vmem:[%s3010_s5] sm:$0xff]   ;;  %v2228_v39 = vld [vmem:[%s3010_s5 + $0x10] sm:$0xff]  }
 0x1b6   : > { %v829_v16 = vpack.c.bf16 %v2273_v4, %v2269_v0  ;;  %v795_v43 = vadd.f32 %v2273_v4, %v2271_v63  ;;  %2104 = vmatprep.subr.bf16.mxu0 %v2226_v2  ;;  %v2227_v4 = vld [vmem:[%s3010_s5 + $0x8] sm:$0xff]  }
 0x1b7   : > { %2282 = vpow2.f32 %v750_v5  ;;  %v754_v44 = vmul.f32 1.442695, %v700_v10  ;;  %v756_v18 = vmul.f32 1.442695, %v701_v12  ;;  %2105 = vmatpush3.bf16.msra.mxu0 %v2226_v2  ;;  %v2230_v5 = vld [vmem:[%s3010_s5 + $0x20] sm:$0xff]   ;;  %v2232_v10 = vld [vmem:[%s3010_s5 + $0x30] sm:$0xff]  }
 0x1b8   : > { %2284 = vpow2.f32 %v752_v6  ;;  %1022 = vmatprep.mubr.bf16.mxu1 %v829_v16  ;;  %796 = vadd.xlane.f32.xlu1 %v795_v43  ;;  %v2231_v6 = vld [vmem:[%s3010_s5 + $0x28] sm:$0xff]   ;;  %v2233_v12 = vld [vmem:[%s3010_s5 + $0x38] sm:$0xff]  }
 0x1b9   : > { %v2275_v7 = vpop.eup %2274  ;;  %2286 = vpow2.f32 %v754_v44  ;;  %2106 = vmatprep.subr.bf16.mxu0 %v2227_v4 }
 0x1ba   : > { %v2277_v8 = vpop.eup %2276  ;;  %2288 = vpow2.f32 %v756_v18  ;;  %1023 = vmatmul.mubr.bf16.gmra.mrb[12].mxu1 %v828_v41  ;;  %v668_v22 = vpop.xlane.xlu0 %667  ;;  %v2229_v41 = vld [vmem:[%s3010_s5 + $0x18] sm:$0xff]  }
 0x1bb   : > { %v2279_v45 = vpop.eup %2278  ;;  %v702_v9 = vsub.f32 %v2712_v13, %v668_v22  ;;  %v703_v11 = vsub.f32 %v2714_v14, %v668_v22  ;;  %v798_v47 = vadd.f32 %v2277_v8, %v2275_v7  ;;  %2107 = vmatpush3.bf16.msra.mxu0 %v2227_v4 }
 0x1bc   : > { %v2281_v24 = vpop.eup %2280  ;;  %v671_v25 = vpop.xlane.xlu1 %670  ;;  %v830_v26 = vpack.c.bf16 %v2279_v45, %v2275_v7  ;;  %2108 = vmatprep.subr.bf16.mxu0 %v2228_v39 }
 0x1bd   : > { %v758_v27 = vmul.f32 1.442695, %v702_v9  ;;  %v760_v28 = vmul.f32 1.442695, %v703_v11  ;;  %v704_v29 = vsub.f32 %v2716_v15, %v671_v25  ;;  %v705_v30 = vsub.f32 %v2720_v17, %v671_v25  ;;  %799 = vadd.xlane.f32.xlu0 %v798_v47 }
 0x1be   : > { %v831_v34 = vpack.c.bf16 %v2281_v24, %v2277_v8  ;;  %v801_v36 = vadd.f32 %v2281_v24, %v2279_v45 }
 0x1bf   : > { %2290 = vpow2.f32 %v758_v27  ;;  %v762_v40 = vmul.f32 1.442695, %v704_v29  ;;  %v764_v42 = vmul.f32 1.442695, %v705_v30  ;;  %2109 = vmatpush3.bf16.msra.mxu0 %v2228_v39  ;;  %v1098_v27 = vld [vmem:[%s2796_s15 + $0x18] sm:$0xff] }
 0x1c0   : > { %2292 = vpow2.f32 %v760_v28  ;;  %1030 = vmatprep.mubr.bf16.mxu1 %v831_v34  ;;  %802 = vadd.xlane.f32.xlu1 %v801_v36 }
 0x1c1   : > { %v2283_v13 = vpop.eup %2282  ;;  %2294 = vpow2.f32 %v762_v40  ;;  %2110 = vmatprep.subr.bf16.mxu0 %v2229_v41 }
 0x1c2   : > { %v2285_v14 = vpop.eup %2284  ;;  %2296 = vpow2.f32 %v764_v42  ;;  %1031 = vmatmul.mubr.bf16.gmra.mrb[16].mxu1 %v830_v26  ;;  %v674_v46 = vpop.xlane.xlu0 %673  ;;  %v1095_v26 = vld [vmem:[%s2796_s15] sm:$0xff] }
 0x1c3   : > { %v2287_v52 = vpop.eup %2286  ;;  %v706_v15 = vsub.f32 %v2724_v19, %v674_v46  ;;  %v707_v17 = vsub.f32 %v2726_v20, %v674_v46  ;;  %v804_v48 = vadd.f32 %v2285_v14, %v2283_v13  ;;  %2111 = vmatpush3.bf16.msra.mxu0 %v2229_v41 }
 0x1c4   : > { %v2289_v54 = vpop.eup %2288  ;;  %v677_v49 = vpop.xlane.xlu1 %676  ;;  %v832_v55 = vpack.c.bf16 %v2287_v52, %v2283_v13  ;;  %2112 = vmatprep.subr.bf16.mxu0 %v2230_v5 }
 0x1c5   : > { %v766_v57 = vmul.f32 1.442695, %v706_v15  ;;  %v768_v31 = vmul.f32 1.442695, %v707_v17  ;;  %805 = vadd.xlane.f32.xlu0 %v804_v48  ;;  %v708_v32 = vsub.f32 %v2728_v21, %v677_v49  ;;  %v709_v50 = vsub.f32 %v2732_v23, %v677_v49  ;;  %v1101_v49 = vld [vmem:[%s2796_s15 + $0x30] sm:$0xff] }
 0x1c6   : > { %v833_v51 = vpack.c.bf16 %v2289_v54, %v2285_v14  ;;  %v807_v33 = vadd.f32 %v2289_v54, %v2287_v52 }
 0x1c7   : > { %2298 = vpow2.f32 %v766_v57  ;;  %v770_v35 = vmul.f32 1.442695, %v708_v32  ;;  %v772_v53 = vmul.f32 1.442695, %v709_v50  ;;  %2113 = vmatpush3.bf16.msra.mxu0 %v2230_v5 }
 0x1c8   : > { %2300 = vpow2.f32 %v768_v31  ;;  %1038 = vmatprep.mubr.bf16.mxu1 %v833_v51  ;;  %808 = vadd.xlane.f32.xlu1 %v807_v33 }
 0x1c9   : > { %v2291_v19 = vpop.eup %2290  ;;  %2302 = vpow2.f32 %v770_v35  ;;  %2114 = vmatprep.subr.bf16.mxu0 %v2231_v6 }
 0x1ca   : > { %v2293_v20 = vpop.eup %2292  ;;  %2304 = vpow2.f32 %v772_v53  ;;  %1039 = vmatmul.mubr.bf16.gmra.mrb[20].mxu1 %v832_v55  ;;  %v1104_v55 = vld [vmem:[%s2796_s15 + $0x48] sm:$0xff] }
 0x1cb   : > { %v2295_v56 = vpop.eup %2294  ;;  %v810_v58 = vadd.f32 %v2293_v20, %v2291_v19  ;;  %2115 = vmatpush3.bf16.msra.mxu0 %v2231_v6 }
 0x1cc   : > { %v2297_v59 = vpop.eup %2296  ;;  %v834_v37 = vpack.c.bf16 %v2295_v56, %v2291_v19  ;;  %2116 = vmatprep.subr.bf16.mxu0 %v2232_v10 }
 0x1cd   : > { %811 = vadd.xlane.f32.xlu0 %v810_v58  ;;  %v835_v21 = vpack.c.bf16 %v2297_v59, %v2293_v20  ;;  %v813_v23 = vadd.f32 %v2297_v59, %v2295_v56 }
 0x1cf   : > { %1046 = vmatprep.mubr.bf16.mxu1 %v835_v21  ;;  %814 = vadd.xlane.f32.xlu1 %v813_v23  ;;  %v1107_v23 = vld [vmem:[%s2796_s15 + $0x60] sm:$0xff] }
 0x1d0   : > { %2117 = vmatpush3.bf16.msra.mxu0 %v2232_v10 }
 0x1d1   : > { %v2299_v38 = vpop.eup %2298  ;;  %2118 = vmatprep.subr.bf16.mxu0 %v2233_v12 }
 0x1d2   : > { %v2301_v60 = vpop.eup %2300  ;;  %1047 = vmatmul.mubr.bf16.gmra.mrb[24].mxu1 %v834_v37 }
 0x1d3   : > { %v2303_v62 = vpop.eup %2302  ;;  %v816_v0 = vadd.f32 %v2301_v60, %v2299_v38 }
 0x1d4   : > { %v2305_v61 = vpop.eup %2304  ;;  %v836_v63 = vpack.c.bf16 %v2303_v62, %v2299_v38  ;;  %2119 = vmatpush3.bf16.msra.mxu0 %v2233_v12  ;;  %v1110_v38 = vld [vmem:[%s2796_s15 + $0x78] sm:$0xff] }
 0x1d5   : > { %817 = vadd.xlane.f32.xlu0 %v816_v0  ;;  %v837_v1 = vpack.c.bf16 %v2305_v61, %v2301_v60  ;;  %v819_v3 = vadd.f32 %v2305_v61, %v2303_v62 }
 0x1d7   : > { %1054 = vmatprep.mubr.bf16.mxu1 %v837_v1  ;;  %820 = vadd.xlane.f32.xlu1 %v819_v3 }
 0x1da   : > { %1055 = vmatmul.mubr.bf16.gmra.mrb[28].mxu1 %v836_v63 }
 0x22a   : > { %v776_v16 = vpop.xlane.xlu0 %775 }
 0x22b   : > { %2306 = vrcp.f32 %v776_v16  ;;  %v1113_v16 = vld [vmem:[%s2796_s15 + $0x90] sm:$0xff] }
 0x22f   : > { %v779_v43 = vpop.xlane.xlu1 %778 }
 0x230   : > { %2308 = vrcp.f32 %v779_v43  ;;  %v1116_v43 = vld [vmem:[%s2796_s15 + $0xa8] sm:$0xff] }
 0x232   : > { %v782_v44 = vpop.xlane.xlu0 %781 }
 0x233   : > { %2310 = vrcp.f32 %v782_v44 }
 0x235   : > { %v2307_v9 = vpop.eup %2306 }
 0x237   : > { %v785_v18 = vpop.xlane.xlu1 %784 }
 0x238   : > { %2312 = vrcp.f32 %v785_v18 }
 0x23a   : > { %v2309_v25 = vpop.eup %2308  ;;  %v788_v28 = vpop.xlane.xlu0 %787 }
 0x23b   : > { %2314 = vrcp.f32 %v788_v28 }
 0x23d   : > { %v791_v30 = vpop.xlane.xlu1 %790  ;;  %v2311_v52 = vpop.eup %2310 }
 0x23e   : > { %2316 = vrcp.f32 %v791_v30  ;;  %v1119_v30 = vld [vmem:[%s2796_s15 + $0xc0] sm:$0xff] }
 0x242   : > { %v2313_v54 = vpop.eup %2312  ;;  %v794_v57 = vpop.xlane.xlu0 %793 }
 0x243   : > { %2318 = vrcp.f32 %v794_v57 }
 0x245   : > { %v797_v32 = vpop.xlane.xlu1 %796  ;;  %v2315_v56 = vpop.eup %2314 }
 0x246   : > { %2320 = vrcp.f32 %v797_v32  ;;  %v1125_v32 = vld [vmem:[%s2796_s15 + $0xf0] sm:$0xff] }
 0x248   : > { %v2317_v21 = vpop.eup %2316 }
 0x24a   : > { %v800_v60 = vpop.xlane.xlu0 %799 }
 0x24b   : > { %2322 = vrcp.f32 %v800_v60 }
 0x24d   : > { %v803_v0 = vpop.xlane.xlu1 %802  ;;  %v2319_v41 = vpop.eup %2318 }
 0x24e   : > { %2324 = vrcp.f32 %v803_v0  ;;  %v1131_v0 = vld [vmem:[%s2796_s15 + $0x120] sm:$0xff] }
 0x250   : > { %v2321_v12 = vpop.eup %2320 }
 0x252   : > { %v806_v44 = vpop.xlane.xlu0 %805 }
 0x253   : > { %2326 = vrcp.f32 %v806_v44  ;;  %v1137_v44 = vld [vmem:[%s2796_s15 + $0x150] sm:$0xff] }
 0x275   : > { %v2024_v7 = vpop.f32.mrb[0].mxu1 }
 0x276   : > { %v2025_v8 = vpop.f32.mrb[1].mxu1 }
 0x277   : > { %v2026_v22 = vadd.f32 %v2025_v8, %v2024_v7  ;;  %v2027_v45 = vpop.f32.mrb[2].mxu1  ;;  %v809_v7 = vpop.xlane.xlu1 %808 }
 0x278   : > { %v2028_v11 = vpop.f32.mrb[3].mxu1  ;;  %2328 = vrcp.f32 %v809_v7 }
 0x279   : > { %v1079_v47 = vmul.f32 %v2307_v9, %v2026_v22  ;;  %v2029_v24 = vadd.f32 %v2028_v11, %v2027_v45 }
 0x27b   : > { %v1080_v29 = vmul.f32 %v2309_v25, %v2029_v24  ;;  %v1143_v34 = vmul.f32 %v1095_v26, %v1079_v47  ;;  %v2323_v25 = vpop.eup %2322 }
 0x27d   : > { %v1144_v36 = vmul.f32 %v1098_v27, %v1080_v29  ;;  %v2030_v40 = vpop.f32.mrb[4].mxu1  ;;  %v2325_v29 = vpop.eup %2324 }
 0x27e   : > { %v2031_v42 = vpop.f32.mrb[5].mxu1 }
 0x27f   : > { %v2032_v13 = vadd.f32 %v2031_v42, %v2030_v40  ;;  %v2033_v14 = vpop.f32.mrb[6].mxu1  ;;  %v1159_v46 = vpack.c.bf16 %v1144_v36, %v1143_v34  ;;  %v1122_v34 = vld [vmem:[%s2796_s15 + $0xd8] sm:$0xff]  ;;  %v812_v36 = vpop.xlane.xlu0 %811 }
 0x280   : > { %v2034_v15 = vpop.f32.mrb[7].mxu1  ;;  %v815_v42 = vpop.xlane.xlu1 %814  ;;  %2330 = vrcp.f32 %v812_v36  ;;  %v1106_v36 = vld [vmem:[%s2796_s15 + $0x58] sm:$0xff] }
 0x281   : > { %v1081_v17 = vmul.f32 %v2311_v52, %v2032_v13  ;;  %v2035_v48 = vadd.f32 %v2034_v15, %v2033_v14  ;;  %2120 = vmatprep.mubr.bf16.mxu0 %v1159_v46  ;;  %2332 = vrcp.f32 %v815_v42 }
 0x283   : > { %v1082_v31 = vmul.f32 %v2313_v54, %v2035_v48  ;;  %v1145_v50 = vmul.f32 %v1101_v49, %v1081_v17  ;;  %v2327_v54 = vpop.eup %2326 }
 0x285   : > { %v1146_v51 = vmul.f32 %v1104_v55, %v1082_v31  ;;  %v2036_v33 = vpop.f32.mrb[8].mxu1  ;;  %v2329_v31 = vpop.eup %2328 }
 0x286   : > { %v2037_v35 = vpop.f32.mrb[9].mxu1 }
 0x287   : > { %v1160_v53 = vpack.c.bf16 %v1146_v51, %v1145_v50  ;;  %v2038_v19 = vadd.f32 %v2037_v35, %v2036_v33  ;;  %v2039_v20 = vpop.f32.mrb[10].mxu1  ;;  %v1128_v50 = vld [vmem:[%s2796_s15 + $0x108] sm:$0xff]  ;;  %v818_v51 = vpop.xlane.xlu0 %817 }
 0x288   : > { %v2040_v58 = vpop.f32.mrb[11].mxu1  ;;  %v821_v35 = vpop.xlane.xlu1 %820  ;;  %2334 = vrcp.f32 %v818_v51 }
 0x289   : > { %v1083_v59 = vmul.f32 %v2315_v56, %v2038_v19  ;;  %v2041_v37 = vadd.f32 %v2040_v58, %v2039_v20  ;;  %2121 = vmatmul.mubr.bf16.vlgmr.msra.gmra.mrb[32].mxu0 %v1160_v53  ;;  %2336 = vrcp.f32 %v821_v35  ;;  %v1118_v35 = vld [vmem:[%s2796_s15 + $0xb8] sm:$0xff] }
 0x28b   : > { %v1084_v62 = vmul.f32 %v2317_v21, %v2041_v37  ;;  %v1147_v61 = vmul.f32 %v1107_v23, %v1083_v59  ;;  %v2331_v21 = vpop.eup %2330 }
 0x28d   : > { %v1148_v63 = vmul.f32 %v1110_v38, %v1084_v62  ;;  %v2042_v1 = vpop.f32.mrb[12].mxu1  ;;  %v2333_v62 = vpop.eup %2332 }
 0x28e   : > { %v2043_v3 = vpop.f32.mrb[13].mxu1 }
 0x28f   : > { %v2044_v2 = vadd.f32 %v2043_v3, %v2042_v1  ;;  %v2045_v4 = vpop.f32.mrb[14].mxu1  ;;  %v1161_v39 = vpack.c.bf16 %v1148_v63, %v1147_v61  ;;  %v1134_v61 = vld [vmem:[%s2796_s15 + $0x138] sm:$0xff] }
 0x290   : > { %v2046_v5 = vpop.f32.mrb[15].mxu1 }
 0x291   : > { %v1085_v6 = vmul.f32 %v2319_v41, %v2044_v2  ;;  %v2047_v10 = vadd.f32 %v2046_v5, %v2045_v4  ;;  %2124 = vmatprep.mubr.bf16.mxu0 %v1161_v39 }
 0x293   : > { %v1086_v18 = vmul.f32 %v2321_v12, %v2047_v10  ;;  %v1149_v8 = vmul.f32 %v1113_v16, %v1085_v6  ;;  %v2335_v6 = vpop.eup %2334 }
 0x295   : > { %v1150_v22 = vmul.f32 %v1116_v43, %v1086_v18  ;;  %v2048_v45 = vpop.f32.mrb[16].mxu1  ;;  %v2337_v43 = vpop.eup %2336  ;;  %v1140_v18 = vld [vmem:[%s2796_s15 + $0x168] sm:$0xff] }
 0x296   : > { %v2049_v9 = vpop.f32.mrb[17].mxu1 }
 0x297   : > { %v2050_v11 = vadd.f32 %v2049_v9, %v2048_v45  ;;  %v2051_v47 = vpop.f32.mrb[18].mxu1  ;;  %v1162_v24 = vpack.c.bf16 %v1150_v22, %v1149_v8  ;;  %v2234_v9 = vld [vmem:[%s3011_s6] sm:$0xff]  }
 0x298   : > { %v2052_v26 = vpop.f32.mrb[19].mxu1  ;;  %2136 = vmatprep.subr.bf16.mxu1 %v2234_v9 }
 0x299   : > { %v1087_v27 = vmul.f32 %v2323_v25, %v2050_v11  ;;  %v2053_v28 = vadd.f32 %v2052_v26, %v2051_v47  ;;  %2125 = vmatmul.mubr.bf16.gmra.mrb[36].mxu0 %v1162_v24  ;;  %2137 = vmatpush3.bf16.msra.mxu1 %v2234_v9  ;;  %v2235_v11 = vld [vmem:[%s3011_s6 + $0x8] sm:$0xff]   ;;  %v2236_v47 = vld [vmem:[%s3011_s6 + $0x10] sm:$0xff]   ;;  %v2237_v24 = vld [vmem:[%s3011_s6 + $0x18] sm:$0xff]  }
 0x29a   : > { %2138 = vmatprep.subr.bf16.mxu1 %v2235_v11  ;;  %v2238_v25 = vld [vmem:[%s3011_s6 + $0x20] sm:$0xff]   ;;  %v2239_v26 = vld [vmem:[%s3011_s6 + $0x28] sm:$0xff]  }
 0x29b   : > { %v1088_v40 = vmul.f32 %v2325_v29, %v2053_v28  ;;  %v1151_v13 = vmul.f32 %v1119_v30, %v1087_v27  ;;  %v2240_v27 = vld [vmem:[%s3011_s6 + $0x30] sm:$0xff]   ;;  %v2241_v28 = vld [vmem:[%s3011_s6 + $0x38] sm:$0xff]   ;;  %v1103_v29 = vld [vmem:[%s2796_s15 + $0x40] sm:$0xff] }
 0x29c   : > { %v1097_v30 = vld [vmem:[%s2796_s15 + $0x10] sm:$0xff] }
 0x29d   : > { %v1152_v14 = vmul.f32 %v1122_v34, %v1088_v40  ;;  %v2054_v46 = vpop.f32.mrb[20].mxu1  ;;  %2139 = vmatpush3.bf16.msra.mxu1 %v2235_v11 }
 0x29e   : > { %v2055_v52 = vpop.f32.mrb[21].mxu1  ;;  %2140 = vmatprep.subr.bf16.mxu1 %v2236_v47 }
 0x29f   : > { %v2056_v15 = vadd.f32 %v2055_v52, %v2054_v46  ;;  %v2057_v17 = vpop.f32.mrb[22].mxu1  ;;  %v1163_v48 = vpack.c.bf16 %v1152_v14, %v1151_v13  ;;  %v1100_v13 = vld [vmem:[%s2796_s15 + $0x28] sm:$0xff] }
 0x2a0   : > { %v2058_v49 = vpop.f32.mrb[23].mxu1 }
 0x2a1   : > { %v1089_v55 = vmul.f32 %v2327_v54, %v2056_v15  ;;  %v2059_v57 = vadd.f32 %v2058_v49, %v2057_v17  ;;  %2128 = vmatprep.mubr.bf16.mxu0 %v1163_v48  ;;  %2141 = vmatpush3.bf16.msra.mxu1 %v2236_v47  ;;  %v1127_v47 = vld [vmem:[%s2796_s15 + $0x100] sm:$0xff] }
 0x2a2   : > { %2142 = vmatprep.subr.bf16.mxu1 %v2237_v24 }
 0x2a3   : > { %v1090_v33 = vmul.f32 %v2329_v31, %v2059_v57  ;;  %v1153_v53 = vmul.f32 %v1125_v32, %v1089_v55  ;;  %v1115_v57 = vld [vmem:[%s2796_s15 + $0xa0] sm:$0xff]  ;;  %v1109_v32 = vld [vmem:[%s2796_s15 + $0x70] sm:$0xff] }
 0x2a5   : > { %v1154_v19 = vmul.f32 %v1128_v50, %v1090_v33  ;;  %v2060_v20 = vpop.f32.mrb[24].mxu1  ;;  %2143 = vmatpush3.bf16.msra.mxu1 %v2237_v24 }
 0x2a6   : > { %v2061_v56 = vpop.f32.mrb[25].mxu1  ;;  %2144 = vmatprep.subr.bf16.mxu1 %v2238_v25 }
 0x2a7   : > { %v2062_v58 = vadd.f32 %v2061_v56, %v2060_v20  ;;  %v2063_v59 = vpop.f32.mrb[26].mxu1  ;;  %v1164_v37 = vpack.c.bf16 %v1154_v19, %v1153_v53 }
 0x2a8   : > { %v2064_v23 = vpop.f32.mrb[27].mxu1 }
 0x2a9   : > { %v1091_v38 = vmul.f32 %v2331_v21, %v2062_v58  ;;  %v2065_v60 = vadd.f32 %v2064_v23, %v2063_v59  ;;  %2129 = vmatmul.mubr.bf16.gmra.mrb[40].mxu0 %v1164_v37  ;;  %2145 = vmatpush3.bf16.msra.mxu1 %v2238_v25  ;;  %v1112_v58 = vld [vmem:[%s2796_s15 + $0x88] sm:$0xff] }
 0x2aa   : > { %2146 = vmatprep.subr.bf16.mxu1 %v2239_v26 }
 0x2ab   : > { %v1092_v63 = vmul.f32 %v2333_v62, %v2065_v60  ;;  %v1155_v1 = vmul.f32 %v1131_v0, %v1091_v38 }
 0x2ad   : > { %v1156_v3 = vmul.f32 %v1134_v61, %v1092_v63  ;;  %v2066_v2 = vpop.f32.mrb[28].mxu1  ;;  %2147 = vmatpush3.bf16.msra.mxu1 %v2239_v26 }
 0x2ae   : > { %v2067_v4 = vpop.f32.mrb[29].mxu1  ;;  %2148 = vmatprep.subr.bf16.mxu1 %v2240_v27 }
 0x2af   : > { %v2068_v39 = vadd.f32 %v2067_v4, %v2066_v2  ;;  %v2069_v41 = vpop.f32.mrb[30].mxu1  ;;  %v1165_v5 = vpack.c.bf16 %v1156_v3, %v1155_v1  ;;  %v1102_v3 = vld [vmem:[%s2796_s15 + $0x38] sm:$0xff]  ;;  %v1096_v4 = vld [vmem:[%s2796_s15 + $0x8] sm:$0xff] }
 0x2b0   : > { %v2070_v10 = vpop.f32.mrb[31].mxu1 }
 0x2b1   : > { %v1093_v12 = vmul.f32 %v2335_v6, %v2068_v39  ;;  %v2071_v16 = vadd.f32 %v2070_v10, %v2069_v41  ;;  %2132 = vmatprep.mubr.bf16.mxu0 %v1165_v5  ;;  %2149 = vmatpush3.bf16.msra.mxu1 %v2240_v27  ;;  %v1105_v39 = vld [vmem:[%s2796_s15 + $0x50] sm:$0xff]  ;;  %v1474_v41 = vsub.f32 1.0, %v1102_v3  ;;  %v1099_v5 = vld [vmem:[%s2796_s15 + $0x20] sm:$0xff]  ;;  %v1472_v10 = vsub.f32 1.0, %v1096_v4 }
 0x2b2   : > { %2150 = vmatprep.subr.bf16.mxu1 %v2241_v28  ;;  %v1490_v6 = vld [vmem:[%s2877_s16 + $0x10] sm:$0xff] }
 0x2b3   : > { %v1094_v7 = vmul.f32 %v2337_v43, %v2071_v16  ;;  %v1157_v8 = vmul.f32 %v1137_v44, %v1093_v12  ;;  %v1475_v12 = vsub.f32 1.0, %v1105_v39  ;;  %v1488_v16 = vld [vmem:[%s2877_s16] sm:$0xff]  ;;  %v1491_v44 = vld [vmem:[%s2877_s16 + $0x18] sm:$0xff] }
 0x2b4   : > { %v1504_v24 = vmul.f32 %v1488_v16, %v1472_v10  ;;  %v1492_v16 = vld [vmem:[%s2877_s16 + $0x20] sm:$0xff] }
 0x2b5   : > { %v1158_v22 = vmul.f32 %v1140_v18, %v1094_v7  ;;  %2151 = vmatpush3.bf16.msra.mxu1 %v2241_v28  ;;  %v1473_v18 = vsub.f32 1.0, %v1099_v5  ;;  %v1507_v28 = vmul.f32 %v1491_v44, %v1475_v12 }
 0x2b7   : > { %v1166_v45 = vpack.c.bf16 %v1158_v22, %v1157_v8  ;;  %v1506_v22 = vmul.f32 %v1490_v6, %v1474_v41 }
 0x2b9   : > { %2133 = vmatmul.mubr.bf16.gmra.mrb[44].mxu0 %v1166_v45  ;;  %v1489_v45 = vld [vmem:[%s2877_s16 + $0x8] sm:$0xff] }
 0x35c   : > { %v2122_v34 = vpop.f32.mrb[32].mxu0 }
 0x35d   : > { %v2841_v40 = vadd.f32 %v2122_v34, %v1103_v29  ;;  %v1265_v42 = vpop.f32.mrb[33].mxu0  ;;  %v1121_v29 = vld [vmem:[%s2796_s15 + $0xd0] sm:$0xff] }
 0x35e   : > { %v2844_v14 = vadd.f32 %v1265_v42, %v1097_v30  ;;  %v2123_v46 = vpop.f32.mrb[34].mxu0  ;;  %v1505_v42 = vmul.f32 %v1489_v45, %v1473_v18  ;;  %v1139_v18 = vld [vmem:[%s2796_s15 + $0x160] sm:$0xff] }
 0x35f   : > { %v1967_v52 = vmul.f32 -1.442695, %v2841_v40  ;;  %v2847_v15 = vadd.f32 %v2123_v46, %v1106_v36  ;;  %v1268_v17 = vpop.f32.mrb[35].mxu0 }
 0x360   : > { %v1965_v48 = vmul.f32 -1.442695, %v2844_v14  ;;  %v2850_v54 = vadd.f32 %v1268_v17, %v1100_v13 }
 0x361   : > { %2338 = vpow2.f32 %v1967_v52  ;;  %v1968_v49 = vmul.f32 -1.442695, %v2847_v15 }
 0x362   : > { %2340 = vpow2.f32 %v1965_v48  ;;  %v1966_v55 = vmul.f32 -1.442695, %v2850_v54 }
 0x363   : > { %2342 = vpow2.f32 %v1968_v49  ;;  %v1130_v49 = vld [vmem:[%s2796_s15 + $0x118] sm:$0xff] }
 0x364   : > { %2344 = vpow2.f32 %v1966_v55 }
 0x36b   : > { %v2339_v31 = vpop.eup %2338 }
 0x36c   : > { %v2341_v50 = vpop.eup %2340  ;;  %v1394_v51 = vadd.f32 1.0, %v2339_v31  ;;  %v2126_v33 = vpop.f32.mrb[36].mxu0 }
 0x36d   : > { %v2343_v53 = vpop.eup %2342  ;;  %v1392_v19 = vadd.f32 1.0, %v2341_v50  ;;  %v2857_v20 = vadd.f32 %v2126_v33, %v1115_v57  ;;  %v1281_v56 = vpop.f32.mrb[37].mxu0  ;;  %v1124_v50 = vld [vmem:[%s2796_s15 + $0xe8] sm:$0xff] }
 0x36e   : > { %v2345_v59 = vpop.eup %2344  ;;  %2346 = vrcp.f32 %v1394_v51  ;;  %v1395_v37 = vadd.f32 1.0, %v2343_v53  ;;  %v2860_v21 = vadd.f32 %v1281_v56, %v1109_v32  ;;  %v2127_v23 = vpop.f32.mrb[38].mxu0 }
 0x36f   : > { %2348 = vrcp.f32 %v1392_v19  ;;  %v1393_v38 = vadd.f32 1.0, %v2345_v59  ;;  %v1971_v60 = vmul.f32 -1.442695, %v2857_v20  ;;  %v2863_v62 = vadd.f32 %v2127_v23, %v1118_v35  ;;  %v1284_v0 = vpop.f32.mrb[39].mxu0 }
 0x370   : > { %2350 = vrcp.f32 %v1395_v37  ;;  %v1969_v61 = vmul.f32 -1.442695, %v2860_v21  ;;  %v2867_v63 = vadd.f32 %v1284_v0, %v1112_v58 }
 0x371   : > { %2352 = vrcp.f32 %v1393_v38  ;;  %v1972_v1 = vmul.f32 -1.442695, %v2863_v62 }
 0x372   : > { %2354 = vpow2.f32 %v1971_v60  ;;  %v1970_v2 = vmul.f32 -1.442695, %v2867_v63 }
 0x373   : > { %2356 = vpow2.f32 %v1969_v61 }
 0x374   : > { %2358 = vpow2.f32 %v1972_v1  ;;  %v1114_v1 = vld [vmem:[%s2796_s15 + $0x98] sm:$0xff] }
 0x375   : > { %2360 = vpow2.f32 %v1970_v2  ;;  %v1117_v2 = vld [vmem:[%s2796_s15 + $0xb0] sm:$0xff] }
 0x376   : > { %v1479_v10 = vsub.f32 1.0, %v1117_v2 }
 0x378   : > { %v2347_v43 = vpop.eup %2346 }
 0x379   : > { %v2349_v7 = vpop.eup %2348  ;;  %v1442_v8 = vmul.f32 %v2347_v43, %v2841_v40 }
 0x37a   : > { %v2351_v9 = vpop.eup %2350  ;;  %v1440_v11 = vmul.f32 %v2349_v7, %v2844_v14  ;;  %v1493_v7 = vld [vmem:[%s2877_s16 + $0x28] sm:$0xff] }
 0x37b   : > { %v2353_v25 = vpop.eup %2352  ;;  %v1458_v26 = vmul.f32 %v1442_v8, %v1102_v3  ;;  %v1443_v27 = vmul.f32 %v2351_v9, %v2847_v15  ;;  %v1108_v3 = vld [vmem:[%s2796_s15 + $0x68] sm:$0xff]  ;;  %v1495_v8 = vld [vmem:[%s2877_s16 + $0x38] sm:$0xff]  ;;  %v1133_v9 = vld [vmem:[%s2796_s15 + $0x130] sm:$0xff] }
 0x37c   : > { %v2355_v30 = vpop.eup %2354  ;;  %v1456_v34 = vmul.f32 %v1440_v11, %v1096_v4  ;;  %v1441_v36 = vmul.f32 %v2353_v25, %v2850_v54  ;;  %v2130_v40 = vpop.f32.mrb[40].mxu0  ;;  %v1111_v4 = vld [vmem:[%s2796_s15 + $0x80] sm:$0xff]  ;;  %v1476_v41 = vsub.f32 1.0, %v1108_v3 }
 0x37d   : > { %v2357_v13 = vpop.eup %2356  ;;  %v1522_v46 = vadd.f32 %v1506_v22, %v1458_v26  ;;  %v1459_v52 = vmul.f32 %v1443_v27, %v1105_v39  ;;  %v1398_v14 = vadd.f32 1.0, %v2355_v30  ;;  %v2892_v17 = vadd.f32 %v2130_v40, %v1127_v47  ;;  %v1297_v48 = vpop.f32.mrb[41].mxu0  ;;  %v1142_v27 = vld [vmem:[%s2796_s15 + $0x178] sm:$0xff] }
 0x37e   : > { %v2359_v55 = vpop.eup %2358  ;;  %v1457_v57 = vmul.f32 %v1441_v36, %v1099_v5  ;;  %v1396_v15 = vadd.f32 1.0, %v2357_v13  ;;  %v2895_v31 = vadd.f32 %v1297_v48, %v1121_v29  ;;  %v2131_v32 = vpop.f32.mrb[42].mxu0  ;;  %v1520_v51 = vadd.f32 %v1504_v24, %v1456_v34  ;;  %v1494_v5 = vld [vmem:[%s2877_s16 + $0x30] sm:$0xff]  ;;  %v1136_v36 = vld [vmem:[%s2796_s15 + $0x148] sm:$0xff] }
 0x37f   : > { %v2361_v33 = vpop.eup %2360  ;;  %v1523_v54 = vadd.f32 %v1507_v28, %v1459_v52  ;;  %2362 = vrcp.f32 %v1398_v14  ;;  %v1399_v35 = vadd.f32 1.0, %v2359_v55  ;;  %v1975_v53 = vmul.f32 -1.442695, %v2892_v17  ;;  %v1300_v19 = vpop.f32.mrb[43].mxu0 }
 0x380   : > { %2364 = vrcp.f32 %v1396_v15  ;;  %v1397_v56 = vadd.f32 1.0, %v2361_v33  ;;  %v1973_v58 = vmul.f32 -1.442695, %v2895_v31  ;;  %v2900_v59 = vadd.f32 %v2131_v32, %v1130_v49 }
 0x381   : > { %v1537_v37 = vpack.c.bf16 %v1523_v54, %v1522_v46  ;;  %2366 = vrcp.f32 %v1399_v35  ;;  %v2902_v23 = vadd.f32 %v1300_v19, %v1124_v50  ;;  %v1521_v38 = vadd.f32 %v1505_v42, %v1457_v57 }
 0x382   : > { %2368 = vrcp.f32 %v1397_v56  ;;  %v1976_v60 = vmul.f32 -1.442695, %v2900_v59  ;;  %v1478_v39 = vsub.f32 1.0, %v1114_v1  ;;  %v1477_v12 = vsub.f32 1.0, %v1111_v4 }
 0x383   : > { %2370 = vpow2.f32 %v1975_v53  ;;  %v1974_v0 = vmul.f32 -1.442695, %v2902_v23  ;;  %v1536_v61 = vpack.c.bf16 %v1521_v38, %v1520_v51  ;;  %v1508_v28 = vmul.f32 %v1492_v16, %v1476_v41 }
 0x384   : > { %2372 = vpow2.f32 %v1973_v58  ;;  %v1510_v11 = vmul.f32 %v1494_v5, %v1478_v39  ;;  %v1509_v40 = vmul.f32 %v1493_v7, %v1477_v12  ;;  %v1511_v42 = vmul.f32 %v1495_v8, %v1479_v10  ;;  %v1499_v10 = vld [vmem:[%s2877_s16 + $0x58] sm:$0xff] }
 0x385   : > { %2374 = vpow2.f32 %v1976_v60  ;;  %2152 = vmatprep.mubr.bf16.mxu1 %v1536_v61  ;;  %v1129_v61 = vld [vmem:[%s2796_s15 + $0x110] sm:$0xff] }
 0x386   : > { %2376 = vpow2.f32 %v1974_v0  ;;  %2153 = vmatmul.mubr.bf16.vlgmr.msra.gmra.mrb[32].mxu1 %v1537_v37  ;;  %v1126_v0 = vld [vmem:[%s2796_s15 + $0xf8] sm:$0xff] }
 0x389   : > { %v2363_v6 = vpop.eup %2362 }
 0x38a   : > { %v2365_v43 = vpop.eup %2364  ;;  %v1446_v44 = vmul.f32 %v2363_v6, %v2857_v20  ;;  %v1498_v6 = vld [vmem:[%s2877_s16 + $0x50] sm:$0xff] }
 0x38b   : > { %v2367_v22 = vpop.eup %2366  ;;  %v1444_v45 = vmul.f32 %v2365_v43, %v2860_v21  ;;  %v1496_v43 = vld [vmem:[%s2877_s16 + $0x40] sm:$0xff] }
 0x38c   : > { %v2369_v47 = vpop.eup %2368  ;;  %v1462_v24 = vmul.f32 %v1446_v44, %v1114_v1  ;;  %v1447_v25 = vmul.f32 %v2367_v22, %v2863_v62  ;;  %v2134_v26 = vpop.f32.mrb[44].mxu0  ;;  %v1120_v1 = vld [vmem:[%s2796_s15 + $0xc8] sm:$0xff] }
 0x38d   : > { %v2371_v29 = vpop.eup %2370  ;;  %v1445_v30 = vmul.f32 %v2369_v47, %v2867_v63  ;;  %v2921_v20 = vadd.f32 %v2134_v26, %v1139_v18  ;;  %v1313_v34 = vpop.f32.mrb[45].mxu0  ;;  %v1460_v21 = vmul.f32 %v1444_v45, %v1108_v3  ;;  %v1123_v3 = vld [vmem:[%s2796_s15 + $0xe0] sm:$0xff]  ;;  %v1480_v41 = vsub.f32 1.0, %v1120_v1  ;;  %v1497_v44 = vld [vmem:[%s2877_s16 + $0x48] sm:$0xff] }
 0x38e   : > { %v2373_v13 = vpop.eup %2372  ;;  %v1463_v46 = vmul.f32 %v1447_v25, %v1117_v2  ;;  %v1402_v52 = vadd.f32 1.0, %v2371_v29  ;;  %v2924_v14 = vadd.f32 %v1313_v34, %v1133_v9  ;;  %v2135_v48 = vpop.f32.mrb[46].mxu0  ;;  %v1526_v63 = vadd.f32 %v1510_v11, %v1462_v24 }
 0x38f   : > { %v2375_v62 = vpop.eup %2374  ;;  %v1461_v49 = vmul.f32 %v1445_v30, %v1111_v4  ;;  %v1400_v55 = vadd.f32 1.0, %v2373_v13  ;;  %v2926_v57 = vadd.f32 %v2135_v48, %v1142_v27  ;;  %v1316_v15 = vpop.f32.mrb[47].mxu0  ;;  %v1979_v51 = vmul.f32 -1.442695, %v2921_v20  ;;  %v1138_v48 = vld [vmem:[%s2796_s15 + $0x158] sm:$0xff] }
 0x390   : > { %v2377_v32 = vpop.eup %2376  ;;  %2378 = vrcp.f32 %v1402_v52  ;;  %v1403_v50 = vadd.f32 1.0, %v2375_v62  ;;  %v2929_v33 = vadd.f32 %v1316_v15, %v1136_v36  ;;  %v1977_v35 = vmul.f32 -1.442695, %v2924_v14  ;;  %v1141_v62 = vld [vmem:[%s2796_s15 + $0x170] sm:$0xff] }
 0x391   : > { %2380 = vrcp.f32 %v1400_v55  ;;  %v1401_v54 = vadd.f32 1.0, %v2377_v32  ;;  %v1980_v53 = vmul.f32 -1.442695, %v2926_v57  ;;  %v1524_v19 = vadd.f32 %v1508_v28, %v1460_v21  ;;  %v1135_v55 = vld [vmem:[%s2796_s15 + $0x140] sm:$0xff] }
 0x392   : > { %2382 = vrcp.f32 %v1403_v50  ;;  %v1525_v56 = vadd.f32 %v1509_v40, %v1461_v49  ;;  %v1527_v58 = vadd.f32 %v1511_v42, %v1463_v46  ;;  %v1978_v37 = vmul.f32 -1.442695, %v2929_v33  ;;  %v1132_v49 = vld [vmem:[%s2796_s15 + $0x128] sm:$0xff] }
 0x393   : > { %2384 = vrcp.f32 %v1401_v54  ;;  %v1482_v2 = vsub.f32 1.0, %v1126_v0  ;;  %v1483_v4 = vsub.f32 1.0, %v1129_v61  ;;  %v1481_v5 = vsub.f32 1.0, %v1123_v3  ;;  %v1502_v54 = vld [vmem:[%s2877_s16 + $0x70] sm:$0xff] }
 0x394   : > { %2386 = vpow2.f32 %v1979_v51  ;;  %v1538_v38 = vpack.c.bf16 %v1525_v56, %v1524_v19  ;;  %v1539_v60 = vpack.c.bf16 %v1527_v58, %v1526_v63  ;;  %v1512_v26 = vmul.f32 %v1496_v43, %v1480_v41  ;;  %v1500_v56 = vld [vmem:[%s2877_s16 + $0x60] sm:$0xff]  ;;  %v1501_v58 = vld [vmem:[%s2877_s16 + $0x68] sm:$0xff] }
 0x395   : > { %2388 = vpow2.f32 %v1977_v35  ;;  %v1514_v9 = vmul.f32 %v1498_v6, %v1482_v2  ;;  %v1515_v11 = vmul.f32 %v1499_v10, %v1483_v4  ;;  %v1513_v27 = vmul.f32 %v1497_v44, %v1481_v5  ;;  %v1503_v35 = vld [vmem:[%s2877_s16 + $0x78] sm:$0xff] }
 0x396   : > { %2390 = vpow2.f32 %v1980_v53  ;;  %2156 = vmatprep.mubr.bf16.mxu1 %v1538_v38  ;;  %v1486_v15 = vsub.f32 1.0, %v1138_v48  ;;  %v1487_v63 = vsub.f32 1.0, %v1141_v62  ;;  %v1484_v50 = vsub.f32 1.0, %v1132_v49 }
 0x397   : > { %2392 = vpow2.f32 %v1978_v37  ;;  %2157 = vmatmul.mubr.bf16.gmra.mrb[36].mxu1 %v1539_v60  ;;  %v1485_v51 = vsub.f32 1.0, %v1135_v55 }
 0x399   : > { %v1517_v41 = vmul.f32 %v1501_v58, %v1485_v51 }
 0x39a   : > { %v2379_v39 = vpop.eup %2378 }
 0x39b   : > { %v2381_v12 = vpop.eup %2380  ;;  %v1450_v16 = vmul.f32 %v2379_v39, %v2892_v17  ;;  %v1516_v39 = vmul.f32 %v1500_v56, %v1484_v50 }
 0x39c   : > { %v2383_v18 = vpop.eup %2382  ;;  %v1448_v7 = vmul.f32 %v2381_v12, %v2895_v31 }
 0x39d   : > { %v2385_v8 = vpop.eup %2384  ;;  %v1466_v22 = vmul.f32 %v1450_v16, %v1126_v0  ;;  %v1451_v45 = vmul.f32 %v2383_v18, %v2900_v59 }
 0x39e   : > { %v2387_v47 = vpop.eup %2386  ;;  %v1464_v24 = vmul.f32 %v1448_v7, %v1120_v1  ;;  %v1449_v25 = vmul.f32 %v2385_v8, %v2902_v23  ;;  %v1518_v1 = vmul.f32 %v1502_v54, %v1486_v15 }
 0x39f   : > { %v2389_v28 = vpop.eup %2388  ;;  %v1467_v29 = vmul.f32 %v1451_v45, %v1129_v61  ;;  %v1406_v17 = vadd.f32 1.0, %v2387_v47  ;;  %v1530_v40 = vadd.f32 %v1514_v9, %v1466_v22 }
 0x3a0   : > { %v2391_v30 = vpop.eup %2390  ;;  %v1465_v34 = vmul.f32 %v1449_v25, %v1123_v3  ;;  %v1404_v36 = vadd.f32 1.0, %v2389_v28  ;;  %v1528_v23 = vadd.f32 %v1512_v26, %v1464_v24  ;;  %v1519_v3 = vmul.f32 %v1503_v35, %v1487_v63 }
 0x3a1   : > { %v2393_v31 = vpop.eup %2392  ;;  %2394 = vrcp.f32 %v1406_v17  ;;  %v1407_v59 = vadd.f32 1.0, %v2391_v30  ;;  %v1531_v42 = vadd.f32 %v1515_v11, %v1467_v29 }
 0x3a2   : > { %2396 = vrcp.f32 %v1404_v36  ;;  %v1405_v13 = vadd.f32 1.0, %v2393_v31  ;;  %v1529_v21 = vadd.f32 %v1513_v27, %v1465_v34 }
 0x3a3   : > { %2398 = vrcp.f32 %v1407_v59  ;;  %v1541_v46 = vpack.c.bf16 %v1531_v42, %v1530_v40 }
 0x3a4   : > { %2400 = vrcp.f32 %v1405_v13  ;;  %v1540_v52 = vpack.c.bf16 %v1529_v21, %v1528_v23 }
 0x3a6   : > { %2160 = vmatprep.mubr.bf16.mxu1 %v1540_v52 }
 0x3a7   : > { %2161 = vmatmul.mubr.bf16.gmra.mrb[40].mxu1 %v1541_v46 }
 0x3ab   : > { %v2395_v32 = vpop.eup %2394 }
 0x3ac   : > { %v2397_v53 = vpop.eup %2396  ;;  %v1454_v19 = vmul.f32 %v2395_v32, %v2921_v20 }
 0x3ad   : > { %v2399_v37 = vpop.eup %2398  ;;  %v1452_v38 = vmul.f32 %v2397_v53, %v2924_v14  ;;  %v2961_v14 = vld [vmem:[%s3012_s7] ss:$0 sm:$0xff] }
 0x3ae   : > { %v2401_v60 = vpop.eup %2400  ;;  %v1470_v0 = vmul.f32 %v1454_v19, %v1138_v48  ;;  %v1455_v61 = vmul.f32 %v2399_v37, %v2926_v57 }
 0x3af   : > { %v1468_v2 = vmul.f32 %v1452_v38, %v1132_v49  ;;  %v1453_v4 = vmul.f32 %v2401_v60, %v2929_v33 }
 0x3b0   : > { %v1471_v5 = vmul.f32 %v1455_v61, %v1141_v62  ;;  %v1534_v10 = vadd.f32 %v1518_v1, %v1470_v0 }
 0x3b1   : > { %v1469_v6 = vmul.f32 %v1453_v4, %v1135_v55  ;;  %v1532_v12 = vadd.f32 %v1516_v39, %v1468_v2 }
 0x3b2   : > { %v1535_v20 = vadd.f32 %v1519_v3, %v1471_v5 }
 0x3b3   : > { %v1533_v16 = vadd.f32 %v1517_v41, %v1469_v6 }
 0x3b4   : > { %v1543_v43 = vpack.c.bf16 %v1535_v20, %v1534_v10 }
 0x3b5   : > { %v1542_v44 = vpack.c.bf16 %v1533_v16, %v1532_v12 }
 0x3b7   : > { %2164 = vmatprep.mubr.bf16.mxu1 %v1542_v44 }
 0x3b8   : > { %2165 = vmatmul.mubr.bf16.gmra.mrb[44].mxu1 %v1543_v43 }
 0x459   : > { %v2154_v57 = vpop.f32.mrb[32].mxu1 }
 0x45a   : > { %v1658_v33 = vadd.f32 %v2154_v57, %v2961_v14  ;;  %v1649_v18 = vpop.f32.mrb[33].mxu1 }
 0x45b   : > { %v1650_v7 = vadd.f32 %v2961_v14, %v1649_v18  ;;  %v2155_v8 = vpop.f32.mrb[34].mxu1 }
 0x45c   : > { %v1992_v22 = vmul.f32 -1.442695, %v1658_v33  ;;  %v1661_v45 = vadd.f32 %v2155_v8, %v2961_v14  ;;  %v1652_v9 = vpop.f32.mrb[35].mxu1 }
 0x45d   : > { %v1990_v11 = vmul.f32 -1.442695, %v1650_v7  ;;  %v1653_v47 = vadd.f32 %v2961_v14, %v1652_v9 }
 0x45e   : > { %2402 = vpow2.f32 %v1992_v22  ;;  %v1993_v24 = vmul.f32 -1.442695, %v1661_v45 }
 0x45f   : > { %2404 = vpow2.f32 %v1990_v11  ;;  %v1991_v25 = vmul.f32 -1.442695, %v1653_v47 }
 0x460   : > { %2406 = vpow2.f32 %v1993_v24 }
 0x461   : > { %2408 = vpow2.f32 %v1991_v25 }
 0x468   : > { %v2403_v26 = vpop.eup %2402 }
 0x469   : > { %v2405_v27 = vpop.eup %2404  ;;  %v1762_v28 = vadd.f32 1.0, %v2403_v26 }
 0x46a   : > { %v2407_v29 = vpop.eup %2406  ;;  %v1760_v17 = vadd.f32 1.0, %v2405_v27  ;;  %v2158_v30 = vpop.f32.mrb[36].mxu1 }
 0x46b   : > { %v2409_v34 = vpop.eup %2408  ;;  %2410 = vrcp.f32 %v1762_v28  ;;  %v1763_v36 = vadd.f32 1.0, %v2407_v29  ;;  %v1674_v31 = vadd.f32 %v2158_v30, %v2961_v14  ;;  %v1665_v59 = vpop.f32.mrb[37].mxu1 }
 0x46c   : > { %2412 = vrcp.f32 %v1760_v17  ;;  %v1761_v40 = vadd.f32 1.0, %v2409_v34  ;;  %v1666_v42 = vadd.f32 %v2961_v14, %v1665_v59  ;;  %v2159_v13 = vpop.f32.mrb[38].mxu1 }
 0x46d   : > { %2414 = vrcp.f32 %v1763_v36  ;;  %v1996_v23 = vmul.f32 -1.442695, %v1674_v31  ;;  %v1677_v21 = vadd.f32 %v2159_v13, %v2961_v14  ;;  %v1668_v46 = vpop.f32.mrb[39].mxu1 }
 0x46e   : > { %2416 = vrcp.f32 %v1761_v40  ;;  %v1994_v52 = vmul.f32 -1.442695, %v1666_v42  ;;  %v1669_v48 = vadd.f32 %v2961_v14, %v1668_v46 }
 0x46f   : > { %2418 = vpow2.f32 %v1996_v23  ;;  %v1997_v62 = vmul.f32 -1.442695, %v1677_v21 }
 0x470   : > { %2420 = vpow2.f32 %v1994_v52  ;;  %v1995_v49 = vmul.f32 -1.442695, %v1669_v48 }
 0x471   : > { %2422 = vpow2.f32 %v1997_v62 }
 0x472   : > { %2424 = vpow2.f32 %v1995_v49 }
 0x475   : > { %v2411_v55 = vpop.eup %2410 }
 0x476   : > { %v2413_v15 = vpop.eup %2412  ;;  %1810 = vst [vmem:[%s2976_s20 + $0x10] sm:$0xff] %v2411_v55 }
 0x477   : > { %v2415_v63 = vpop.eup %2414  ;;  %1808 = vst [vmem:[%s2976_s20] sm:$0xff] %v2413_v15 }
 0x478   : > { %v2417_v32 = vpop.eup %2416  ;;  %1811 = vst [vmem:[%s2976_s20 + $0x18] sm:$0xff] %v2415_v63 }
 0x479   : > { %v2419_v50 = vpop.eup %2418  ;;  %1809 = vst [vmem:[%s2976_s20 + $0x8] sm:$0xff] %v2417_v32 }
 0x47a   : > { %v2421_v51 = vpop.eup %2420  ;;  %v1766_v54 = vadd.f32 1.0, %v2419_v50  ;;  %v2162_v35 = vpop.f32.mrb[40].mxu1 }
 0x47b   : > { %v2423_v53 = vpop.eup %2422  ;;  %v1764_v19 = vadd.f32 1.0, %v2421_v51  ;;  %v1690_v56 = vadd.f32 %v2162_v35, %v2961_v14  ;;  %v1681_v58 = vpop.f32.mrb[41].mxu1 }
 0x47c   : > { %v2425_v37 = vpop.eup %2424  ;;  %2426 = vrcp.f32 %v1766_v54  ;;  %v1767_v38 = vadd.f32 1.0, %v2423_v53  ;;  %v1682_v60 = vadd.f32 %v2961_v14, %v1681_v58  ;;  %v2163_v0 = vpop.f32.mrb[42].mxu1 }
 0x47d   : > { %2428 = vrcp.f32 %v1764_v19  ;;  %v1765_v61 = vadd.f32 1.0, %v2425_v37  ;;  %v2000_v1 = vmul.f32 -1.442695, %v1690_v56  ;;  %v1693_v3 = vadd.f32 %v2163_v0, %v2961_v14  ;;  %v1684_v2 = vpop.f32.mrb[43].mxu1 }
 0x47e   : > { %2430 = vrcp.f32 %v1767_v38  ;;  %v1998_v4 = vmul.f32 -1.442695, %v1682_v60  ;;  %v1685_v39 = vadd.f32 %v2961_v14, %v1684_v2 }
 0x47f   : > { %2432 = vrcp.f32 %v1765_v61  ;;  %v2001_v41 = vmul.f32 -1.442695, %v1693_v3 }
 0x480   : > { %2434 = vpow2.f32 %v2000_v1  ;;  %v1999_v5 = vmul.f32 -1.442695, %v1685_v39 }
 0x481   : > { %2436 = vpow2.f32 %v1998_v4 }
 0x482   : > { %2438 = vpow2.f32 %v2001_v41 }
 0x483   : > { %2440 = vpow2.f32 %v1999_v5 }
 0x486   : > { %v2427_v6 = vpop.eup %2426 }
 0x487   : > { %v2429_v10 = vpop.eup %2428  ;;  %1814 = vst [vmem:[%s2976_s20 + $0x30] sm:$0xff] %v2427_v6 }
 0x488   : > { %v2431_v20 = vpop.eup %2430  ;;  %1812 = vst [vmem:[%s2976_s20 + $0x20] sm:$0xff] %v2429_v10 }
 0x489   : > { %v2433_v12 = vpop.eup %2432  ;;  %1815 = vst [vmem:[%s2976_s20 + $0x38] sm:$0xff] %v2431_v20 }
 0x48a   : > { %v2435_v16 = vpop.eup %2434  ;;  %1813 = vst [vmem:[%s2976_s20 + $0x28] sm:$0xff] %v2433_v12 }
 0x48b   : > { %v2437_v43 = vpop.eup %2436  ;;  %v1770_v44 = vadd.f32 1.0, %v2435_v16  ;;  %v2166_v57 = vpop.f32.mrb[44].mxu1 }
 0x48c   : > { %v2439_v33 = vpop.eup %2438  ;;  %v1768_v18 = vadd.f32 1.0, %v2437_v43  ;;  %v1706_v7 = vadd.f32 %v2166_v57, %v2961_v14  ;;  %v1697_v8 = vpop.f32.mrb[45].mxu1 }
 0x48d   : > { %v2441_v22 = vpop.eup %2440  ;;  %2442 = vrcp.f32 %v1770_v44  ;;  %v1771_v45 = vadd.f32 1.0, %v2439_v33  ;;  %v1698_v9 = vadd.f32 %v2961_v14, %v1697_v8  ;;  %v2167_v11 = vpop.f32.mrb[46].mxu1 }
 0x48e   : > { %2444 = vrcp.f32 %v1768_v18  ;;  %v1769_v47 = vadd.f32 1.0, %v2441_v22  ;;  %v2004_v24 = vmul.f32 -1.442695, %v1706_v7  ;;  %v1709_v25 = vadd.f32 %v2167_v11, %v2961_v14  ;;  %v1700_v26 = vpop.f32.mrb[47].mxu1 }
 0x48f   : > { %2446 = vrcp.f32 %v1771_v45  ;;  %v2002_v27 = vmul.f32 -1.442695, %v1698_v9  ;;  %v1701_v28 = vadd.f32 %v2961_v14, %v1700_v26 }
 0x490   : > { %2448 = vrcp.f32 %v1769_v47  ;;  %v2005_v29 = vmul.f32 -1.442695, %v1709_v25 }
 0x491   : > { %2450 = vpow2.f32 %v2004_v24  ;;  %v2003_v17 = vmul.f32 -1.442695, %v1701_v28 }
 0x492   : > { %2452 = vpow2.f32 %v2002_v27 }
 0x493   : > { %2454 = vpow2.f32 %v2005_v29 }
 0x494   : > { %2456 = vpow2.f32 %v2003_v17 }
 0x497   : > { %v2443_v30 = vpop.eup %2442 }
 0x498   : > { %v2445_v34 = vpop.eup %2444  ;;  %1818 = vst [vmem:[%s2976_s20 + $0x50] sm:$0xff] %v2443_v30 }
 0x499   : > { %v2447_v36 = vpop.eup %2446  ;;  %1816 = vst [vmem:[%s2976_s20 + $0x40] sm:$0xff] %v2445_v34 }
 0x49a   : > { %v2449_v31 = vpop.eup %2448  ;;  %1819 = vst [vmem:[%s2976_s20 + $0x58] sm:$0xff] %v2447_v36 }
 0x49b   : > { %v2451_v59 = vpop.eup %2450  ;;  %1817 = vst [vmem:[%s2976_s20 + $0x48] sm:$0xff] %v2449_v31 }
 0x49c   : > { %v2453_v14 = vpop.eup %2452  ;;  %v1774_v40 = vadd.f32 1.0, %v2451_v59 }
 0x49d   : > { %v2455_v42 = vpop.eup %2454  ;;  %v1772_v13 = vadd.f32 1.0, %v2453_v14 }
 0x49e   : > { %v2457_v23 = vpop.eup %2456  ;;  %2458 = vrcp.f32 %v1774_v40  ;;  %v1775_v21 = vadd.f32 1.0, %v2455_v42 }
 0x49f   : > { %2460 = vrcp.f32 %v1772_v13  ;;  %v1773_v46 = vadd.f32 1.0, %v2457_v23 }
 0x4a0   : > { %2462 = vrcp.f32 %v1775_v21 }
 0x4a1   : > { %2464 = vrcp.f32 %v1773_v46 }
 0x4a8   : > { %v2459_v52 = vpop.eup %2458 }
 0x4a9   : > { %v2461_v48 = vpop.eup %2460  ;;  %1822 = vst [vmem:[%s2976_s20 + $0x70] sm:$0xff] %v2459_v52 }
 0x4aa   : > { %v2463_v62 = vpop.eup %2462  ;;  %1820 = vst [vmem:[%s2976_s20 + $0x60] sm:$0xff] %v2461_v48 }
 0x4ab   : > { %v2465_v49 = vpop.eup %2464  ;;  %1823 = vst [vmem:[%s2976_s20 + $0x78] sm:$0xff] %v2463_v62 }
 0x4ac   : > { %1821 = vst [vmem:[%s2976_s20 + $0x68] sm:$0xff] %v2465_v49 }
 0x4ad PF: > { %s18_s27 = sadd.s32 1, %s2472_s27  }
 0x4ae   : > { %p15_p4 = scmp.ge.s32.totalorder %s18_s27, 4  }
 0x4b0   :  { %17 = sbr.rel (!%p15_p4) target bundleno = 1 (0x1), region = 88 }

// kernel: mega_decoder_forward.2
= control target key start
LH: loop header
LB: loop body
LE: loop exit
PB: predicated region body
PF: predicated region fallthrough
CT: control target
= control target key end

     0   :  { %s3828_s21 = smov 0   ;;  %s3830_s22 = smov 0   ;;  %s4794_s0 = inlined_call_operand.vmem [shape: f32[256,128], index: 0, kind: input, shape index: {}]   ;;  %s4795_s1 = inlined_call_operand.vmem [shape: f32[256,128], index: 1, kind: input, shape index: {}]   ;;  %s4796_s2 = inlined_call_operand.vmem [shape: bf16[128,256], index: 2, kind: input, shape index: {}]   ;;  %s4797_s3 = inlined_call_operand.vmem [shape: bf16[128,256], index: 3, kind: input, shape index: {}]   ;;  %s4798_s4 = inlined_call_operand.vmem [shape: f32[1,256], index: 4, kind: input, shape index: {}]   ;;  %s4799_s5 = inlined_call_operand.vmem [shape: bf16[128,128], index: 5, kind: input, shape index: {}]   ;;  %s4800_s6 = inlined_call_operand.vmem [shape: f32[1,128], index: 6, kind: input, shape index: {}]   ;;  %s4801_s7 = inlined_call_operand.vmem [shape: bf16[128,768], index: 7, kind: input, shape index: {}]   ;;  %s4802_s8 = inlined_call_operand.vmem [shape: f32[1,768], index: 8, kind: input, shape index: {}]   ;;  %s4803_s9 = inlined_call_operand.vmem [shape: bf16[256,128], index: 9, kind: output, shape index: {0}]   ;;  %s4804_s10 = inlined_call_operand.vmem [shape: bf16[128,256], index: 10, kind: output, shape index: {1}]   ;;  %s4805_s11 = inlined_call_operand.vmem [shape: bf16[256,128], index: 11, kind: output, shape index: {2}]   ;;  %s4806_s12 = inlined_call_operand.vmem [shape: f32[256,384], index: 12, kind: output, shape index: {3}]  }
   0x1   :  { %s3832_s23 = smov 0  }
   0x2 LB: > { %s3841_s24 = sadd.s32 4294967295, %s3760_s23   ;;  %s3843_s25 = sadd.s32 1, %s3760_s23   ;;  %s3760_s23 = sphi %s3832_s23, %s4810_s23   ;;  %s3756_s22 = sphi %s3830_s22, %s4809_s22   ;;  %s3752_s21 = sphi %s3828_s21, %s4808_s21  }
   0x3   : > { %s252_s26 = ssub.s32 %s3760_s23, %s3843_s25  ;;  %s255_s27 = sadd.s32 1, %s3756_s22 }
   0x4   : > { %p253_p0 = scmp.eq.s32.totalorder %s252_s26, 0  ;;  %p265_p1 = scmp.ne.s32.totalorder %s3756_s22, %s3752_s21 }
   0x5   : > { %p266_p2 = scmp.eq.s32.totalorder %s3841_s24, 1  ;;  %p2842_p3 = scmp.ge.s32.totalorder %s3760_s23, 1 }
   0x6   : > { %s3851_s28 = scalar_select %p253_p0, %s3756_s22, %s255_s27  }
   0x7   : > { %p3853_p4 = por %p266_p2, %p265_p1  ;;  %p381_p5 = scmp.lt.s32.totalorder %s3760_s23, 3 }
   0x9   : > { %p382_p6 = pnand %p2842_p3, %p381_p5 }
   0xa   : > { %v3354_v0 = vld [vmem:[%s4797_s3 + $0x4] ss:$8 sps:$4 sm:$0xff] (!%p382_p6)   ;;  %v3356_v1 = vld [vmem:[%s4797_s3] ss:$8 sps:$4 sm:$0xff] (!%p382_p6)   ;;  %v3762_v2 = vmov (!%p382_p6), 0   ;;  %s2844_s14 = sshll.u32 (!%p382_p6), %s3841_s24, 4 }
   0xb   : > { %385 = sbr.rel (%p382_p6) target bundleno = 1018 (0x3fa), region = 56  ;;  %667 = vmatprep.mubr.bf16.mxu0 (!%p382_p6), %v3762_v2  ;;  %635 = vmatprep.subr.bf16.mxu0 (!%p382_p6), %v3354_v0  ;;  %v3357_v3 = vld [vmem:[%s4797_s3 + $0x14] ss:$8 sps:$4 sm:$0xff] (!%p382_p6)   ;;  %v3359_v4 = vld [vmem:[%s4797_s3 + $0x10] ss:$8 sps:$4 sm:$0xff] (!%p382_p6)   ;;  %p444_p7 = scmp.lt.s32.totalorder (!%p382_p6), %s2844_s14, 31 }
   0xc   : > { %636 = vmatpush1.bf16.msra.mxu0 (!%p382_p6), %v3356_v1  ;;  %v3360_v5 = vld [vmem:[%s4797_s3 + $0x24] ss:$8 sps:$4 sm:$0xff] (!%p382_p6)   ;;  %v3362_v6 = vld [vmem:[%s4797_s3 + $0x20] ss:$8 sps:$4 sm:$0xff] (!%p382_p6)   ;;  %v3363_v7 = vld [vmem:[%s4797_s3 + $0x34] ss:$8 sps:$4 sm:$0xff] (!%p382_p6)  }
   0xd   : > { %637 = vmatprep.subr.bf16.mxu0 (!%p382_p6), %v3357_v3  ;;  %v3365_v8 = vld [vmem:[%s4797_s3 + $0x30] ss:$8 sps:$4 sm:$0xff] (!%p382_p6)   ;;  %v3366_v9 = vld [vmem:[%s4797_s3 + $0x44] ss:$8 sps:$4 sm:$0xff] (!%p382_p6)   ;;  %v3368_v10 = vld [vmem:[%s4797_s3 + $0x40] ss:$8 sps:$4 sm:$0xff] (!%p382_p6)  }
   0xe   : > { %v3369_v11 = vld [vmem:[%s4797_s3 + $0x54] ss:$8 sps:$4 sm:$0xff] (!%p382_p6)   ;;  %v3371_v12 = vld [vmem:[%s4797_s3 + $0x50] ss:$8 sps:$4 sm:$0xff] (!%p382_p6)   ;;  %v3372_v13 = vld [vmem:[%s4797_s3 + $0x64] ss:$8 sps:$4 sm:$0xff] (!%p382_p6)  }
   0xf   : > { %v3374_v14 = vld [vmem:[%s4797_s3 + $0x60] ss:$8 sps:$4 sm:$0xff] (!%p382_p6)   ;;  %v3375_v15 = vld [vmem:[%s4797_s3 + $0x74] ss:$8 sps:$4 sm:$0xff] (!%p382_p6)   ;;  %v3377_v16 = vld [vmem:[%s4797_s3 + $0x70] ss:$8 sps:$4 sm:$0xff] (!%p382_p6)  }
  0x10   : > { %638 = vmatpush1.bf16.msra.mxu0 (!%p382_p6), %v3359_v4  ;;  %v3380_v19 = vld [vmem:[%s4796_s2 + $0x4] ss:$8 sps:$4 sm:$0xff] (!%p382_p6)   ;;  %v3378_v21 = vld [vmem:[%s4796_s2] ss:$8 sps:$4 sm:$0xff] (!%p382_p6)   ;;  %v3383_v22 = vld [vmem:[%s4796_s2 + $0x14] ss:$8 sps:$4 sm:$0xff] (!%p382_p6)  }
  0x11   : > { %639 = vmatprep.subr.bf16.mxu0 (!%p382_p6), %v3360_v5  ;;  %v3381_v25 = vld [vmem:[%s4796_s2 + $0x10] ss:$8 sps:$4 sm:$0xff] (!%p382_p6)   ;;  %v3386_v26 = vld [vmem:[%s4796_s2 + $0x24] ss:$8 sps:$4 sm:$0xff] (!%p382_p6)   ;;  %v3384_v27 = vld [vmem:[%s4796_s2 + $0x20] ss:$8 sps:$4 sm:$0xff] (!%p382_p6)  }
  0x12   : > { %s4812_s14 = smov (!%p444_p7, %s2844_s14), 31  ;;  %v3389_v29 = vld [vmem:[%s4796_s2 + $0x34] ss:$8 sps:$4 sm:$0xff]   ;;  %v3387_v32 = vld [vmem:[%s4796_s2 + $0x30] ss:$8 sps:$4 sm:$0xff]   ;;  %s3040_s26 = sshll.u32 (%p3853_p4), %s3841_s24, 2 }
  0x13   : > { %s2845_s16 = sshll.u32 %s4812_s14, 3  ;;  %v3392_v33 = vld [vmem:[%s4796_s2 + $0x44] ss:$8 sps:$4 sm:$0xff]   ;;  %v3390_v34 = vld [vmem:[%s4796_s2 + $0x40] ss:$8 sps:$4 sm:$0xff]   ;;  %s3328_s23 = smul.u32 24, %s4812_s14 }
  0x14   : > { %640 = vmatpush1.bf16.msra.mxu0 %v3362_v6  ;;  %s3912_s27 = scalar_lea.vmem %s4794_s0, %s2845_s16  ;;  %v3395_v36 = vld [vmem:[%s4796_s2 + $0x54] ss:$8 sps:$4 sm:$0xff]   ;;  %v3393_v39 = vld [vmem:[%s4796_s2 + $0x50] ss:$8 sps:$4 sm:$0xff]   ;;  %v3398_v40 = vld [vmem:[%s4796_s2 + $0x64] ss:$8 sps:$4 sm:$0xff]   ;;  %s4041_s30 = scalar_lea.vmem %s4795_s1, %s2845_s16 }
  0x15   : > { %641 = vmatprep.subr.bf16.mxu0 %v3363_v7  ;;  %v3918_v17 = vld [vmem:[%s3912_s27] sm:$0xff]  ;;  %v3921_v18 = vld [vmem:[%s3912_s27 + $0x8] sm:$0xff]  ;;  %v3935_v23 = vld [vmem:[%s3912_s27 + $0x10] sm:$0xff]  ;;  %s4566_s16 = scalar_lea.vmem %s4806_s12, %s3328_s23 }
  0x16   : > { %v507_v20 = vpack.c.bf16 %v3921_v18, %v3918_v17  ;;  %v3938_v24 = vld [vmem:[%s3912_s27 + $0x18] sm:$0xff]  ;;  %v3956_v30 = vld [vmem:[%s3912_s27 + $0x20] sm:$0xff]  ;;  %v3959_v31 = vld [vmem:[%s3912_s27 + $0x28] sm:$0xff] }
  0x17   : > { %v508_v28 = vpack.c.bf16 %v3938_v24, %v3935_v23  ;;  %v509_v35 = vpack.c.bf16 %v3959_v31, %v3956_v30  ;;  %v3977_v37 = vld [vmem:[%s3912_s27 + $0x30] sm:$0xff]  ;;  %v3980_v38 = vld [vmem:[%s3912_s27 + $0x38] sm:$0xff]  ;;  %v3396_v42 = vld [vmem:[%s4796_s2 + $0x60] ss:$8 sps:$4 sm:$0xff]  }
  0x18   : > { %642 = vmatpush1.bf16.msra.mxu0 %v3365_v8  ;;  %v510_v41 = vpack.c.bf16 %v3980_v38, %v3977_v37  ;;  %v3401_v43 = vld [vmem:[%s4796_s2 + $0x74] ss:$8 sps:$4 sm:$0xff]   ;;  %v3999_v44 = vld [vmem:[%s3912_s27 + $0x40] sm:$0xff]  ;;  %v4002_v45 = vld [vmem:[%s3912_s27 + $0x48] sm:$0xff] }
  0x19   : > { %643 = vmatprep.subr.bf16.mxu0 %v3366_v9  ;;  %v3399_v46 = vld [vmem:[%s4796_s2 + $0x70] ss:$8 sps:$4 sm:$0xff]   ;;  %v511_v47 = vpack.c.bf16 %v4002_v45, %v3999_v44  ;;  %v4020_v51 = vld [vmem:[%s3912_s27 + $0x60] sm:$0xff]  ;;  %v4023_v52 = vld [vmem:[%s3912_s27 + $0x68] sm:$0xff] }
  0x1a   : > { %v4011_v48 = vld [vmem:[%s3912_s27 + $0x50] sm:$0xff]  ;;  %v4014_v49 = vld [vmem:[%s3912_s27 + $0x58] sm:$0xff]  ;;  %v513_v53 = vpack.c.bf16 %v4023_v52, %v4020_v51  ;;  %v4045_v57 = vld [vmem:[%s4041_s30] sm:$0xff] }
  0x1b   : > { %v512_v50 = vpack.c.bf16 %v4014_v49, %v4011_v48  ;;  %v4029_v54 = vld [vmem:[%s3912_s27 + $0x70] sm:$0xff]  ;;  %v4032_v55 = vld [vmem:[%s3912_s27 + $0x78] sm:$0xff]  ;;  %v4048_v58 = vld [vmem:[%s4041_s30 + $0x8] sm:$0xff]  ;;  %s2849_s27 = sshll.u32 %s4812_s14, 2  ;;  %s425_s14 = sand.u32 1, %s3752_s21  }
  0x1c   : > { %644 = vmatpush1.bf16.msra.mxu0 %v3368_v10  ;;  %v514_v56 = vpack.c.bf16 %v4032_v55, %v4029_v54  ;;  %v515_v59 = vpack.c.bf16 %v4048_v58, %v4045_v57  ;;  %v4054_v60 = vld [vmem:[%s4041_s30 + $0x10] sm:$0xff]  ;;  %v4057_v61 = vld [vmem:[%s4041_s30 + $0x18] sm:$0xff]  ;;  %v4063_v63 = vld [vmem:[%s4041_s30 + $0x20] sm:$0xff]  ;;  %s4581_s17 = scalar_lea.vmem %s4803_s9, %s2849_s27  ;;  %s4679_s20 = scalar_lea.vmem %s4805_s11, %s2849_s27 }
  0x1d   : > { %645 = vmatprep.subr.bf16.mxu0 %v3369_v11  ;;  %v516_v62 = vpack.c.bf16 %v4057_v61, %v4054_v60  ;;  %v4066_v0 = vld [vmem:[%s4041_s30 + $0x28] sm:$0xff]  ;;  %v4072_v3 = vld [vmem:[%s4041_s30 + $0x30] sm:$0xff]  ;;  %v4075_v4 = vld [vmem:[%s4041_s30 + $0x38] sm:$0xff]  ;;  %s2843_s23 = sshll.u32 %s425_s14, 6  ;;  %s2592_s27 = scalar_lea.vmem (%p3853_p4), %s4804_s10, %s3040_s26 }
  0x1e   : > { %v517_v1 = vpack.c.bf16 %v4066_v0, %v4063_v63  ;;  %v518_v5 = vpack.c.bf16 %v4075_v4, %v4072_v3  ;;  %v4081_v6 = vld [vmem:[%s4041_s30 + $0x40] sm:$0xff]  ;;  %v4084_v7 = vld [vmem:[%s4041_s30 + $0x48] sm:$0xff]  ;;  %v4090_v9 = vld [vmem:[%s4041_s30 + $0x50] sm:$0xff]  ;;  %s4740_s21 = scalar_lea.vmem [#allocation2], %s2843_s23 }
  0x1f   : > { %v519_v8 = vpack.c.bf16 %v4084_v7, %v4081_v6  ;;  %v4093_v10 = vld [vmem:[%s4041_s30 + $0x58] sm:$0xff] }
  0x20   : > { %646 = vmatpush1.bf16.msra.mxu0 %v3371_v12  ;;  %v520_v11 = vpack.c.bf16 %v4093_v10, %v4090_v9  ;;  %v4099_v12 = vld [vmem:[%s4041_s30 + $0x60] sm:$0xff] }
  0x21   : > { %647 = vmatprep.subr.bf16.mxu0 %v3372_v13  ;;  %v4102_v13 = vld [vmem:[%s4041_s30 + $0x68] sm:$0xff] }
  0x24   : > { %648 = vmatpush1.bf16.msra.mxu0 %v3374_v14  ;;  %v521_v14 = vpack.c.bf16 %v4102_v13, %v4099_v12 }
  0x25   : > { %649 = vmatprep.subr.bf16.mxu0 %v3375_v15  ;;  %v4108_v15 = vld [vmem:[%s4041_s30 + $0x70] sm:$0xff] }
  0x28   : > { %650 = vmatpush1.bf16.msra.mxu0 %v3377_v16  ;;  %v4111_v16 = vld [vmem:[%s4041_s30 + $0x78] sm:$0xff] }
  0x29   : > { %828 = vmatprep.subr.bf16.mxu0 %v3380_v19  ;;  %v522_v19 = vpack.c.bf16 %v4111_v16, %v4108_v15 }
  0x2b   : > { %668 = vmatmul.mubr.bf16.vlgmr.msra.gmra.mrb[0].mxu0 %v507_v20  ;;  %v3402_v20 = vld [vmem:[%s4799_s5] sm:$0xff]  }
  0x2c   : > { %829 = vmatpush1.bf16.msra.mxu0 %v3378_v21  ;;  %677 = vmatprep.mubr.bf16.mxu0 %v3762_v2  ;;  %v3403_v21 = vld [vmem:[%s4799_s5 + $0x8] sm:$0xff]  }
  0x2d   : > { %830 = vmatprep.subr.bf16.mxu0 %v3383_v22  ;;  %3248 = vmatprep.subr.bf16.mxu1 %v3402_v20  ;;  %v3404_v22 = vld [vmem:[%s4799_s5 + $0x10] sm:$0xff]  }
  0x2e   : > { %3249 = vmatpush3.bf16.msra.mxu1 %v3402_v20 }
  0x2f   : > { %3250 = vmatprep.subr.bf16.mxu1 %v3403_v21 }
  0x30   : > { %831 = vmatpush1.bf16.msra.mxu0 %v3381_v25  ;;  %v3405_v25 = vld [vmem:[%s4799_s5 + $0x18] sm:$0xff]  }
  0x31   : > { %832 = vmatprep.subr.bf16.mxu0 %v3386_v26  ;;  %v3406_v26 = vld [vmem:[%s4799_s5 + $0x20] sm:$0xff]  }
  0x32   : > { %3251 = vmatpush3.bf16.msra.mxu1 %v3403_v21 }
  0x33   : > { %678 = vmatmul.mubr.bf16.gmra.mrb[4].mxu0 %v508_v28  ;;  %3252 = vmatprep.subr.bf16.mxu1 %v3404_v22  ;;  %v3408_v28 = vld [vmem:[%s4799_s5 + $0x30] sm:$0xff]  }
  0x34   : > { %687 = vmatprep.mubr.bf16.mxu0 %v3762_v2  ;;  %833 = vmatpush1.bf16.msra.mxu0 %v3384_v27  ;;  %v3407_v27 = vld [vmem:[%s4799_s5 + $0x28] sm:$0xff]  }
  0x35   : > { %834 = vmatprep.subr.bf16.mxu0 %v3389_v29  ;;  %v3409_v29 = vld [vmem:[%s4799_s5 + $0x38] sm:$0xff]  }
  0x36   : > { %3253 = vmatpush3.bf16.msra.mxu1 %v3404_v22 }
  0x37   : > { %3254 = vmatprep.subr.bf16.mxu1 %v3405_v25 }
  0x38   : > { %835 = vmatpush1.bf16.msra.mxu0 %v3387_v32  ;;  %v943_v32 = vlaneseq }
  0x39   : > { %836 = vmatprep.subr.bf16.mxu0 %v3392_v33 }
  0x3a   : > { %3255 = vmatpush3.bf16.msra.mxu1 %v3405_v25  ;;  %v4140_v33 = vshrl.u32 %v943_v32, 7 }
  0x3b   : > { %688 = vmatmul.mubr.bf16.gmra.mrb[8].mxu0 %v509_v35  ;;  %3256 = vmatprep.subr.bf16.mxu1 %v3406_v26  ;;  %v941_v35 = vld [vmem:[%s4798_s4] sm:$0x3] }
  0x3c   : > { %697 = vmatprep.mubr.bf16.mxu0 %v3762_v2  ;;  %837 = vmatpush1.bf16.msra.mxu0 %v3390_v34  ;;  %v945_v34 = vsub.s32 0, %v4140_v33 }
  0x3d   : > { %838 = vmatprep.subr.bf16.mxu0 %v3395_v36  ;;  %v949_v36 = vsub.s32 1, %v4140_v33 }
  0x3e   : > { %3257 = vmatpush3.bf16.msra.mxu1 %v3406_v26 }
  0x3f   : > { %3258 = vmatprep.subr.bf16.mxu1 %v3407_v27 }
  0x40   : > { %839 = vmatpush1.bf16.msra.mxu0 %v3393_v39  ;;  %v4149_v39 = vrot.slane %v941_v35, %v945_v34 }
  0x41   : > { %840 = vmatprep.subr.bf16.mxu0 %v3398_v40  ;;  %v4153_v40 = vrot.slane %v941_v35, %v949_v36 }
  0x42   : > { %3259 = vmatpush3.bf16.msra.mxu1 %v3407_v27 }
  0x43   : > { %698 = vmatmul.mubr.bf16.gmra.mrb[12].mxu0 %v510_v41  ;;  %3260 = vmatprep.subr.bf16.mxu1 %v3408_v28 }
  0x44   : > { %707 = vmatprep.mubr.bf16.mxu0 %v3762_v2  ;;  %841 = vmatpush1.bf16.msra.mxu0 %v3396_v42 }
  0x45   : > { %842 = vmatprep.subr.bf16.mxu0 %v3401_v43 }
  0x46   : > { %3261 = vmatpush3.bf16.msra.mxu1 %v3408_v28 }
  0x47   : > { %3262 = vmatprep.subr.bf16.mxu1 %v3409_v29 }
  0x48   : > { %843 = vmatpush1.bf16.msra.mxu0 %v3399_v46 }
  0x4a   : > { %3263 = vmatpush3.bf16.msra.mxu1 %v3409_v29 }
  0x4b   : > { %708 = vmatmul.mubr.bf16.gmra.mrb[16].mxu0 %v511_v47 }
  0x4c   : > { %717 = vmatprep.mubr.bf16.mxu0 %v3762_v2 }
  0x53   : > { %718 = vmatmul.mubr.bf16.gmra.mrb[20].mxu0 %v512_v50 }
  0x54   : > { %727 = vmatprep.mubr.bf16.mxu0 %v3762_v2 }
  0x5b   : > { %728 = vmatmul.mubr.bf16.gmra.mrb[24].mxu0 %v513_v53 }
  0x5c   : > { %737 = vmatprep.mubr.bf16.mxu0 %v3762_v2 }
  0x63   : > { %738 = vmatmul.mubr.bf16.gmra.mrb[28].mxu0 %v514_v56 }
  0x64   : > { %860 = vmatprep.mubr.bf16.mxu0 %v3762_v2 }
  0x6b   : > { %861 = vmatmul.mubr.bf16.vlgmr.msra.gmra.mrb[0].mxu0 %v515_v59 }
  0x6c   : > { %870 = vmatprep.mubr.bf16.mxu0 %v3762_v2 }
  0x73   : > { %871 = vmatmul.mubr.bf16.gmra.mrb[4].mxu0 %v516_v62 }
  0x74   : > { %880 = vmatprep.mubr.bf16.mxu0 %v3762_v2 }
  0x7b   : > { %881 = vmatmul.mubr.bf16.gmra.mrb[8].mxu0 %v517_v1 }
  0x7c   : > { %890 = vmatprep.mubr.bf16.mxu0 %v3762_v2 }
  0x83   : > { %891 = vmatmul.mubr.bf16.gmra.mrb[12].mxu0 %v518_v5 }
  0x84   : > { %900 = vmatprep.mubr.bf16.mxu0 %v3762_v2 }
  0x8b   : > { %901 = vmatmul.mubr.bf16.gmra.mrb[16].mxu0 %v519_v8 }
  0x8c   : > { %910 = vmatprep.mubr.bf16.mxu0 %v3762_v2 }
  0x93   : > { %911 = vmatmul.mubr.bf16.gmra.mrb[20].mxu0 %v520_v11 }
  0x94   : > { %920 = vmatprep.mubr.bf16.mxu0 %v3762_v2 }
  0x9b   : > { %921 = vmatmul.mubr.bf16.gmra.mrb[24].mxu0 %v521_v14 }
  0x9c   : > { %930 = vmatprep.mubr.bf16.mxu0 %v3762_v2 }
  0xa3   : > { %931 = vmatmul.mubr.bf16.gmra.mrb[28].mxu0 %v522_v19 }
  0xa4   : > { %1971 = vmatprep.mubr.bf16.mxu0 %v3762_v2 }
 0x13e   : > { %v862_v41 = vpop.f32.mrb[0].mxu0 }
 0x13f   : > { %v953_v42 = vadd.f32 %v4149_v39, %v862_v41  ;;  %v864_v43 = vpop.f32.mrb[1].mxu0 }
 0x140   : > { %v954_v46 = vadd.f32 %v4153_v40, %v864_v43  ;;  %v866_v47 = vpop.f32.mrb[2].mxu0 }
 0x141   : > { %3482 = vtanh.f32 %v953_v42  ;;  %v955_v50 = vadd.f32 %v4149_v39, %v866_v47  ;;  %v868_v53 = vpop.f32.mrb[3].mxu0 }
 0x142   : > { %3484 = vtanh.f32 %v954_v46  ;;  %v956_v56 = vadd.f32 %v4153_v40, %v868_v53 }
 0x143   : > { %3486 = vtanh.f32 %v955_v50 }
 0x144   : > { %3488 = vtanh.f32 %v956_v56 }
 0x146   : > { %v872_v59 = vpop.f32.mrb[4].mxu0 }
 0x147   : > { %v957_v62 = vadd.f32 %v4149_v39, %v872_v59  ;;  %v874_v1 = vpop.f32.mrb[5].mxu0 }
 0x148   : > { %v958_v5 = vadd.f32 %v4153_v40, %v874_v1  ;;  %v876_v8 = vpop.f32.mrb[6].mxu0 }
 0x149   : > { %3490 = vtanh.f32 %v957_v62  ;;  %v959_v11 = vadd.f32 %v4149_v39, %v876_v8  ;;  %v878_v14 = vpop.f32.mrb[7].mxu0 }
 0x14a   : > { %3492 = vtanh.f32 %v958_v5  ;;  %v960_v19 = vadd.f32 %v4153_v40, %v878_v14 }
 0x14b   : > { %v3483_v20 = vpop.eup %3482  ;;  %3494 = vtanh.f32 %v959_v11 }
 0x14c   : > { %v3485_v21 = vpop.eup %3484  ;;  %3496 = vtanh.f32 %v960_v19  ;;  %v1033_v22 = vsub.f32 1.0, %v3483_v20  ;;  %v1017_v43 = vmul.f32 %v3483_v20, %v3918_v17 }
 0x14d   : > { %v3487_v25 = vpop.eup %3486 }
 0x14e   : > { %v3489_v26 = vpop.eup %3488  ;;  %v882_v27 = vpop.f32.mrb[8].mxu0  ;;  %v1034_v28 = vsub.f32 1.0, %v3487_v25  ;;  %v1049_v29 = vmul.f32 %v3485_v21, %v1033_v22  ;;  %v1018_v56 = vmul.f32 %v3487_v25, %v3921_v18 }
 0x14f   : > { %v961_v32 = vadd.f32 %v4149_v39, %v882_v27  ;;  %v884_v35 = vpop.f32.mrb[9].mxu0 }
 0x150   : > { %v962_v41 = vadd.f32 %v4153_v40, %v884_v35  ;;  %v886_v42 = vpop.f32.mrb[10].mxu0  ;;  %v1050_v46 = vmul.f32 %v3489_v26, %v1034_v28  ;;  %v1065_v47 = vmul.f32 %v1049_v29, %v4045_v57 }
 0x151   : > { %3498 = vtanh.f32 %v961_v32  ;;  %v963_v50 = vadd.f32 %v4149_v39, %v886_v42  ;;  %v888_v53 = vpop.f32.mrb[11].mxu0 }
 0x152   : > { %3500 = vtanh.f32 %v962_v41  ;;  %v964_v59 = vadd.f32 %v4153_v40, %v888_v53  ;;  %v1066_v62 = vmul.f32 %v1050_v46, %v4048_v58  ;;  %v1081_v1 = vadd.f32 %v1065_v47, %v1017_v43 }
 0x153   : > { %v3491_v5 = vpop.eup %3490  ;;  %3502 = vtanh.f32 %v963_v50 }
 0x154   : > { %v3493_v8 = vpop.eup %3492  ;;  %3504 = vtanh.f32 %v964_v59  ;;  %v1082_v17 = vadd.f32 %v1066_v62, %v1018_v56  ;;  %v1035_v11 = vsub.f32 1.0, %v3491_v5  ;;  %v1019_v58 = vmul.f32 %v3491_v5, %v3935_v23 }
 0x155   : > { %v3495_v14 = vpop.eup %3494 }
 0x156   : > { %v3497_v57 = vpop.eup %3496  ;;  %v892_v19 = vpop.f32.mrb[12].mxu0  ;;  %v1097_v20 = vpack.c.bf16 %v1082_v17, %v1081_v1  ;;  %v1036_v21 = vsub.f32 1.0, %v3495_v14  ;;  %v1051_v22 = vmul.f32 %v3493_v8, %v1035_v11  ;;  %v1020_v41 = vmul.f32 %v3495_v14, %v3938_v24 }
 0x157   : > { %v965_v18 = vadd.f32 %v4149_v39, %v892_v19  ;;  %v894_v25 = vpop.f32.mrb[13].mxu0 }
 0x158   : > { %v966_v26 = vadd.f32 %v4153_v40, %v894_v25  ;;  %v896_v27 = vpop.f32.mrb[14].mxu0  ;;  %3264 = vmatprep.mubr.bf16.mxu1 %v1097_v20  ;;  %v1052_v28 = vmul.f32 %v3497_v57, %v1036_v21  ;;  %v1067_v29 = vmul.f32 %v1051_v22, %v4054_v60 }
 0x159   : > { %3506 = vtanh.f32 %v965_v18  ;;  %v967_v32 = vadd.f32 %v4149_v39, %v896_v27  ;;  %v898_v35 = vpop.f32.mrb[15].mxu0 }
 0x15a   : > { %3508 = vtanh.f32 %v966_v26  ;;  %v968_v42 = vadd.f32 %v4153_v40, %v898_v35  ;;  %v1068_v43 = vmul.f32 %v1052_v28, %v4057_v61  ;;  %v1083_v46 = vadd.f32 %v1067_v29, %v1019_v58 }
 0x15b   : > { %v3499_v47 = vpop.eup %3498  ;;  %3510 = vtanh.f32 %v967_v32 }
 0x15c   : > { %v3501_v50 = vpop.eup %3500  ;;  %3512 = vtanh.f32 %v968_v42  ;;  %v1084_v23 = vadd.f32 %v1068_v43, %v1020_v41  ;;  %v1037_v53 = vsub.f32 1.0, %v3499_v47  ;;  %v1021_v61 = vmul.f32 %v3499_v47, %v3956_v30 }
 0x15d   : > { %v3503_v56 = vpop.eup %3502 }
 0x15e   : > { %v3505_v60 = vpop.eup %3504  ;;  %v902_v59 = vpop.f32.mrb[16].mxu0  ;;  %v1098_v62 = vpack.c.bf16 %v1084_v23, %v1083_v46  ;;  %v1038_v1 = vsub.f32 1.0, %v3503_v56  ;;  %v1053_v5 = vmul.f32 %v3501_v50, %v1037_v53  ;;  %v1022_v21 = vmul.f32 %v3503_v56, %v3959_v31 }
 0x15f   : > { %v969_v24 = vadd.f32 %v4149_v39, %v902_v59  ;;  %v904_v8 = vpop.f32.mrb[17].mxu0 }
 0x160   : > { %v970_v17 = vadd.f32 %v4153_v40, %v904_v8  ;;  %v906_v11 = vpop.f32.mrb[18].mxu0  ;;  %3265 = vmatmul.mubr.bf16.vlgmr.msra.gmra.mrb[0].mxu1 %v1098_v62  ;;  %v1054_v14 = vmul.f32 %v3505_v60, %v1038_v1  ;;  %v1069_v57 = vmul.f32 %v1053_v5, %v4063_v63 }
 0x161   : > { %3514 = vtanh.f32 %v969_v24  ;;  %v971_v19 = vadd.f32 %v4149_v39, %v906_v11  ;;  %v908_v20 = vpop.f32.mrb[19].mxu0 }
 0x162   : > { %3516 = vtanh.f32 %v970_v17  ;;  %v972_v22 = vadd.f32 %v4153_v40, %v908_v20  ;;  %v1070_v18 = vmul.f32 %v1054_v14, %v4066_v0  ;;  %v1085_v25 = vadd.f32 %v1069_v57, %v1021_v61 }
 0x163   : > { %v3507_v26 = vpop.eup %3506  ;;  %3518 = vtanh.f32 %v971_v19 }
 0x164   : > { %v3509_v27 = vpop.eup %3508  ;;  %3520 = vtanh.f32 %v972_v22  ;;  %v1086_v30 = vadd.f32 %v1070_v18, %v1022_v21  ;;  %v1039_v58 = vsub.f32 1.0, %v3507_v26  ;;  %v1023_v0 = vmul.f32 %v3507_v26, %v3977_v37 }
 0x165   : > { %v3511_v28 = vpop.eup %3510 }
 0x166   : > { %v3513_v63 = vpop.eup %3512  ;;  %v912_v29 = vpop.f32.mrb[20].mxu0  ;;  %v1099_v32 = vpack.c.bf16 %v1086_v30, %v1085_v25  ;;  %v1040_v35 = vsub.f32 1.0, %v3511_v28  ;;  %v1055_v41 = vmul.f32 %v3509_v27, %v1039_v58  ;;  %v1024_v56 = vmul.f32 %v3511_v28, %v3980_v38 }
 0x167   : > { %v973_v31 = vadd.f32 %v4149_v39, %v912_v29  ;;  %v914_v42 = vpop.f32.mrb[21].mxu0 }
 0x168   : > { %v974_v43 = vadd.f32 %v4153_v40, %v914_v42  ;;  %v916_v46 = vpop.f32.mrb[22].mxu0  ;;  %3268 = vmatprep.mubr.bf16.mxu1 %v1099_v32  ;;  %v1056_v47 = vmul.f32 %v3513_v63, %v1040_v35  ;;  %v1071_v50 = vmul.f32 %v1055_v41, %v4072_v3 }
 0x169   : > { %3522 = vtanh.f32 %v973_v31  ;;  %v975_v23 = vadd.f32 %v4149_v39, %v916_v46  ;;  %v918_v53 = vpop.f32.mrb[23].mxu0 }
 0x16a   : > { %3524 = vtanh.f32 %v974_v43  ;;  %v976_v60 = vadd.f32 %v4153_v40, %v918_v53  ;;  %v1072_v59 = vmul.f32 %v1056_v47, %v4075_v4  ;;  %v1087_v62 = vadd.f32 %v1071_v50, %v1023_v0 }
 0x16b   : > { %v3515_v1 = vpop.eup %3514  ;;  %3526 = vtanh.f32 %v975_v23 }
 0x16c   : > { %v3517_v5 = vpop.eup %3516  ;;  %3528 = vtanh.f32 %v976_v60  ;;  %v1088_v37 = vadd.f32 %v1072_v59, %v1024_v56  ;;  %v1041_v24 = vsub.f32 1.0, %v3515_v1  ;;  %v1025_v4 = vmul.f32 %v3515_v1, %v3999_v44 }
 0x16d   : > { %v3519_v8 = vpop.eup %3518 }
 0x16e   : > { %v3521_v3 = vpop.eup %3520  ;;  %v922_v17 = vpop.f32.mrb[24].mxu0  ;;  %v1100_v11 = vpack.c.bf16 %v1088_v37, %v1087_v62  ;;  %v1042_v61 = vsub.f32 1.0, %v3519_v8  ;;  %v1057_v14 = vmul.f32 %v3517_v5, %v1041_v24  ;;  %v1026_v26 = vmul.f32 %v3519_v8, %v4002_v45 }
 0x16f   : > { %v977_v38 = vadd.f32 %v4149_v39, %v922_v17  ;;  %v924_v57 = vpop.f32.mrb[25].mxu0 }
 0x170   : > { %v978_v19 = vadd.f32 %v4153_v40, %v924_v57  ;;  %v926_v20 = vpop.f32.mrb[26].mxu0  ;;  %3269 = vmatmul.mubr.bf16.gmra.mrb[4].mxu1 %v1100_v11  ;;  %v1058_v21 = vmul.f32 %v3521_v3, %v1042_v61  ;;  %v1073_v22 = vmul.f32 %v1057_v14, %v4081_v6 }
 0x171   : > { %3530 = vtanh.f32 %v977_v38  ;;  %v979_v18 = vadd.f32 %v4149_v39, %v926_v20  ;;  %v928_v25 = vpop.f32.mrb[27].mxu0 }
 0x172   : > { %3532 = vtanh.f32 %v978_v19  ;;  %v980_v27 = vadd.f32 %v4153_v40, %v928_v25  ;;  %v1074_v30 = vmul.f32 %v1058_v21, %v4084_v7  ;;  %v1089_v58 = vadd.f32 %v1073_v22, %v1025_v4 }
 0x173   : > { %v3523_v28 = vpop.eup %3522  ;;  %3534 = vtanh.f32 %v979_v18 }
 0x174   : > { %v3525_v63 = vpop.eup %3524  ;;  %3536 = vtanh.f32 %v980_v27  ;;  %v1090_v44 = vadd.f32 %v1074_v30, %v1026_v26  ;;  %v1043_v29 = vsub.f32 1.0, %v3523_v28  ;;  %v1027_v7 = vmul.f32 %v3523_v28, %v4011_v48  ;;  %v4244_v28 = vld [vmem:[%s4801_s7 + $0x44] ss:$24 sps:$4 sm:$0xff]  }
 0x175   : > { %v3527_v32 = vpop.eup %3526 }
 0x176   : > { %v3529_v6 = vpop.eup %3528  ;;  %v932_v35 = vpop.f32.mrb[28].mxu0  ;;  %v1101_v41 = vpack.c.bf16 %v1090_v44, %v1089_v58  ;;  %v1044_v31 = vsub.f32 1.0, %v3527_v32  ;;  %v1059_v42 = vmul.f32 %v3525_v63, %v1043_v29  ;;  %v1028_v56 = vmul.f32 %v3527_v32, %v4014_v49  ;;  %v3412_v58 = vld [vmem:[%s4801_s7 + $0x4] ss:$24 sps:$4 sm:$0xff]   ;;  %v3416_v63 = vld [vmem:[%s4801_s7 + $0x30] ss:$24 sps:$4 sm:$0xff]  }
 0x177   : > { %v981_v45 = vadd.f32 %v4149_v39, %v932_v35  ;;  %v934_v43 = vpop.f32.mrb[29].mxu0  ;;  %1713 = vmatprep.subr.bf16.mxu1 %v3412_v58  ;;  %v4252_v44 = vld [vmem:[%s4801_s7 + $0x40] ss:$24 sps:$4 sm:$0xff]   ;;  %v3424_v29 = vld [vmem:[%s4801_s7 + $0x64] ss:$24 sps:$4 sm:$0xff]  }
 0x178   : > { %v982_v46 = vadd.f32 %v4153_v40, %v934_v43  ;;  %v936_v0 = vpop.f32.mrb[30].mxu0  ;;  %3272 = vmatprep.mubr.bf16.mxu1 %v1101_v41  ;;  %v1060_v47 = vmul.f32 %v3529_v6, %v1044_v31  ;;  %v1075_v50 = vmul.f32 %v1059_v42, %v4090_v9  ;;  %v4262_v32 = vld [vmem:[%s4801_s7 + $0x74] ss:$24 sps:$4 sm:$0xff]   ;;  %v3422_v6 = vld [vmem:[%s4801_s7 + $0x60] ss:$24 sps:$4 sm:$0xff]  }
 0x179   : > { %3538 = vtanh.f32 %v981_v45  ;;  %v983_v23 = vadd.f32 %v4149_v39, %v936_v0  ;;  %v938_v53 = vpop.f32.mrb[31].mxu0  ;;  %v4270_v35 = vld [vmem:[%s4801_s7 + $0x70] ss:$24 sps:$4 sm:$0xff]   ;;  %v3430_v41 = vld [vmem:[%s4801_s7 + $0x94] ss:$24 sps:$4 sm:$0xff]  }
 0x17a   : > { %3540 = vtanh.f32 %v982_v46  ;;  %v984_v60 = vadd.f32 %v4153_v40, %v938_v53  ;;  %v1076_v59 = vmul.f32 %v1060_v47, %v4093_v10  ;;  %v1091_v62 = vadd.f32 %v1075_v50, %v1027_v7  ;;  %v4280_v31 = vld [vmem:[%s4801_s7 + $0xa4] ss:$24 sps:$4 sm:$0xff]   ;;  %v3428_v42 = vld [vmem:[%s4801_s7 + $0x90] ss:$24 sps:$4 sm:$0xff]   ;;  %v4288_v45 = vld [vmem:[%s4801_s7 + $0xa0] ss:$24 sps:$4 sm:$0xff]  }
 0x17b   : > { %v3531_v1 = vpop.eup %3530  ;;  %3542 = vtanh.f32 %v983_v23  ;;  %v3436_v43 = vld [vmem:[%s4801_s7 + $0xc4] ss:$24 sps:$4 sm:$0xff]   ;;  %v4298_v46 = vld [vmem:[%s4801_s7 + $0xd4] ss:$24 sps:$4 sm:$0xff]   ;;  %v3434_v0 = vld [vmem:[%s4801_s7 + $0xc0] ss:$24 sps:$4 sm:$0xff]  }
 0x17c   : > { %v3533_v5 = vpop.eup %3532  ;;  %3544 = vtanh.f32 %v984_v60  ;;  %v1092_v48 = vadd.f32 %v1076_v59, %v1028_v56  ;;  %v1045_v37 = vsub.f32 1.0, %v3531_v1  ;;  %v1029_v49 = vmul.f32 %v3531_v1, %v4020_v51  ;;  %v4306_v7 = vld [vmem:[%s4801_s7 + $0xd0] ss:$24 sps:$4 sm:$0xff]   ;;  %v3442_v47 = vld [vmem:[%s4801_s7 + $0xf4] ss:$24 sps:$4 sm:$0xff]  }
 0x17d   : > { %v3535_v24 = vpop.eup %3534  ;;  %v4316_v50 = vld [vmem:[%s4801_s7 + $0x104] ss:$24 sps:$4 sm:$0xff]   ;;  %v3440_v23 = vld [vmem:[%s4801_s7 + $0xf0] ss:$24 sps:$4 sm:$0xff]   ;;  %v4324_v53 = vld [vmem:[%s4801_s7 + $0x100] ss:$24 sps:$4 sm:$0xff]  }
 0x17e   : > { %v3537_v9 = vpop.eup %3536  ;;  %v1102_v8 = vpack.c.bf16 %v1092_v48, %v1091_v62  ;;  %v1046_v3 = vsub.f32 1.0, %v3535_v24  ;;  %v1061_v39 = vmul.f32 %v3533_v5, %v1045_v37  ;;  %v1030_v10 = vmul.f32 %v3535_v24, %v4023_v52  ;;  %v3448_v56 = vld [vmem:[%s4801_s7 + $0x124] ss:$24 sps:$4 sm:$0xff]   ;;  %v4334_v60 = vld [vmem:[%s4801_s7 + $0x134] ss:$24 sps:$4 sm:$0xff]  }
 0x17f   : > { %v3446_v59 = vld [vmem:[%s4801_s7 + $0x120] ss:$24 sps:$4 sm:$0xff]   ;;  %v4342_v62 = vld [vmem:[%s4801_s7 + $0x130] ss:$24 sps:$4 sm:$0xff]   ;;  %v3454_v1 = vld [vmem:[%s4801_s7 + $0x154] ss:$24 sps:$4 sm:$0xff]  }
 0x180   : > { %3273 = vmatmul.mubr.bf16.gmra.mrb[8].mxu1 %v1102_v8  ;;  %v1062_v17 = vmul.f32 %v3537_v9, %v1046_v3  ;;  %v1077_v40 = vmul.f32 %v1061_v39, %v4099_v12  ;;  %v4352_v5 = vld [vmem:[%s4801_s7 + $0x164] ss:$24 sps:$4 sm:$0xff]   ;;  %v3452_v48 = vld [vmem:[%s4801_s7 + $0x150] ss:$24 sps:$4 sm:$0xff]   ;;  %v4360_v37 = vld [vmem:[%s4801_s7 + $0x160] ss:$24 sps:$4 sm:$0xff]  }
 0x181   : > { %v3460_v24 = vld [vmem:[%s4801_s7 + $0xc] ss:$24 sps:$4 sm:$0xff]   ;;  %v4370_v9 = vld [vmem:[%s4800_s6] ss:$0 sm:$0xff] }
 0x182   : > { %v1078_v11 = vmul.f32 %v1062_v17, %v4102_v13  ;;  %v1093_v61 = vadd.f32 %v1077_v40, %v1029_v49 }
 0x183   : > { %v3539_v14 = vpop.eup %3538 }
 0x184   : > { %v3541_v38 = vpop.eup %3540  ;;  %v1094_v57 = vadd.f32 %v1078_v11, %v1030_v10  ;;  %v1047_v19 = vsub.f32 1.0, %v3539_v14  ;;  %v1031_v51 = vmul.f32 %v3539_v14, %v4029_v54  ;;  %v4226_v54 = vld [vmem:[%s4801_s7 + $0x14] ss:$24 sps:$4 sm:$0xff]  }
 0x185   : > { %v3543_v20 = vpop.eup %3542  ;;  %1939 = vmatprep.subr.bf16.mxu0 %v4226_v54 }
 0x186   : > { %v3545_v4 = vpop.eup %3544  ;;  %v1103_v21 = vpack.c.bf16 %v1094_v57, %v1093_v61  ;;  %v1048_v22 = vsub.f32 1.0, %v3543_v20  ;;  %v1063_v18 = vmul.f32 %v3541_v38, %v1047_v19  ;;  %v1032_v52 = vmul.f32 %v3543_v20, %v4032_v55  ;;  %v3410_v55 = vld [vmem:[%s4801_s7] ss:$24 sps:$4 sm:$0xff]  }
 0x187   : > { %1714 = vmatpush1.bf16.msra.mxu1 %v3410_v55 }
 0x188   : > { %3276 = vmatprep.mubr.bf16.mxu1 %v1103_v21  ;;  %v1064_v25 = vmul.f32 %v3545_v4, %v1048_v22  ;;  %v1079_v12 = vmul.f32 %v1063_v18, %v4108_v15  ;;  %v4234_v15 = vld [vmem:[%s4801_s7 + $0x10] ss:$24 sps:$4 sm:$0xff]  }
 0x189   : > { %1940 = vmatpush1.bf16.msra.mxu0 %v4234_v15 }
 0x18a   : > { %v1080_v13 = vmul.f32 %v1064_v25, %v4111_v16  ;;  %v1095_v26 = vadd.f32 %v1079_v12, %v1031_v51  ;;  %v3418_v16 = vld [vmem:[%s4801_s7 + $0x34] ss:$24 sps:$4 sm:$0xff]   ;;  %1941 = vmatprep.subr.bf16.mxu0 %v4244_v28 }
 0x18b   : > { %1715 = vmatprep.subr.bf16.mxu1 %v3418_v16 }
 0x18c   : > { %v1096_v27 = vadd.f32 %v1080_v13, %v1032_v52  ;;  %1716 = vmatpush1.bf16.msra.mxu1 %v3416_v63 }
 0x18d   : > { %1942 = vmatpush1.bf16.msra.mxu0 %v4252_v44  ;;  %1717 = vmatprep.subr.bf16.mxu1 %v3424_v29 }
 0x18e   : > { %v1104_v30 = vpack.c.bf16 %v1096_v27, %v1095_v26  ;;  %1943 = vmatprep.subr.bf16.mxu0 %v4262_v32 }
 0x190   : > { %3277 = vmatmul.mubr.bf16.gmra.mrb[12].mxu1 %v1104_v30 }
 0x191   : > { %1745 = vmatprep.mubr.bf16.mxu1 %v3762_v2  ;;  %1718 = vmatpush1.bf16.msra.mxu1 %v3422_v6 }
 0x192   : > { %1944 = vmatpush1.bf16.msra.mxu0 %v4270_v35  ;;  %1719 = vmatprep.subr.bf16.mxu1 %v3430_v41 }
 0x193   : > { %1945 = vmatprep.subr.bf16.mxu0 %v4280_v31 }
 0x195   : > { %1720 = vmatpush1.bf16.msra.mxu1 %v3428_v42 }
 0x196   : > { %1946 = vmatpush1.bf16.msra.mxu0 %v4288_v45  ;;  %1721 = vmatprep.subr.bf16.mxu1 %v3436_v43 }
 0x197   : > { %1947 = vmatprep.subr.bf16.mxu0 %v4298_v46 }
 0x199   : > { %1722 = vmatpush1.bf16.msra.mxu1 %v3434_v0 }
 0x19a   : > { %1948 = vmatpush1.bf16.msra.mxu0 %v4306_v7  ;;  %1723 = vmatprep.subr.bf16.mxu1 %v3442_v47 }
 0x19b   : > { %1949 = vmatprep.subr.bf16.mxu0 %v4316_v50 }
 0x19d   : > { %1724 = vmatpush1.bf16.msra.mxu1 %v3440_v23 }
 0x19e   : > { %1950 = vmatpush1.bf16.msra.mxu0 %v4324_v53  ;;  %1725 = vmatprep.subr.bf16.mxu1 %v3448_v56 }
 0x19f   : > { %1951 = vmatprep.subr.bf16.mxu0 %v4334_v60 }
 0x1a1   : > { %1726 = vmatpush1.bf16.msra.mxu1 %v3446_v59 }
 0x1a2   : > { %1952 = vmatpush1.bf16.msra.mxu0 %v4342_v62  ;;  %1727 = vmatprep.subr.bf16.mxu1 %v3454_v1 }
 0x1a3   : > { %1953 = vmatprep.subr.bf16.mxu0 %v4352_v5 }
 0x1a5   : > { %1728 = vmatpush1.bf16.msra.mxu1 %v3452_v48 }
 0x1a6   : > { %1954 = vmatpush1.bf16.msra.mxu0 %v4360_v37  ;;  %1826 = vmatprep.subr.bf16.mxu1 %v3460_v24 }
 0x233   : > { %v3266_v8 = vpop.f32.mrb[0].mxu1 }
 0x234   : > { %v1219_v3 = vadd.f32 %v3266_v8, %v4370_v9  ;;  %v1210_v39 = vpop.f32.mrb[1].mxu1 }
 0x235   : > { %v1211_v49 = vadd.f32 %v4370_v9, %v1210_v39  ;;  %v3267_v17 = vpop.f32.mrb[2].mxu1 }
 0x236   : > { %v2897_v40 = vmul.f32 -1.442695, %v1219_v3  ;;  %v1222_v10 = vadd.f32 %v3267_v17, %v4370_v9  ;;  %v1213_v11 = vpop.f32.mrb[3].mxu1 }
 0x237   : > { %v2895_v61 = vmul.f32 -1.442695, %v1211_v49  ;;  %v1214_v14 = vadd.f32 %v4370_v9, %v1213_v11 }
 0x238   : > { %3546 = vpow2.f32 %v2897_v40  ;;  %v2898_v38 = vmul.f32 -1.442695, %v1222_v10 }
 0x239   : > { %3548 = vpow2.f32 %v2895_v61  ;;  %v2896_v57 = vmul.f32 -1.442695, %v1214_v14 }
 0x23a   : > { %3550 = vpow2.f32 %v2898_v38 }
 0x23b   : > { %3552 = vpow2.f32 %v2896_v57 }
 0x242   : > { %v3547_v19 = vpop.eup %3546 }
 0x243   : > { %v3549_v20 = vpop.eup %3548  ;;  %v1323_v4 = vadd.f32 1.0, %v3547_v19  ;;  %v3270_v21 = vpop.f32.mrb[4].mxu1 }
 0x244   : > { %v3551_v22 = vpop.eup %3550  ;;  %v1321_v18 = vadd.f32 1.0, %v3549_v20  ;;  %v4377_v51 = vadd.f32 %v3270_v21, %v4370_v9  ;;  %v1226_v25 = vpop.f32.mrb[5].mxu1  ;;  %v3463_v21 = vld [vmem:[%s4801_s7 + $0x3c] ss:$24 sps:$4 sm:$0xff]  }
 0x245   : > { %v3553_v12 = vpop.eup %3552  ;;  %3554 = vrcp.f32 %v1323_v4  ;;  %v1324_v52 = vadd.f32 1.0, %v3551_v22  ;;  %v4380_v13 = vadd.f32 %v4370_v9, %v1226_v25  ;;  %v3271_v26 = vpop.f32.mrb[6].mxu1 }
 0x246   : > { %3556 = vrcp.f32 %v1321_v18  ;;  %v1322_v27 = vadd.f32 1.0, %v3553_v12  ;;  %v2901_v30 = vmul.f32 -1.442695, %v4377_v51  ;;  %v4384_v58 = vadd.f32 %v3271_v26, %v4370_v9  ;;  %v1229_v55 = vpop.f32.mrb[7].mxu1  ;;  %v3461_v26 = vld [vmem:[%s4801_s7 + $0x38] ss:$24 sps:$4 sm:$0xff]  }
 0x247   : > { %3558 = vrcp.f32 %v1324_v52  ;;  %v2899_v16 = vmul.f32 -1.442695, %v4380_v13  ;;  %v4388_v63 = vadd.f32 %v4370_v9, %v1229_v55  ;;  %v3469_v55 = vld [vmem:[%s4801_s7 + $0x9c] ss:$24 sps:$4 sm:$0xff]  }
 0x248   : > { %3560 = vrcp.f32 %v1322_v27  ;;  %v2902_v29 = vmul.f32 -1.442695, %v4384_v58  ;;  %v3466_v27 = vld [vmem:[%s4801_s7 + $0x6c] ss:$24 sps:$4 sm:$0xff]  }
 0x249   : > { %3562 = vpow2.f32 %v2901_v30  ;;  %v2900_v6 = vmul.f32 -1.442695, %v4388_v63  ;;  %v3464_v30 = vld [vmem:[%s4801_s7 + $0x68] ss:$24 sps:$4 sm:$0xff]  }
 0x24a   : > { %3564 = vpow2.f32 %v2899_v16 }
 0x24b   : > { %3566 = vpow2.f32 %v2902_v29 }
 0x24c   : > { %3568 = vpow2.f32 %v2900_v6  ;;  %v3467_v6 = vld [vmem:[%s4801_s7 + $0x98] ss:$24 sps:$4 sm:$0xff]  }
 0x24f   : > { %v3555_v41 = vpop.eup %3554 }
 0x250   : > { %v3557_v42 = vpop.eup %3556  ;;  %v1371_v47 = vmul.f32 %v3555_v41, %v1219_v3 }
 0x251   : > { %v3559_v43 = vpop.eup %3558  ;;  %v1369_v59 = vmul.f32 %v3557_v42, %v1211_v49  ;;  %v3458_v49 = vld [vmem:[%s4801_s7 + $0x8] ss:$24 sps:$4 sm:$0xff]   ;;  %v3472_v42 = vld [vmem:[%s4801_s7 + $0xcc] ss:$24 sps:$4 sm:$0xff]  }
 0x252   : > { %v3561_v0 = vpop.eup %3560  ;;  %v1372_v23 = vmul.f32 %v3559_v43, %v1222_v10 }
 0x253   : > { %v3563_v56 = vpop.eup %3562  ;;  %v1370_v1 = vmul.f32 %v3561_v0, %v1214_v14  ;;  %v3274_v48 = vpop.f32.mrb[8].mxu1 }
 0x254   : > { %v3565_v24 = vpop.eup %3564  ;;  %v1327_v8 = vadd.f32 1.0, %v3563_v56  ;;  %v4393_v39 = vadd.f32 %v3274_v48, %v4370_v9  ;;  %v1242_v17 = vpop.f32.mrb[9].mxu1  ;;  %v4395_v40 = vpack.c.bf16 %v1372_v23, %v1371_v47 }
 0x255   : > { %v3567_v11 = vpop.eup %3566  ;;  %v4397_v61 = vpack.c.bf16 %v1370_v1, %v1369_v59  ;;  %v1325_v38 = vadd.f32 1.0, %v3565_v24  ;;  %v4400_v57 = vadd.f32 %v4370_v9, %v1242_v17  ;;  %v3275_v3 = vpop.f32.mrb[10].mxu1 }
 0x256   : > { %v3569_v10 = vpop.eup %3568  ;;  %3570 = vrcp.f32 %v1327_v8  ;;  %v1328_v14 = vadd.f32 1.0, %v3567_v11  ;;  %v2905_v19 = vmul.f32 -1.442695, %v4393_v39  ;;  %v4407_v20 = vadd.f32 %v3275_v3, %v4370_v9  ;;  %v1245_v4 = vpop.f32.mrb[11].mxu1 }
 0x257   : > { %3572 = vrcp.f32 %v1325_v38  ;;  %v1326_v22 = vadd.f32 1.0, %v3569_v10  ;;  %v2903_v18 = vmul.f32 -1.442695, %v4400_v57  ;;  %v4414_v25 = vadd.f32 %v4370_v9, %v1245_v4  ;;  %1746 = vmatmul.mubr.bf16.vlgmr.msra.gmra.mrb[16].mxu1 %v4397_v61  ;;  %1972 = vmatmul.mubr.bf16.vlgmr.msra.gmra.mrb[32].mxu0 %v4397_v61  ;;  %v3470_v10 = vld [vmem:[%s4801_s7 + $0xc8] ss:$24 sps:$4 sm:$0xff]  }
 0x258   : > { %3574 = vrcp.f32 %v1328_v14  ;;  %v2906_v12 = vmul.f32 -1.442695, %v4407_v20  ;;  %1755 = vmatprep.mubr.bf16.mxu1 %v3762_v2  ;;  %1981 = vmatprep.mubr.bf16.mxu0 %v3762_v2 }
 0x259   : > { %3576 = vrcp.f32 %v1326_v22  ;;  %v2904_v52 = vmul.f32 -1.442695, %v4414_v25  ;;  %1827 = vmatpush1.bf16.msra.mxu1 %v3458_v49  ;;  %v3475_v22 = vld [vmem:[%s4801_s7 + $0xfc] ss:$24 sps:$4 sm:$0xff]  }
 0x25a   : > { %3578 = vpow2.f32 %v2905_v19  ;;  %1828 = vmatprep.subr.bf16.mxu1 %v3463_v21 }
 0x25b   : > { %3580 = vpow2.f32 %v2903_v18 }
 0x25c   : > { %3582 = vpow2.f32 %v2906_v12 }
 0x25d   : > { %3584 = vpow2.f32 %v2904_v52  ;;  %1829 = vmatpush1.bf16.msra.mxu1 %v3461_v26  ;;  %v3473_v26 = vld [vmem:[%s4801_s7 + $0xf8] ss:$24 sps:$4 sm:$0xff]  }
 0x25e   : > { %1830 = vmatprep.subr.bf16.mxu1 %v3466_v27  ;;  %v3478_v27 = vld [vmem:[%s4801_s7 + $0x12c] ss:$24 sps:$4 sm:$0xff]  }
 0x25f   : > { %1756 = vmatmul.mubr.bf16.gmra.mrb[20].mxu1 %v4395_v40  ;;  %1982 = vmatmul.mubr.bf16.gmra.mrb[36].mxu0 %v4395_v40 }
 0x260   : > { %v3571_v16 = vpop.eup %3570  ;;  %1765 = vmatprep.mubr.bf16.mxu1 %v3762_v2  ;;  %1991 = vmatprep.mubr.bf16.mxu0 %v3762_v2 }
 0x261   : > { %v3573_v29 = vpop.eup %3572  ;;  %1831 = vmatpush1.bf16.msra.mxu1 %v3464_v30  ;;  %v1375_v0 = vmul.f32 %v3571_v16, %v4377_v51  ;;  %v3476_v30 = vld [vmem:[%s4801_s7 + $0x128] ss:$24 sps:$4 sm:$0xff]  }
 0x262   : > { %v3575_v41 = vpop.eup %3574  ;;  %1832 = vmatprep.subr.bf16.mxu1 %v3469_v55  ;;  %v1373_v59 = vmul.f32 %v3573_v29, %v4380_v13  ;;  %v3481_v55 = vld [vmem:[%s4801_s7 + $0x15c] ss:$24 sps:$4 sm:$0xff]  }
 0x263   : > { %v3577_v43 = vpop.eup %3576  ;;  %v1376_v47 = vmul.f32 %v3575_v41, %v4384_v58  ;;  %v3278_v23 = vpop.f32.mrb[12].mxu1 }
 0x264   : > { %v3579_v56 = vpop.eup %3578  ;;  %v1374_v1 = vmul.f32 %v3577_v43, %v4388_v63  ;;  %v4449_v48 = vadd.f32 %v3278_v23, %v4370_v9  ;;  %v1258_v24 = vpop.f32.mrb[13].mxu1 }
 0x265   : > { %v3581_v8 = vpop.eup %3580  ;;  %v1331_v17 = vadd.f32 1.0, %v3579_v56  ;;  %v4452_v11 = vadd.f32 %v4370_v9, %v1258_v24  ;;  %v3279_v38 = vpop.f32.mrb[14].mxu1  ;;  %v4454_v3 = vpack.c.bf16 %v1376_v47, %v1375_v0  ;;  %1833 = vmatpush1.bf16.msra.mxu1 %v3467_v6  ;;  %v3479_v6 = vld [vmem:[%s4801_s7 + $0x158] ss:$24 sps:$4 sm:$0xff]  }
 0x266   : > { %v3583_v51 = vpop.eup %3582  ;;  %v1329_v58 = vadd.f32 1.0, %v3581_v8  ;;  %v4457_v49 = vadd.f32 %v3279_v38, %v4370_v9  ;;  %v1261_v13 = vpop.f32.mrb[15].mxu1  ;;  %v4459_v63 = vpack.c.bf16 %v1374_v1, %v1373_v59  ;;  %1834 = vmatprep.subr.bf16.mxu1 %v3472_v42  ;;  %v2909_v4 = vmul.f32 -1.442695, %v4449_v48 }
 0x267   : > { %v3585_v14 = vpop.eup %3584  ;;  %3586 = vrcp.f32 %v1331_v17  ;;  %v1332_v19 = vadd.f32 1.0, %v3583_v51  ;;  %v4466_v21 = vadd.f32 %v4370_v9, %v1261_v13  ;;  %v2907_v12 = vmul.f32 -1.442695, %v4452_v11 }
 0x268   : > { %3588 = vrcp.f32 %v1329_v58  ;;  %v1330_v18 = vadd.f32 1.0, %v3585_v14  ;;  %1766 = vmatmul.mubr.bf16.gmra.mrb[24].mxu1 %v4459_v63  ;;  %1992 = vmatmul.mubr.bf16.gmra.mrb[40].mxu0 %v4459_v63  ;;  %v2910_v52 = vmul.f32 -1.442695, %v4457_v49 }
 0x269   : > { %3590 = vrcp.f32 %v1332_v19  ;;  %1775 = vmatprep.mubr.bf16.mxu1 %v3762_v2  ;;  %2001 = vmatprep.mubr.bf16.mxu0 %v3762_v2  ;;  %v2908_v9 = vmul.f32 -1.442695, %v4466_v21 }
 0x26a   : > { %3592 = vrcp.f32 %v1330_v18  ;;  %1835 = vmatpush1.bf16.msra.mxu1 %v3470_v10 }
 0x26b   : > { %3594 = vpow2.f32 %v2909_v4  ;;  %1836 = vmatprep.subr.bf16.mxu1 %v3475_v22 }
 0x26c   : > { %3596 = vpow2.f32 %v2907_v12 }
 0x26d   : > { %3598 = vpow2.f32 %v2910_v52 }
 0x26e   : > { %3600 = vpow2.f32 %v2908_v9  ;;  %1837 = vmatpush1.bf16.msra.mxu1 %v3473_v26 }
 0x26f   : > { %1838 = vmatprep.subr.bf16.mxu1 %v3478_v27 }
 0x270   : > { %1776 = vmatmul.mubr.bf16.gmra.mrb[28].mxu1 %v4454_v3  ;;  %2002 = vmatmul.mubr.bf16.gmra.mrb[44].mxu0 %v4454_v3 }
 0x271   : > { %v3587_v16 = vpop.eup %3586  ;;  %1785 = vmatprep.mubr.bf16.mxu1 %v3762_v2  ;;  %2011 = vmatprep.mubr.bf16.mxu0 %v3762_v2 }
 0x272   : > { %v3589_v29 = vpop.eup %3588  ;;  %1839 = vmatpush1.bf16.msra.mxu1 %v3476_v30  ;;  %v1379_v43 = vmul.f32 %v3587_v16, %v4393_v39 }
 0x273   : > { %v3591_v41 = vpop.eup %3590  ;;  %1840 = vmatprep.subr.bf16.mxu1 %v3481_v55  ;;  %v1377_v23 = vmul.f32 %v3589_v29, %v4400_v57 }
 0x274   : > { %v3593_v42 = vpop.eup %3592  ;;  %v1380_v0 = vmul.f32 %v3591_v41, %v4407_v20 }
 0x275   : > { %v3595_v47 = vpop.eup %3594  ;;  %v1378_v56 = vmul.f32 %v3593_v42, %v4414_v25 }
 0x276   : > { %v3597_v59 = vpop.eup %3596  ;;  %v1335_v1 = vadd.f32 1.0, %v3595_v47  ;;  %v1390_v24 = vpack.c.bf16 %v1380_v0, %v1379_v43  ;;  %1841 = vmatpush1.bf16.msra.mxu1 %v3479_v6 }
 0x277   : > { %v3599_v8 = vpop.eup %3598  ;;  %v1333_v17 = vadd.f32 1.0, %v3597_v59  ;;  %v1389_v38 = vpack.c.bf16 %v1378_v56, %v1377_v23  ;;  %3280 = vmatprep.subr.bf16.mxu1 %v4226_v54 }
 0x278   : > { %v3601_v51 = vpop.eup %3600  ;;  %3602 = vrcp.f32 %v1335_v1  ;;  %v1336_v58 = vadd.f32 1.0, %v3599_v8 }
 0x279   : > { %3604 = vrcp.f32 %v1333_v17  ;;  %v1334_v39 = vadd.f32 1.0, %v3601_v51  ;;  %1786 = vmatmul.mubr.bf16.gmra.mrb[32].mxu1 %v1389_v38  ;;  %2012 = vmatmul.mubr.bf16.gmra.mrb[48].mxu0 %v1389_v38 }
 0x27a   : > { %3606 = vrcp.f32 %v1336_v58  ;;  %1795 = vmatprep.mubr.bf16.mxu1 %v3762_v2  ;;  %2021 = vmatprep.mubr.bf16.mxu0 %v3762_v2 }
 0x27b   : > { %3608 = vrcp.f32 %v1334_v39 }
 0x281   : > { %1796 = vmatmul.mubr.bf16.gmra.mrb[36].mxu1 %v1390_v24  ;;  %2022 = vmatmul.mubr.bf16.gmra.mrb[52].mxu0 %v1390_v24 }
 0x282   : > { %v3603_v57 = vpop.eup %3602  ;;  %1805 = vmatprep.mubr.bf16.mxu1 %v3762_v2 }
 0x283   : > { %v3605_v20 = vpop.eup %3604  ;;  %v1383_v13 = vmul.f32 %v3603_v57, %v4449_v48 }
 0x284   : > { %v3607_v54 = vpop.eup %3606  ;;  %v1381_v14 = vmul.f32 %v3605_v20, %v4452_v11 }
 0x285   : > { %v3609_v25 = vpop.eup %3608  ;;  %v1384_v10 = vmul.f32 %v3607_v54, %v4457_v49 }
 0x286   : > { %v1382_v19 = vmul.f32 %v3609_v25, %v4466_v21 }
 0x287   : > { %v1392_v4 = vpack.c.bf16 %v1384_v10, %v1383_v13 }
 0x288   : > { %v1391_v22 = vpack.c.bf16 %v1382_v19, %v1381_v14 }
 0x28a   : > { %1806 = vmatmul.mubr.bf16.gmra.mrb[40].mxu1 %v1391_v22 }
 0x28b   : > { %1815 = vmatprep.mubr.bf16.mxu1 %v3762_v2 }
 0x292   : > { %1816 = vmatmul.mubr.bf16.gmra.mrb[44].mxu1 %v1392_v4 }
 0x293   : > { %1858 = vmatprep.mubr.bf16.mxu1 %v3762_v2 }
 0x29a   : > { %1859 = vmatmul.mubr.bf16.vlgmr.msra.gmra.mrb[48].mxu1 %v4397_v61 }
 0x29b   : > { %1868 = vmatprep.mubr.bf16.mxu1 %v3762_v2  ;;  %3288 = vmatpush1.bf16.msra.mxu1 %v4234_v15  ;;  %v1461_v15 = vsub.s32 4, %v4140_v33 }
 0x29c   : > { %3281 = vmatprep.subr.bf16.mxu1 %v4244_v28  ;;  %v4543_v28 = vld [vmem:[%s4802_s8] sm:$0x3f] }
 0x29f   : > { %3289 = vmatpush1.bf16.msra.mxu1 %v4252_v44  ;;  %v1465_v44 = vsub.s32 5, %v4140_v33 }
 0x2a0   : > { %3282 = vmatprep.subr.bf16.mxu1 %v4262_v32  ;;  %v4548_v32 = vrot.slane %v4543_v28, %v1461_v15 }
 0x2a2   : > { %1869 = vmatmul.mubr.bf16.gmra.mrb[52].mxu1 %v4395_v40 }
 0x2a3   : > { %1878 = vmatprep.mubr.bf16.mxu1 %v3762_v2  ;;  %3290 = vmatpush1.bf16.msra.mxu1 %v4270_v35  ;;  %v4551_v35 = vrot.slane %v4543_v28, %v1465_v44 }
 0x2a4   : > { %3283 = vmatprep.subr.bf16.mxu1 %v4280_v31  ;;  %v4561_v31 = vrot.slane %v4543_v28, %v945_v34 }
 0x2a7   : > { %3291 = vmatpush1.bf16.msra.mxu1 %v4288_v45 }
 0x2a8   : > { %3284 = vmatprep.subr.bf16.mxu1 %v4298_v46 }
 0x2aa   : > { %1879 = vmatmul.mubr.bf16.gmra.mrb[56].mxu1 %v4459_v63 }
 0x2ab   : > { %1888 = vmatprep.mubr.bf16.mxu1 %v3762_v2  ;;  %3292 = vmatpush1.bf16.msra.mxu1 %v4306_v7 }
 0x2ac   : > { %3285 = vmatprep.subr.bf16.mxu1 %v4316_v50 }
 0x2af   : > { %3293 = vmatpush1.bf16.msra.mxu1 %v4324_v53 }
 0x2b0   : > { %3286 = vmatprep.subr.bf16.mxu1 %v4334_v60 }
 0x2b2   : > { %1889 = vmatmul.mubr.bf16.gmra.mrb[60].mxu1 %v4454_v3 }
 0x2b3   : > { %1898 = vmatprep.mubr.bf16.mxu1 %v3762_v2  ;;  %3294 = vmatpush1.bf16.msra.mxu1 %v4342_v62 }
 0x2b4   : > { %3287 = vmatprep.subr.bf16.mxu1 %v4352_v5 }
 0x2b7   : > { %3295 = vmatpush1.bf16.msra.mxu1 %v4360_v37 }
 0x2ba   : > { %1899 = vmatmul.mubr.bf16.gmra.mrb[64].mxu1 %v1389_v38 }
 0x2bb   : > { %1908 = vmatprep.mubr.bf16.mxu1 %v3762_v2 }
 0x2c2   : > { %1909 = vmatmul.mubr.bf16.gmra.mrb[68].mxu1 %v1390_v24 }
 0x2c3   : > { %1918 = vmatprep.mubr.bf16.mxu1 %v3762_v2 }
 0x2ca   : > { %1919 = vmatmul.mubr.bf16.gmra.mrb[72].mxu1 %v1391_v22 }
 0x2cb   : > { %1928 = vmatprep.mubr.bf16.mxu1 %v3762_v2 }
 0x2d2   : > { %1929 = vmatmul.mubr.bf16.gmra.mrb[76].mxu1 %v1392_v4 }
 0x2d3   : > { %2031 = vmatprep.mubr.bf16.mxu1 %v3762_v2 }
 0x2da   : > { %2032 = vmatmul.mubr.bf16.vlgmr.msra.gmra.mrb[80].mxu1 %v1391_v22 }
 0x2db   : > { %2041 = vmatprep.mubr.bf16.mxu1 %v3762_v2  ;;  %v4556_v2 = vrot.slane %v4543_v28, %v949_v36 }
 0x2e2   : > { %2042 = vmatmul.mubr.bf16.gmra.mrb[84].mxu1 %v1392_v4 }
 0x32a   : > { %v1747_v45 = vpop.f32.mrb[16].mxu1  ;;  %v1973_v46 = vpop.f32.mrb[32].mxu0 }
 0x32b   : > { %v1974_v7 = vadd.f32 %v1973_v46, %v4548_v32  ;;  %v1749_v50 = vpop.f32.mrb[17].mxu1  ;;  %v1975_v53 = vpop.f32.mrb[33].mxu0  ;;  %v1748_v5 = vadd.f32 %v1747_v45, %v4561_v31 }
 0x32c   : > { %v1976_v36 = vadd.f32 %v1975_v53, %v4551_v35  ;;  %v1751_v60 = vpop.f32.mrb[18].mxu1  ;;  %v1977_v62 = vpop.f32.mrb[34].mxu0  ;;  %v1750_v34 = vadd.f32 %v1749_v50, %v4556_v2 }
 0x32d   : > { %v3008_v37 = vmul.f32 -1.442695, %v1974_v7  ;;  %v1752_v40 = vadd.f32 %v1751_v60, %v4561_v31  ;;  %v1978_v61 = vadd.f32 %v1977_v62, %v4548_v32  ;;  %v1753_v48 = vpop.f32.mrb[19].mxu1  ;;  %v1979_v11 = vpop.f32.mrb[35].mxu0 }
 0x32e   : > { %2548 = vst [vmem:[%s4566_s16 + $0x10] sm:$0xff] %v1976_v36  ;;  %v1980_v3 = vadd.f32 %v1979_v11, %v4551_v35  ;;  %2132 = vxpose.xlu0.b32.start [1/16] %v1750_v34, 128  ;;  %v1754_v21 = vadd.f32 %v1753_v48, %v4556_v2 }
 0x32f   : > { %3610 = vpow2.f32 %v3008_v37  ;;  %v3094_v49 = vpack.c.bf16 %v1752_v40, %v1748_v5  ;;  %v3010_v63 = vmul.f32 -1.442695, %v1978_v61 }
 0x330   : > { %2549 = vst [vmem:[%s4566_s16 + $0x28] sm:$0xff] %v1980_v3 }
 0x331   : > { %3095 = vst [vmem:[%s4581_s17] sm:$0xff] %v3094_v49   ;;  %3612 = vpow2.f32 %v3010_v63 }
 0x332   : > { %v1757_v18 = vpop.f32.mrb[20].mxu1  ;;  %v1983_v12 = vpop.f32.mrb[36].mxu0  ;;  %2133 = vxpose.xlu0.b32.cont [2/16] %v1754_v21, 128 }
 0x333   : > { %v1984_v52 = vadd.f32 %v1983_v12, %v4548_v32  ;;  %v1759_v9 = vpop.f32.mrb[21].mxu1  ;;  %v1985_v26 = vpop.f32.mrb[37].mxu0  ;;  %v1758_v29 = vadd.f32 %v1757_v18, %v4561_v31 }
 0x334   : > { %v1760_v27 = vadd.f32 %v1759_v9, %v4556_v2  ;;  %v1986_v30 = vadd.f32 %v1985_v26, %v4551_v35  ;;  %v1761_v55 = vpop.f32.mrb[22].mxu1  ;;  %v1987_v16 = vpop.f32.mrb[38].mxu0 }
 0x335   : > { %v3012_v6 = vmul.f32 -1.442695, %v1984_v52  ;;  %v1762_v41 = vadd.f32 %v1761_v55, %v4561_v31  ;;  %v1988_v42 = vadd.f32 %v1987_v16, %v4548_v32  ;;  %v1763_v43 = vpop.f32.mrb[23].mxu1  ;;  %v1989_v0 = vpop.f32.mrb[39].mxu0 }
 0x336   : > { %2550 = vst [vmem:[%s4566_s16 + $0x40] sm:$0xff] %v1986_v30  ;;  %v1990_v47 = vadd.f32 %v1989_v0, %v4551_v35  ;;  %2134 = vxpose.xlu0.b32.cont [3/16] %v1760_v27, 128  ;;  %v1764_v59 = vadd.f32 %v1763_v43, %v4556_v2 }
 0x337   : > { %3614 = vpow2.f32 %v3012_v6  ;;  %v3099_v23 = vpack.c.bf16 %v1762_v41, %v1758_v29  ;;  %v3014_v56 = vmul.f32 -1.442695, %v1988_v42 }
 0x338   : > { %2551 = vst [vmem:[%s4566_s16 + $0x58] sm:$0xff] %v1990_v47 }
 0x339   : > { %v3611_v1 = vpop.eup %3610  ;;  %3211 = vst [vmem:[%s4581_s17 + $0x8] sm:$0xff] %v3099_v23   ;;  %3616 = vpow2.f32 %v3014_v56 }
 0x33a   : > { %v2421_v24 = vadd.f32 1.0, %v3611_v1  ;;  %2135 = vxpose.xlu0.b32.cont [4/16] %v1764_v59, 128 }
 0x33b   : > { %v3613_v8 = vpop.eup %3612  ;;  %v1767_v17 = vpop.f32.mrb[24].mxu1 }
 0x33c   : > { %v1993_v38 = vpop.f32.mrb[40].mxu0  ;;  %3618 = vrcp.f32 %v2421_v24  ;;  %v2423_v51 = vadd.f32 1.0, %v3613_v8  ;;  %v1769_v39 = vpop.f32.mrb[25].mxu1  ;;  %v1768_v20 = vadd.f32 %v1767_v17, %v4561_v31 }
 0x33d   : > { %v1994_v58 = vadd.f32 %v1993_v38, %v4548_v32  ;;  %v1995_v57 = vpop.f32.mrb[41].mxu0  ;;  %v1770_v54 = vadd.f32 %v1769_v39, %v4556_v2  ;;  %v1771_v13 = vpop.f32.mrb[26].mxu1 }
 0x33e   : > { %v1996_v25 = vadd.f32 %v1995_v57, %v4551_v35  ;;  %v1997_v10 = vpop.f32.mrb[42].mxu0  ;;  %3620 = vrcp.f32 %v2423_v51  ;;  %v1772_v19 = vadd.f32 %v1771_v13, %v4561_v31  ;;  %v1773_v22 = vpop.f32.mrb[27].mxu1 }
 0x33f   : > { %v3016_v14 = vmul.f32 -1.442695, %v1994_v58  ;;  %v1998_v4 = vadd.f32 %v1997_v10, %v4548_v32  ;;  %v1999_v15 = vpop.f32.mrb[43].mxu0  ;;  %2136 = vxpose.xlu0.b32.cont [5/16] %v1770_v54, 128  ;;  %v1774_v50 = vadd.f32 %v1773_v22, %v4556_v2 }
 0x340   : > { %2552 = vst [vmem:[%s4566_s16 + $0x70] sm:$0xff] %v1996_v25  ;;  %v2000_v44 = vadd.f32 %v1999_v15, %v4551_v35  ;;  %v3104_v45 = vpack.c.bf16 %v1772_v19, %v1768_v20 }
 0x341   : > { %3622 = vpow2.f32 %v3016_v14  ;;  %v3018_v46 = vmul.f32 -1.442695, %v1998_v4  ;;  %v3615_v7 = vpop.eup %3614 }
 0x342   : > { %2553 = vst [vmem:[%s4566_s16 + $0x88] sm:$0xff] %v2000_v44  ;;  %v2425_v53 = vadd.f32 1.0, %v3615_v7  ;;  %3212 = vst [vmem:[%s4581_s17 + $0x10] sm:$0xff] %v3104_v45  }
 0x343   : > { %3624 = vpow2.f32 %v3018_v46  ;;  %v3617_v36 = vpop.eup %3616  ;;  %v1777_v60 = vpop.f32.mrb[28].mxu1  ;;  %2137 = vxpose.xlu0.b32.cont [6/16] %v1774_v50, 128 }
 0x344   : > { %v2003_v62 = vpop.f32.mrb[44].mxu0  ;;  %3626 = vrcp.f32 %v2425_v53  ;;  %v2427_v34 = vadd.f32 1.0, %v3617_v36  ;;  %v1779_v37 = vpop.f32.mrb[29].mxu1  ;;  %v1778_v61 = vadd.f32 %v1777_v60, %v4561_v31 }
 0x345   : > { %v2004_v5 = vadd.f32 %v2003_v62, %v4548_v32  ;;  %v2005_v40 = vpop.f32.mrb[45].mxu0  ;;  %v1780_v48 = vadd.f32 %v1779_v37, %v4556_v2  ;;  %v1781_v3 = vpop.f32.mrb[30].mxu1 }
 0x346   : > { %v2006_v11 = vadd.f32 %v2005_v40, %v4551_v35  ;;  %v2007_v49 = vpop.f32.mrb[46].mxu0  ;;  %v3619_v63 = vpop.eup %3618  ;;  %3628 = vrcp.f32 %v2427_v34  ;;  %v1782_v18 = vadd.f32 %v1781_v3, %v4561_v31 }
 0x347   : > { %v3020_v21 = vmul.f32 -1.442695, %v2004_v5  ;;  %v2008_v12 = vadd.f32 %v2007_v49, %v4548_v32  ;;  %v1783_v52 = vpop.f32.mrb[31].mxu1  ;;  %v2009_v9 = vpop.f32.mrb[47].mxu0  ;;  %2517 = vst [vmem:[%s4566_s16 + $0x8] sm:$0xff] %v3619_v63  ;;  %2138 = vxpose.xlu0.b32.cont [7/16] %v1780_v48, 128 }
 0x348   : > { %2554 = vst [vmem:[%s4566_s16 + $0xa0] sm:$0xff] %v2006_v11  ;;  %v2010_v26 = vadd.f32 %v2009_v9, %v4551_v35  ;;  %v3621_v27 = vpop.eup %3620  ;;  %v3109_v30 = vpack.c.bf16 %v1782_v18, %v1778_v61  ;;  %v1784_v16 = vadd.f32 %v1783_v52, %v4556_v2 }
 0x349   : > { %3630 = vpow2.f32 %v3020_v21  ;;  %v3022_v55 = vmul.f32 -1.442695, %v2008_v12  ;;  %2519 = vst [vmem:[%s4566_s16 + $0x20] sm:$0xff] %v3621_v27 }
 0x34a   : > { %2555 = vst [vmem:[%s4566_s16 + $0xb8] sm:$0xff] %v2010_v26  ;;  %3213 = vst [vmem:[%s4581_s17 + $0x18] sm:$0xff] %v3109_v30  }
 0x34b   : > { %v3623_v29 = vpop.eup %3622  ;;  %3632 = vpow2.f32 %v3022_v55  ;;  %2139 = vxpose.xlu0.b32.cont [8/16] %v1784_v16, 128 }
 0x34c   : > { %v2429_v6 = vadd.f32 1.0, %v3623_v29  ;;  %v1787_v42 = vpop.f32.mrb[32].mxu1  ;;  %v2013_v43 = vpop.f32.mrb[48].mxu0 }
 0x34d   : > { %v3625_v41 = vpop.eup %3624  ;;  %v2014_v47 = vadd.f32 %v2013_v43, %v4548_v32  ;;  %v1789_v23 = vpop.f32.mrb[33].mxu1  ;;  %v1788_v1 = vadd.f32 %v1787_v42, %v4561_v31 }
 0x34e   : > { %3634 = vrcp.f32 %v2429_v6  ;;  %v2431_v0 = vadd.f32 1.0, %v3625_v41  ;;  %v2015_v56 = vpop.f32.mrb[49].mxu0  ;;  %v3627_v59 = vpop.eup %3626  ;;  %v1790_v24 = vadd.f32 %v1789_v23, %v4556_v2 }
 0x34f   : > { %v2016_v8 = vadd.f32 %v2015_v56, %v4551_v35  ;;  %v1791_v17 = vpop.f32.mrb[34].mxu1  ;;  %v2017_v38 = vpop.f32.mrb[50].mxu0  ;;  %2521 = vst [vmem:[%s4566_s16 + $0x38] sm:$0xff] %v3627_v59  ;;  %v3024_v51 = vmul.f32 -1.442695, %v2014_v47 }
 0x350   : > { %3636 = vrcp.f32 %v2431_v0  ;;  %v1792_v58 = vadd.f32 %v1791_v17, %v4561_v31  ;;  %v2018_v39 = vadd.f32 %v2017_v38, %v4548_v32  ;;  %v1793_v57 = vpop.f32.mrb[35].mxu1  ;;  %v2019_v20 = vpop.f32.mrb[51].mxu0  ;;  %2140 = vxpose.xlu0.b32.cont [9/16] %v1790_v24, 128 }
 0x351   : > { %v3629_v54 = vpop.eup %3628  ;;  %2556 = vst [vmem:[%s4566_s16 + $0xd0] sm:$0xff] %v2016_v8  ;;  %v2020_v25 = vadd.f32 %v2019_v20, %v4551_v35  ;;  %3638 = vpow2.f32 %v3024_v51  ;;  %v1794_v19 = vadd.f32 %v1793_v57, %v4556_v2  ;;  %v1457_v51 = vsub.s32 3, %v4140_v33 }
 0x352   : > { %2523 = vst [vmem:[%s4566_s16 + $0x50] sm:$0xff] %v3629_v54  ;;  %v3114_v13 = vpack.c.bf16 %v1792_v58, %v1788_v1  ;;  %v3026_v10 = vmul.f32 -1.442695, %v2018_v39  ;;  %v1453_v54 = vsub.s32 2, %v4140_v33 }
 0x353   : > { %v3631_v14 = vpop.eup %3630  ;;  %2557 = vst [vmem:[%s4566_s16 + $0xe8] sm:$0xff] %v2020_v25 }
 0x354   : > { %v2433_v4 = vadd.f32 1.0, %v3631_v14  ;;  %3214 = vst [vmem:[%s4581_s17 + $0x20] sm:$0xff] %v3114_v13   ;;  %3640 = vpow2.f32 %v3026_v10  ;;  %v1797_v15 = vpop.f32.mrb[36].mxu1  ;;  %v2023_v44 = vpop.f32.mrb[52].mxu0  ;;  %2141 = vxpose.xlu0.b32.cont [10/16] %v1794_v19, 128  ;;  %v4664_v14 = vrot.slane %v4543_v28, %v1457_v51  ;;  %v4668_v19 = vrot.slane %v4543_v28, %v1453_v54 }
 0x355   : > { %v3633_v22 = vpop.eup %3632  ;;  %v2024_v46 = vadd.f32 %v2023_v44, %v4548_v32  ;;  %v1799_v7 = vpop.f32.mrb[37].mxu1  ;;  %v1798_v53 = vadd.f32 %v1797_v15, %v4561_v31 }
 0x356   : > { %3642 = vrcp.f32 %v2433_v4  ;;  %v2435_v45 = vadd.f32 1.0, %v3633_v22  ;;  %v2025_v50 = vpop.f32.mrb[53].mxu0  ;;  %v1800_v36 = vadd.f32 %v1799_v7, %v4556_v2  ;;  %v1801_v62 = vpop.f32.mrb[38].mxu1 }
 0x357   : > { %v2026_v60 = vadd.f32 %v2025_v50, %v4551_v35  ;;  %v2027_v34 = vpop.f32.mrb[54].mxu0  ;;  %v3028_v37 = vmul.f32 -1.442695, %v2024_v46  ;;  %v1802_v40 = vadd.f32 %v1801_v62, %v4561_v31  ;;  %v1803_v48 = vpop.f32.mrb[39].mxu1 }
 0x358   : > { %v3635_v5 = vpop.eup %3634  ;;  %3644 = vrcp.f32 %v2435_v45  ;;  %v2028_v61 = vadd.f32 %v2027_v34, %v4548_v32  ;;  %v2029_v11 = vpop.f32.mrb[55].mxu0  ;;  %2142 = vxpose.xlu0.b32.cont [11/16] %v1800_v36, 128  ;;  %v1804_v18 = vadd.f32 %v1803_v48, %v4556_v2 }
 0x359   : > { %2525 = vst [vmem:[%s4566_s16 + $0x68] sm:$0xff] %v3635_v5  ;;  %2558 = vst [vmem:[%s4566_s16 + $0x100] sm:$0xff] %v2026_v60  ;;  %v2030_v3 = vadd.f32 %v2029_v11, %v4551_v35  ;;  %3646 = vpow2.f32 %v3028_v37  ;;  %v3119_v63 = vpack.c.bf16 %v1802_v40, %v1798_v53 }
 0x35a   : > { %v3637_v49 = vpop.eup %3636  ;;  %v3030_v21 = vmul.f32 -1.442695, %v2028_v61 }
 0x35b   : > { %2527 = vst [vmem:[%s4566_s16 + $0x80] sm:$0xff] %v3637_v49  ;;  %2559 = vst [vmem:[%s4566_s16 + $0x118] sm:$0xff] %v2030_v3  ;;  %v3639_v12 = vpop.eup %3638 }
 0x35c   : > { %3215 = vst [vmem:[%s4581_s17 + $0x28] sm:$0xff] %v3119_v63   ;;  %3648 = vpow2.f32 %v3030_v21  ;;  %v2437_v52 = vadd.f32 1.0, %v3639_v12  ;;  %2143 = vxpose.xlu0.b32.cont [12/16] %v1804_v18, 128 }
 0x35d   : > { %v1807_v26 = vpop.f32.mrb[40].mxu1 }
 0x35e   : > { %v3641_v9 = vpop.eup %3640  ;;  %3650 = vrcp.f32 %v2437_v52  ;;  %v1809_v30 = vpop.f32.mrb[41].mxu1  ;;  %v1808_v6 = vadd.f32 %v1807_v26, %v4561_v31 }
 0x35f   : > { %v2439_v27 = vadd.f32 1.0, %v3641_v9  ;;  %v1810_v16 = vadd.f32 %v1809_v30, %v4556_v2  ;;  %v1811_v29 = vpop.f32.mrb[42].mxu1 }
 0x360   : > { %v3643_v55 = vpop.eup %3642  ;;  %v1812_v41 = vadd.f32 %v1811_v29, %v4561_v31  ;;  %v1813_v42 = vpop.f32.mrb[43].mxu1 }
 0x361   : > { %2529 = vst [vmem:[%s4566_s16 + $0x98] sm:$0xff] %v3643_v55  ;;  %3652 = vrcp.f32 %v2439_v27  ;;  %2144 = vxpose.xlu0.b32.cont [13/16] %v1810_v16, 128  ;;  %v1814_v23 = vadd.f32 %v1813_v42, %v4556_v2 }
 0x362   : > { %v3645_v43 = vpop.eup %3644  ;;  %v3124_v0 = vpack.c.bf16 %v1812_v41, %v1808_v6 }
 0x363   : > { %2531 = vst [vmem:[%s4566_s16 + $0xb0] sm:$0xff] %v3645_v43  ;;  %v3647_v47 = vpop.eup %3646 }
 0x364   : > { %v2441_v56 = vadd.f32 1.0, %v3647_v47  ;;  %3216 = vst [vmem:[%s4581_s17 + $0x30] sm:$0xff] %v3124_v0  }
 0x365   : > { %v1817_v1 = vpop.f32.mrb[44].mxu1  ;;  %2145 = vxpose.xlu0.b32.cont [14/16] %v1814_v23, 128 }
 0x366   : > { %v3649_v59 = vpop.eup %3648  ;;  %3654 = vrcp.f32 %v2441_v56  ;;  %v1819_v8 = vpop.f32.mrb[45].mxu1  ;;  %v1818_v39 = vadd.f32 %v1817_v1, %v4561_v31 }
 0x367   : > { %v2443_v24 = vadd.f32 1.0, %v3649_v59  ;;  %v1820_v17 = vadd.f32 %v1819_v8, %v4556_v2  ;;  %v1821_v38 = vpop.f32.mrb[46].mxu1 }
 0x368   : > { %v3651_v58 = vpop.eup %3650  ;;  %v1822_v57 = vadd.f32 %v1821_v38, %v4561_v31  ;;  %v1823_v20 = vpop.f32.mrb[47].mxu1 }
 0x369   : > { %3656 = vrcp.f32 %v2443_v24  ;;  %2533 = vst [vmem:[%s4566_s16 + $0xc8] sm:$0xff] %v3651_v58  ;;  %v1824_v25 = vadd.f32 %v1823_v20, %v4556_v2  ;;  %2146 = vxpose.xlu0.b32.cont [15/16] %v1820_v17, 128 }
 0x36a   : > { %v3129_v10 = vpack.c.bf16 %v1822_v57, %v1818_v39 }
 0x36b   : > { %v3653_v13 = vpop.eup %3652 }
 0x36c   : > { %2535 = vst [vmem:[%s4566_s16 + $0xe0] sm:$0xff] %v3653_v13  ;;  %3217 = vst [vmem:[%s4581_s17 + $0x38] sm:$0xff] %v3129_v10  }
 0x36d   : > { %v1860_v31 = vpop.f32.mrb[48].mxu1  ;;  %2147 = vxpose.xlu0.b32.end [16/16] %v1824_v25, 128 }
 0x36e   : > { %v1862_v33 = vpop.f32.mrb[49].mxu1  ;;  %v1861_v15 = vadd.f32 %v1860_v31, %v4668_v19 }
 0x36f   : > { %v1863_v4 = vadd.f32 %v1862_v33, %v4664_v14  ;;  %v1864_v2 = vpop.f32.mrb[50].mxu1 }
 0x370   : > { %v3655_v22 = vpop.eup %3654  ;;  %v1865_v44 = vadd.f32 %v1864_v2, %v4668_v19  ;;  %v1866_v45 = vpop.f32.mrb[51].mxu1 }
 0x371   : > { %2537 = vst [vmem:[%s4566_s16 + $0xf8] sm:$0xff] %v3655_v22  ;;  %v3007_v46 = vmul.f32 -1.442695, %v1863_v4  ;;  %v1867_v28 = vadd.f32 %v1866_v45, %v4664_v14 }
 0x372   : > { %v3174_v50 = vpack.c.bf16 %v1865_v44, %v1861_v15 }
 0x373   : > { %v3657_v7 = vpop.eup %3656  ;;  %3658 = vpow2.f32 %v3007_v46  ;;  %v3009_v53 = vmul.f32 -1.442695, %v1867_v28 }
 0x374   : > { %2539 = vst [vmem:[%s4566_s16 + $0x110] sm:$0xff] %v3657_v7  ;;  %3175 = vst [vmem:[%s4679_s20] sm:$0xff] %v3174_v50  }
 0x375   : > { %3660 = vpow2.f32 %v3009_v53  ;;  %v1870_v36 = vpop.f32.mrb[52].mxu1 }
 0x376   : > { %v1872_v60 = vpop.f32.mrb[53].mxu1  ;;  %v1871_v5 = vadd.f32 %v1870_v36, %v4668_v19 }
 0x377   : > { %v1873_v62 = vadd.f32 %v1872_v60, %v4664_v14  ;;  %v1874_v34 = vpop.f32.mrb[54].mxu1 }
 0x378   : > { %v1875_v37 = vadd.f32 %v1874_v34, %v4668_v19  ;;  %v1876_v40 = vpop.f32.mrb[55].mxu1 }
 0x379   : > { %v3011_v61 = vmul.f32 -1.442695, %v1873_v62  ;;  %v1877_v48 = vadd.f32 %v1876_v40, %v4664_v14 }
 0x37a   : > { %v3179_v11 = vpack.c.bf16 %v1875_v37, %v1871_v5 }
 0x37b   : > { %3662 = vpow2.f32 %v3011_v61  ;;  %v3013_v3 = vmul.f32 -1.442695, %v1877_v48 }
 0x37c   : > { %3225 = vst [vmem:[%s4679_s20 + $0x8] sm:$0xff] %v3179_v11  }
 0x37d   : > { %v3659_v49 = vpop.eup %3658  ;;  %3664 = vpow2.f32 %v3013_v3  ;;  %v1880_v63 = vpop.f32.mrb[56].mxu1 }
 0x37e   : > { %v2420_v21 = vadd.f32 1.0, %v3659_v49  ;;  %v1882_v18 = vpop.f32.mrb[57].mxu1  ;;  %v1881_v27 = vadd.f32 %v1880_v63, %v4668_v19 }
 0x37f   : > { %v3661_v12 = vpop.eup %3660  ;;  %v1883_v52 = vadd.f32 %v1882_v18, %v4664_v14  ;;  %v1884_v9 = vpop.f32.mrb[58].mxu1 }
 0x380   : > { %3666 = vrcp.f32 %v2420_v21  ;;  %v2422_v26 = vadd.f32 1.0, %v3661_v12  ;;  %v1885_v30 = vadd.f32 %v1884_v9, %v4668_v19  ;;  %v1886_v55 = vpop.f32.mrb[59].mxu1 }
 0x381   : > { %v3015_v16 = vmul.f32 -1.442695, %v1883_v52  ;;  %v1887_v29 = vadd.f32 %v1886_v55, %v4664_v14 }
 0x382   : > { %3668 = vrcp.f32 %v2422_v26  ;;  %v3184_v6 = vpack.c.bf16 %v1885_v30, %v1881_v27 }
 0x383   : > { %3670 = vpow2.f32 %v3015_v16  ;;  %v3017_v41 = vmul.f32 -1.442695, %v1887_v29 }
 0x384   : > { %3226 = vst [vmem:[%s4679_s20 + $0x10] sm:$0xff] %v3184_v6  }
 0x385   : > { %v3663_v42 = vpop.eup %3662  ;;  %3672 = vpow2.f32 %v3017_v41  ;;  %v1890_v43 = vpop.f32.mrb[60].mxu1 }
 0x386   : > { %v2424_v0 = vadd.f32 1.0, %v3663_v42  ;;  %v1892_v47 = vpop.f32.mrb[61].mxu1  ;;  %v1891_v24 = vadd.f32 %v1890_v43, %v4668_v19 }
 0x387   : > { %v3665_v23 = vpop.eup %3664  ;;  %v1893_v56 = vadd.f32 %v1892_v47, %v4664_v14  ;;  %v1894_v59 = vpop.f32.mrb[62].mxu1 }
 0x388   : > { %3674 = vrcp.f32 %v2424_v0  ;;  %v2426_v1 = vadd.f32 1.0, %v3665_v23  ;;  %v1895_v8 = vadd.f32 %v1894_v59, %v4668_v19  ;;  %v1896_v17 = vpop.f32.mrb[63].mxu1 }
 0x389   : > { %v3019_v38 = vmul.f32 -1.442695, %v1893_v56  ;;  %v1897_v51 = vadd.f32 %v1896_v17, %v4664_v14 }
 0x38a   : > { %v3667_v58 = vpop.eup %3666  ;;  %3676 = vrcp.f32 %v2426_v1  ;;  %v3189_v39 = vpack.c.bf16 %v1895_v8, %v1891_v24 }
 0x38b   : > { %2516 = vst [vmem:[%s4566_s16] sm:$0xff] %v3667_v58  ;;  %3678 = vpow2.f32 %v3019_v38  ;;  %v3021_v57 = vmul.f32 -1.442695, %v1897_v51 }
 0x38c   : > { %v3669_v20 = vpop.eup %3668  ;;  %3227 = vst [vmem:[%s4679_s20 + $0x18] sm:$0xff] %v3189_v39  }
 0x38d   : > { %v3671_v54 = vpop.eup %3670  ;;  %2518 = vst [vmem:[%s4566_s16 + $0x18] sm:$0xff] %v3669_v20  ;;  %3680 = vpow2.f32 %v3021_v57  ;;  %v1900_v25 = vpop.f32.mrb[64].mxu1 }
 0x38e   : > { %v2428_v13 = vadd.f32 1.0, %v3671_v54  ;;  %v1902_v10 = vpop.f32.mrb[65].mxu1  ;;  %v1901_v22 = vadd.f32 %v1900_v25, %v4668_v19 }
 0x38f   : > { %v3673_v31 = vpop.eup %3672  ;;  %v1903_v33 = vadd.f32 %v1902_v10, %v4664_v14  ;;  %v1904_v4 = vpop.f32.mrb[66].mxu1 }
 0x390   : > { %3682 = vrcp.f32 %v2428_v13  ;;  %v2430_v2 = vadd.f32 1.0, %v3673_v31  ;;  %v1905_v15 = vadd.f32 %v1904_v4, %v4668_v19  ;;  %v1906_v44 = vpop.f32.mrb[67].mxu1 }
 0x391   : > { %v3023_v45 = vmul.f32 -1.442695, %v1903_v33  ;;  %v1907_v46 = vadd.f32 %v1906_v44, %v4664_v14 }
 0x392   : > { %v3675_v28 = vpop.eup %3674  ;;  %3684 = vrcp.f32 %v2430_v2  ;;  %v3194_v7 = vpack.c.bf16 %v1905_v15, %v1901_v22 }
 0x393   : > { %2520 = vst [vmem:[%s4566_s16 + $0x30] sm:$0xff] %v3675_v28  ;;  %3686 = vpow2.f32 %v3023_v45  ;;  %v3025_v50 = vmul.f32 -1.442695, %v1907_v46 }
 0x394   : > { %v3677_v53 = vpop.eup %3676  ;;  %3228 = vst [vmem:[%s4679_s20 + $0x20] sm:$0xff] %v3194_v7  }
 0x395   : > { %v3679_v36 = vpop.eup %3678  ;;  %2522 = vst [vmem:[%s4566_s16 + $0x48] sm:$0xff] %v3677_v53  ;;  %3688 = vpow2.f32 %v3025_v50  ;;  %v1910_v60 = vpop.f32.mrb[68].mxu1 }
 0x396   : > { %v2432_v62 = vadd.f32 1.0, %v3679_v36  ;;  %v1912_v34 = vpop.f32.mrb[69].mxu1  ;;  %v1911_v48 = vadd.f32 %v1910_v60, %v4668_v19 }
 0x397   : > { %v3681_v5 = vpop.eup %3680  ;;  %v1913_v37 = vadd.f32 %v1912_v34, %v4664_v14  ;;  %v1914_v40 = vpop.f32.mrb[70].mxu1 }
 0x398   : > { %3690 = vrcp.f32 %v2432_v62  ;;  %v2434_v61 = vadd.f32 1.0, %v3681_v5  ;;  %v1915_v11 = vadd.f32 %v1914_v40, %v4668_v19  ;;  %v1916_v3 = vpop.f32.mrb[71].mxu1 }
 0x399   : > { %v3027_v49 = vmul.f32 -1.442695, %v1913_v37  ;;  %v1917_v63 = vadd.f32 %v1916_v3, %v4664_v14 }
 0x39a   : > { %v3683_v21 = vpop.eup %3682  ;;  %3692 = vrcp.f32 %v2434_v61  ;;  %v3199_v18 = vpack.c.bf16 %v1915_v11, %v1911_v48 }
 0x39b   : > { %2524 = vst [vmem:[%s4566_s16 + $0x60] sm:$0xff] %v3683_v21  ;;  %3694 = vpow2.f32 %v3027_v49  ;;  %v3029_v12 = vmul.f32 -1.442695, %v1917_v63 }
 0x39c   : > { %v3685_v52 = vpop.eup %3684  ;;  %3229 = vst [vmem:[%s4679_s20 + $0x28] sm:$0xff] %v3199_v18  }
 0x39d   : > { %v3687_v9 = vpop.eup %3686  ;;  %2526 = vst [vmem:[%s4566_s16 + $0x78] sm:$0xff] %v3685_v52  ;;  %3696 = vpow2.f32 %v3029_v12  ;;  %v1920_v26 = vpop.f32.mrb[72].mxu1 }
 0x39e   : > { %v2436_v27 = vadd.f32 1.0, %v3687_v9  ;;  %v1922_v30 = vpop.f32.mrb[73].mxu1  ;;  %v1921_v41 = vadd.f32 %v1920_v26, %v4668_v19 }
 0x39f   : > { %v3689_v55 = vpop.eup %3688  ;;  %v1923_v16 = vadd.f32 %v1922_v30, %v4664_v14  ;;  %v1924_v29 = vpop.f32.mrb[74].mxu1 }
 0x3a0   : > { %3698 = vrcp.f32 %v2436_v27  ;;  %v2438_v6 = vadd.f32 1.0, %v3689_v55  ;;  %v1925_v42 = vadd.f32 %v1924_v29, %v4668_v19  ;;  %v1926_v43 = vpop.f32.mrb[75].mxu1 }
 0x3a1   : > { %v3031_v0 = vmul.f32 -1.442695, %v1923_v16  ;;  %v1927_v47 = vadd.f32 %v1926_v43, %v4664_v14 }
 0x3a2   : > { %v3691_v23 = vpop.eup %3690  ;;  %3700 = vrcp.f32 %v2438_v6  ;;  %v3204_v56 = vpack.c.bf16 %v1925_v42, %v1921_v41 }
 0x3a3   : > { %2528 = vst [vmem:[%s4566_s16 + $0x90] sm:$0xff] %v3691_v23  ;;  %3702 = vpow2.f32 %v3031_v0  ;;  %v3033_v59 = vmul.f32 -1.442695, %v1927_v47 }
 0x3a4   : > { %v3693_v1 = vpop.eup %3692  ;;  %3230 = vst [vmem:[%s4679_s20 + $0x30] sm:$0xff] %v3204_v56  }
 0x3a5   : > { %v3695_v24 = vpop.eup %3694  ;;  %2530 = vst [vmem:[%s4566_s16 + $0xa8] sm:$0xff] %v3693_v1  ;;  %3704 = vpow2.f32 %v3033_v59  ;;  %v1930_v8 = vpop.f32.mrb[76].mxu1 }
 0x3a6   : > { %v2440_v17 = vadd.f32 1.0, %v3695_v24  ;;  %v1932_v38 = vpop.f32.mrb[77].mxu1  ;;  %v1931_v20 = vadd.f32 %v1930_v8, %v4668_v19 }
 0x3a7   : > { %v3697_v51 = vpop.eup %3696  ;;  %v1933_v58 = vadd.f32 %v1932_v38, %v4664_v14  ;;  %v1934_v39 = vpop.f32.mrb[78].mxu1 }
 0x3a8   : > { %3706 = vrcp.f32 %v2440_v17  ;;  %v2442_v57 = vadd.f32 1.0, %v3697_v51  ;;  %v1935_v54 = vadd.f32 %v1934_v39, %v4668_v19  ;;  %v1936_v25 = vpop.f32.mrb[79].mxu1 }
 0x3a9   : > { %v3035_v13 = vmul.f32 -1.442695, %v1933_v58  ;;  %v1937_v10 = vadd.f32 %v1936_v25, %v4664_v14 }
 0x3aa   : > { %v3699_v31 = vpop.eup %3698  ;;  %3708 = vrcp.f32 %v2442_v57  ;;  %v3209_v33 = vpack.c.bf16 %v1935_v54, %v1931_v20 }
 0x3ab   : > { %2532 = vst [vmem:[%s4566_s16 + $0xc0] sm:$0xff] %v3699_v31  ;;  %3710 = vpow2.f32 %v3035_v13  ;;  %v3037_v4 = vmul.f32 -1.442695, %v1937_v10 }
 0x3ac   : > { %v3701_v2 = vpop.eup %3700  ;;  %3231 = vst [vmem:[%s4679_s20 + $0x38] sm:$0xff] %v3209_v33  }
 0x3ad   : > { %v3703_v22 = vpop.eup %3702  ;;  %2534 = vst [vmem:[%s4566_s16 + $0xd8] sm:$0xff] %v3701_v2  ;;  %3712 = vpow2.f32 %v3037_v4  ;;  %v2033_v15 = vpop.f32.mrb[80].mxu1 }
 0x3ae   : > { %v2444_v44 = vadd.f32 1.0, %v3703_v22  ;;  %v2034_v19 = vadd.f32 %v2033_v15, %v4548_v32  ;;  %v2035_v45 = vpop.f32.mrb[81].mxu1 }
 0x3af   : > { %v3705_v46 = vpop.eup %3704  ;;  %v2036_v14 = vadd.f32 %v2035_v45, %v4551_v35  ;;  %v2037_v28 = vpop.f32.mrb[82].mxu1 }
 0x3b0   : > { %3714 = vrcp.f32 %v2444_v44  ;;  %v2446_v7 = vadd.f32 1.0, %v3705_v46  ;;  %v3032_v50 = vmul.f32 -1.442695, %v2034_v19  ;;  %v2038_v53 = vadd.f32 %v2037_v28, %v4548_v32  ;;  %v2039_v36 = vpop.f32.mrb[83].mxu1 }
 0x3b1   : > { %2560 = vst [vmem:[%s4566_s16 + $0x130] sm:$0xff] %v2036_v14  ;;  %v2040_v60 = vadd.f32 %v2039_v36, %v4551_v35  ;;  %v2148_v62 = vpop.trf.xlu0 }
 0x3b2   : > { %v3707_v34 = vpop.eup %3706  ;;  %3716 = vrcp.f32 %v2446_v7  ;;  %v3034_v5 = vmul.f32 -1.442695, %v2038_v53 }
 0x3b3   : > { %2536 = vst [vmem:[%s4566_s16 + $0xf0] sm:$0xff] %v3707_v34  ;;  %3718 = vpow2.f32 %v3032_v50  ;;  %2561 = vst [vmem:[%s4566_s16 + $0x148] sm:$0xff] %v2040_v60 }
 0x3b4   : > { %v3709_v37 = vpop.eup %3708  ;;  %3720 = vpow2.f32 %v3034_v5 }
 0x3b5   : > { %v3711_v40 = vpop.eup %3710  ;;  %2538 = vst [vmem:[%s4566_s16 + $0x108] sm:$0xff] %v3709_v37  ;;  %v2043_v61 = vpop.f32.mrb[84].mxu1 }
 0x3b6   : > { %v2149_v48 = vpop.trf.xlu0  ;;  %v2448_v11 = vadd.f32 1.0, %v3711_v40  ;;  %v2044_v3 = vadd.f32 %v2043_v61, %v4548_v32  ;;  %v2045_v63 = vpop.f32.mrb[85].mxu1 }
 0x3b7   : > { %v3134_v49 = vpack.c.bf16 %v2149_v48, %v2148_v62  ;;  %v3713_v21 = vpop.eup %3712  ;;  %v2046_v18 = vadd.f32 %v2045_v63, %v4551_v35  ;;  %v2047_v12 = vpop.f32.mrb[86].mxu1 }
 0x3b8   : > { %3722 = vrcp.f32 %v2448_v11  ;;  %v2450_v52 = vadd.f32 1.0, %v3713_v21  ;;  %v3036_v9 = vmul.f32 -1.442695, %v2044_v3  ;;  %v2048_v26 = vadd.f32 %v2047_v12, %v4548_v32  ;;  %v2049_v27 = vpop.f32.mrb[87].mxu1 }
 0x3b9   : > { %3135 = vst [vmem:[%s4740_s21] sm:$0xff] %v3134_v49   ;;  %2562 = vst [vmem:[%s4566_s16 + $0x160] sm:$0xff] %v2046_v18  ;;  %v2050_v30 = vadd.f32 %v2049_v27, %v4551_v35 }
 0x3ba   : > { %v2150_v55 = vpop.trf.xlu0  ;;  %v3715_v16 = vpop.eup %3714  ;;  %3724 = vrcp.f32 %v2450_v52  ;;  %v3038_v29 = vmul.f32 -1.442695, %v2048_v26 }
 0x3bb   : > { %2540 = vst [vmem:[%s4566_s16 + $0x120] sm:$0xff] %v3715_v16  ;;  %3726 = vpow2.f32 %v3036_v9  ;;  %2563 = vst [vmem:[%s4566_s16 + $0x178] sm:$0xff] %v2050_v30 }
 0x3bc   : > { %v3717_v6 = vpop.eup %3716  ;;  %3728 = vpow2.f32 %v3038_v29 }
 0x3bd   : > { %v3719_v41 = vpop.eup %3718  ;;  %2542 = vst [vmem:[%s4566_s16 + $0x138] sm:$0xff] %v3717_v6 }
 0x3be   : > { %v2151_v42 = vpop.trf.xlu0  ;;  %v3721_v32 = vpop.eup %3720  ;;  %v2445_v43 = vadd.f32 1.0, %v3719_v41 }
 0x3bf   : > { %v3139_v0 = vpack.c.bf16 %v2151_v42, %v2150_v55  ;;  %v2447_v47 = vadd.f32 1.0, %v3721_v32 }
 0x3c0   : > { %3730 = vrcp.f32 %v2445_v43  ;;  %v2608_v14 = vld [vmem:[%s4740_s21] sm:$0xf] (%p3853_p4)  ;;  %v2610_v28 = vld [vmem:[%s4740_s21 + $0x4] sm:$0xf] (%p3853_p4) }
 0x3c1   : > { %3218 = vst [vmem:[%s4740_s21 + $0x8] sm:$0xff] %v3139_v0   ;;  %3732 = vrcp.f32 %v2447_v47  ;;  %2609 = vst [vmem:[%s2592_s27] sm:$0xf] (%p3853_p4), %v2608_v14 }
 0x3c2   : > { %v2152_v35 = vpop.trf.xlu0  ;;  %v3723_v23 = vpop.eup %3722  ;;  %2611 = vst [vmem:[%s2592_s27 + $0x8] sm:$0xf] (%p3853_p4), %v2610_v28 }
 0x3c3   : > { %2544 = vst [vmem:[%s4566_s16 + $0x150] sm:$0xff] %v3723_v23 }
 0x3c4   : > { %v3725_v56 = vpop.eup %3724 }
 0x3c5   : > { %v3727_v59 = vpop.eup %3726  ;;  %2546 = vst [vmem:[%s4566_s16 + $0x168] sm:$0xff] %v3725_v56 }
 0x3c6   : > { %v2153_v1 = vpop.trf.xlu0  ;;  %v3729_v24 = vpop.eup %3728  ;;  %v2449_v8 = vadd.f32 1.0, %v3727_v59 }
 0x3c7   : > { %v3144_v17 = vpack.c.bf16 %v2153_v1, %v2152_v35  ;;  %v2451_v38 = vadd.f32 1.0, %v3729_v24 }
 0x3c8   : > { %3734 = vrcp.f32 %v2449_v8  ;;  %v2612_v7 = vld [vmem:[%s4740_s21 + $0x8] sm:$0xf] (%p3853_p4)  ;;  %v2614_v50 = vld [vmem:[%s4740_s21 + $0xc] sm:$0xf] (%p3853_p4) }
 0x3c9   : > { %3219 = vst [vmem:[%s4740_s21 + $0x10] sm:$0xff] %v3144_v17   ;;  %3736 = vrcp.f32 %v2451_v38  ;;  %2613 = vst [vmem:[%s2592_s27 + $0x10] sm:$0xf] (%p3853_p4), %v2612_v7 }
 0x3ca   : > { %v2154_v51 = vpop.trf.xlu0  ;;  %v3731_v58 = vpop.eup %3730  ;;  %2615 = vst [vmem:[%s2592_s27 + $0x18] sm:$0xf] (%p3853_p4), %v2614_v50 }
 0x3cb   : > { %v3733_v39 = vpop.eup %3732  ;;  %2541 = vst [vmem:[%s4566_s16 + $0x128] sm:$0xff] %v3731_v58 }
 0x3cc   : > { %2543 = vst [vmem:[%s4566_s16 + $0x140] sm:$0xff] %v3733_v39 }
 0x3ce   : > { %v2155_v57 = vpop.trf.xlu0 }
 0x3cf   : > { %v3149_v20 = vpack.c.bf16 %v2155_v57, %v2154_v51 }
 0x3d0   : > { %v2616_v53 = vld [vmem:[%s4740_s21 + $0x10] sm:$0xf] (%p3853_p4)  ;;  %v2618_v36 = vld [vmem:[%s4740_s21 + $0x14] sm:$0xf] (%p3853_p4) }
 0x3d1   : > { %3220 = vst [vmem:[%s4740_s21 + $0x18] sm:$0xff] %v3149_v20   ;;  %2617 = vst [vmem:[%s2592_s27 + $0x20] sm:$0xf] (%p3853_p4), %v2616_v53 }
 0x3d2   : > { %v2156_v54 = vpop.trf.xlu0  ;;  %v3735_v25 = vpop.eup %3734  ;;  %2619 = vst [vmem:[%s2592_s27 + $0x28] sm:$0xf] (%p3853_p4), %v2618_v36 }
 0x3d3   : > { %v3737_v13 = vpop.eup %3736  ;;  %2545 = vst [vmem:[%s4566_s16 + $0x158] sm:$0xff] %v3735_v25 }
 0x3d4   : > { %2547 = vst [vmem:[%s4566_s16 + $0x170] sm:$0xff] %v3737_v13 }
 0x3d6   : > { %v2157_v10 = vpop.trf.xlu0 }
 0x3d7   : > { %v3154_v31 = vpack.c.bf16 %v2157_v10, %v2156_v54 }
 0x3d8   : > { %v2620_v60 = vld [vmem:[%s4740_s21 + $0x18] sm:$0xf] (%p3853_p4)  ;;  %v2622_v62 = vld [vmem:[%s4740_s21 + $0x1c] sm:$0xf] (%p3853_p4) }
 0x3d9   : > { %3221 = vst [vmem:[%s4740_s21 + $0x20] sm:$0xff] %v3154_v31   ;;  %2621 = vst [vmem:[%s2592_s27 + $0x30] sm:$0xf] (%p3853_p4), %v2620_v60 }
 0x3da   : > { %v2158_v33 = vpop.trf.xlu0  ;;  %2623 = vst [vmem:[%s2592_s27 + $0x38] sm:$0xf] (%p3853_p4), %v2622_v62 }
 0x3de   : > { %v2159_v4 = vpop.trf.xlu0 }
 0x3df   : > { %v3159_v2 = vpack.c.bf16 %v2159_v4, %v2158_v33 }
 0x3e0   : > { %v2624_v34 = vld [vmem:[%s4740_s21 + $0x20] sm:$0xf] (%p3853_p4)  ;;  %v2626_v5 = vld [vmem:[%s4740_s21 + $0x24] sm:$0xf] (%p3853_p4) }
 0x3e1   : > { %3222 = vst [vmem:[%s4740_s21 + $0x28] sm:$0xff] %v3159_v2   ;;  %2625 = vst [vmem:[%s2592_s27 + $0x40] sm:$0xf] (%p3853_p4), %v2624_v34 }
 0x3e2   : > { %v2160_v22 = vpop.trf.xlu0  ;;  %2627 = vst [vmem:[%s2592_s27 + $0x48] sm:$0xf] (%p3853_p4), %v2626_v5 }
 0x3e6   : > { %v2161_v15 = vpop.trf.xlu0 }
 0x3e7   : > { %v3164_v44 = vpack.c.bf16 %v2161_v15, %v2160_v22 }
 0x3e8   : > { %v2628_v37 = vld [vmem:[%s4740_s21 + $0x28] sm:$0xf] (%p3853_p4)  ;;  %v2630_v40 = vld [vmem:[%s4740_s21 + $0x2c] sm:$0xf] (%p3853_p4) }
 0x3e9   : > { %3223 = vst [vmem:[%s4740_s21 + $0x30] sm:$0xff] %v3164_v44   ;;  %2629 = vst [vmem:[%s2592_s27 + $0x50] sm:$0xf] (%p3853_p4), %v2628_v37 }
 0x3ea   : > { %v2162_v19 = vpop.trf.xlu0  ;;  %2631 = vst [vmem:[%s2592_s27 + $0x58] sm:$0xf] (%p3853_p4), %v2630_v40 }
 0x3eb   : > { %2590 = sbr.rel (!%p3853_p4) target bundleno = 1018 (0x3fa), region = 64 }
 0x3ee   : > { %v2163_v45 = vpop.trf.xlu0 }
 0x3ef   : > { %v3169_v46 = vpack.c.bf16 %v2163_v45, %v2162_v19 }
 0x3f0   : > { %v2632_v61 = vld [vmem:[%s4740_s21 + $0x30] sm:$0xf] (%p3853_p4)  ;;  %v2634_v48 = vld [vmem:[%s4740_s21 + $0x34] sm:$0xf] (%p3853_p4) }
 0x3f1   : > { %3224 = vst [vmem:[%s4740_s21 + $0x38] sm:$0xff] %v3169_v46   ;;  %2633 = vst [vmem:[%s2592_s27 + $0x60] sm:$0xf] (%p3853_p4), %v2632_v61 }
 0x3f2   : > { %2635 = vst [vmem:[%s2592_s27 + $0x68] sm:$0xf] %v2634_v48 }
 0x3f8   : > { %v2636_v11 = vld [vmem:[%s4740_s21 + $0x38] sm:$0xf]  ;;  %v2638_v3 = vld [vmem:[%s4740_s21 + $0x3c] sm:$0xf] }
 0x3f9   : > { %2637 = vst [vmem:[%s2592_s27 + $0x70] sm:$0xf] %v2636_v11  ;;  %2639 = vst [vmem:[%s2592_s27 + $0x78] sm:$0xf] %v2638_v3 }
 0x3fa PF: > { %p20_p8 = scmp.ge.s32.totalorder %s3843_s25, 4   ;;  %s4808_s21 = smov %s3756_s22 }
 0x3fb   : > { %s4809_s22 = smov %s3851_s28  ;;  %s4810_s23 = smov %s3843_s25 }
 0x3fc   :  { %22 = sbr.rel (!%p20_p8) target bundleno = 2 (0x2), region = 166 }

</bundles_post_ra>
